<compile_context>
chip_gen: v7x
topology: tpu7x:2x2x1
jax: 0.10.0
libtpu: 0.0.40
codegen_flags: <defaults>
</compile_context>

<pallas_src>
import functools

import jax
import jax.numpy as jnp
from jax.experimental import pallas as pl
from jax.experimental.pallas import tpu as pltpu


# ----------------------------------------------------------------------------
# Fused kernel: one grid step == one independent batch of `B` rows.
# ----------------------------------------------------------------------------
def _mlp_g_kernel(
    nz_ref, sf_ref, ct_ref,            # per-step data blocks (B, *)
    w256_ref, w512_ref, w128_ref, w768_ref,   # packed bf16 weights (resident)
    p_ref,                             # (11, 768) f32 bias / gamma / beta table
    o_ref,                             # (B, 128) output block
    *, input_dim, noise_dim, ct2_row, mg2_row, out_row, eps, slope,
):
    def dot(x_f32, w_bf16):
        # bf16 x bf16 on the MXU, f32 accumulation.
        return jnp.dot(x_f32.astype(jnp.bfloat16), w_bf16,
                       preferred_element_type=jnp.float32)

    def leaky(h):
        return jnp.where(h > 0, h, slope * h)

    def bn(h, gamma, beta):
        # Training-mode BatchNorm1d over this grid step's batch.  The Linear
        # bias preceding BN cancels exactly with the batch-mean subtraction,
        # so it is never added (dead parameter, removed).
        mean = jnp.mean(h, axis=0, keepdims=True)
        var = jnp.mean((h - mean) ** 2, axis=0, keepdims=True)
        return (h - mean) * jax.lax.rsqrt(var + eps) * gamma + beta

    p = p_ref[...]                               # (11, 768) f32, tiny

    # --- shortform branch: Linear->LReLU, Linear->BN->LReLU ------------------
    sf_h = leaky(dot(sf_ref[...], w256_ref[0:128, :]) + p[0:1, 0:256])
    sf_h = leaky(bn(dot(sf_h, w256_ref[128:384, :]),
                    p[1:2, 0:256], p[2:3, 0:256]))                    # (B, 256)

    # --- context branch: Linear->LReLU, Linear->BN->LReLU --------------------
    ct_h = leaky(dot(ct_ref[...], w512_ref[0:input_dim, :]) + p[3:4, 0:512])
    ct_h = leaky(bn(dot(ct_h, w512_ref[ct2_row:ct2_row + 512, :]),
                    p[4:5, 0:512], p[5:6, 0:512]))                    # (B, 512)

    # --- noise branch: Linear->LReLU ------------------------------------------
    nz_h = leaky(dot(nz_ref[...], w128_ref[0:noise_dim, :]) + p[6:7, 0:128])
                                                                      # (B, 128)

    # --- merge layer 1: torch.cat eliminated -> three dots into one f32 tile --
    h = leaky(dot(sf_h, w768_ref[0:256, :])
              + dot(ct_h, w768_ref[256:768, :])
              + dot(nz_h, w768_ref[768:896, :])
              + p[7:8, :])                                            # (B, 768)

    # --- merge layer 2: Linear->BN->LReLU -------------------------------------
    h = leaky(bn(dot(h, w512_ref[mg2_row:mg2_row + 768, :]),
                 p[8:9, 0:512], p[9:10, 0:512]))                      # (B, 512)

    # --- output Linear (no activation) ----------------------------------------
    o_ref[...] = (dot(h, w128_ref[out_row:out_row + 512, :])
                  + p[10:11, 0:128]).astype(o_ref.dtype)


def mlp_g_forward(packed, noise_z, sf, cont, *, batch_per_step, eps=1e-5, slope=0.2):
    total, noise_dim = noise_z.shape
    sf_dim = sf.shape[1]
    input_dim = cont.shape[1]
    assert sf_dim == 128, "shortform branch input is fixed at 128 by the module"
    assert total % batch_per_step == 0, "stack whole batches of batch_per_step rows"
    B = batch_per_step
    G = total // B

    w256, w512, w128, w768, ptab = (packed[k] for k in
                                    ("w256", "w512", "w128", "w768", "ptab"))

    kernel = functools.partial(
        _mlp_g_kernel,
        input_dim=input_dim, noise_dim=noise_dim,
        ct2_row=packed["ct2_row"], mg2_row=packed["mg2_row"],
        out_row=packed["out_row"], eps=eps, slope=slope)

    def data_spec(d):
        # one independent batch of B rows per grid step
        return pl.BlockSpec((B, d), lambda g: (g, 0))

    def resident_spec(a):
        # constant index_map -> block is revisited, stays VMEM-resident
        return pl.BlockSpec(a.shape, lambda g: (0, 0))

    return pl.pallas_call(
        kernel,
        out_shape=jax.ShapeDtypeStruct((total, 128), jnp.float32),
        grid=(G,),
        in_specs=[data_spec(noise_dim), data_spec(sf_dim), data_spec(input_dim),
                  resident_spec(w256), resident_spec(w512),
                  resident_spec(w128), resident_spec(w768),
                  resident_spec(ptab)],
        out_specs=pl.BlockSpec((B, 128), lambda g: (g, 0)),
        compiler_params=pltpu.CompilerParams(
            # batches are independent -> megacore split on v7x
            dimension_semantics=("parallel",),
            vmem_limit_bytes=32 * 1024 * 1024,   # ~6 MB working set; ample headroom
        ),
    )(noise_z, sf, cont, w256, w512, w128, w768, ptab)


# ----------------------------------------------------------------------------
# Parameter construction (mirrors MLP_G.__init__ / init_weights)
# ----------------------------------------------------------------------------
def make_mlp_g_params(input_dim, noise_dim, seed=0):
    keys = iter(jax.random.split(jax.random.PRNGKey(seed), 16))
    std = 0.02

    def lin_w(kin, kout):
        # init_weights: weight ~ N(0, 0.02); stored transposed (in, out).
        return jax.random.normal(next(keys), (kin, kout), jnp.float32) * std

    def bn_gamma(n):
        # NOTE (review concern): the reference module's init_weights hits the
        # BatchNorm `weight` too, so gamma ~ N(0, 0.02) (not the usual N(1, .02)).
        return jax.random.normal(next(keys), (n,), jnp.float32) * std

    z = lambda n: jnp.zeros((n,), jnp.float32)

    p = {}
    # shortform_layer: [128, 256, 256]
    p["sf_w1"] = lin_w(128, 256); p["sf_b1"] = z(256)
    p["sf_w2"] = lin_w(256, 256); p["sf_g2"] = bn_gamma(256); p["sf_be2"] = z(256)
    # context_layer: [input_dim, 512, 512]
    p["ct_w1"] = lin_w(input_dim, 512); p["ct_b1"] = z(512)
    p["ct_w2"] = lin_w(512, 512); p["ct_g2"] = bn_gamma(512); p["ct_be2"] = z(512)
    # noise_layer: [noise_dim, 128] — NOT touched by init_weights: PyTorch default
    k = 1.0 / jnp.sqrt(jnp.float32(noise_dim))
    p["nz_w1"] = jax.random.uniform(next(keys), (noise_dim, 128), jnp.float32, -k, k)
    p["nz_b1"] = jax.random.uniform(next(keys), (128,), jnp.float32, -k, k)
    # merge_layer: [896, 768, 512] + output Linear(512, 128)
    p["mg_w1"] = lin_w(896, 768); p["mg_b1"] = z(768)
    p["mg_w2"] = lin_w(768, 512); p["mg_g2"] = bn_gamma(512); p["mg_be2"] = z(512)
    p["out_w"] = lin_w(512, 128); p["out_b"] = z(128)
    return p


def pack_mlp_g_params(raw, input_dim, noise_dim):
    """Pack raw params into the fused kernel's 8-operand layout."""
    bf16 = jnp.bfloat16
    r16 = lambda n: ((n + 15) // 16) * 16   # bf16 sublane pack -> 16-row alignment

    ct2_row = r16(input_dim)          # start row of ct_w2 inside w512
    mg2_row = ct2_row + 512           # start row of mg_w2 inside w512
    out_row = r16(noise_dim)          # start row of out_w inside w128

    def pad_rows(w, rows):
        extra = rows - w.shape[0]
        return jnp.pad(w, ((0, extra), (0, 0))) if extra else w

    w256 = jnp.concatenate([raw["sf_w1"], raw["sf_w2"]], axis=0).astype(bf16)
    w512 = jnp.concatenate([pad_rows(raw["ct_w1"], ct2_row),
                            raw["ct_w2"], raw["mg_w2"]], axis=0).astype(bf16)
    w128 = jnp.concatenate([pad_rows(raw["nz_w1"], out_row),
                            raw["out_w"]], axis=0).astype(bf16)
    w768 = raw["mg_w1"].astype(bf16)

    # (11, 768) f32 param table: biases, BN gammas, BN betas.  Dead biases of
    # the BN-preceded Linears are not stored at all.
    ptab = jnp.zeros((11, 768), jnp.float32)
    ptab = ptab.at[0, 0:256].set(raw["sf_b1"])
    ptab = ptab.at[1, 0:256].set(raw["sf_g2"])
    ptab = ptab.at[2, 0:256].set(raw["sf_be2"])
    ptab = ptab.at[3, 0:512].set(raw["ct_b1"])
    ptab = ptab.at[4, 0:512].set(raw["ct_g2"])
    ptab = ptab.at[5, 0:512].set(raw["ct_be2"])
    ptab = ptab.at[6, 0:128].set(raw["nz_b1"])
    ptab = ptab.at[7, 0:768].set(raw["mg_b1"])
    ptab = ptab.at[8, 0:512].set(raw["mg_g2"])
    ptab = ptab.at[9, 0:512].set(raw["mg_be2"])
    ptab = ptab.at[10, 0:128].set(raw["out_b"])

    return {"w256": w256, "w512": w512, "w128": w128, "w768": w768, "ptab": ptab,
            "ct2_row": ct2_row, "mg2_row": mg2_row, "out_row": out_row}


# ----------------------------------------------------------------------------
# Pure-JAX reference (same bf16 precision recipe, per-batch BN) for checking
# ----------------------------------------------------------------------------
def mlp_g_reference(raw, noise_z, sf, cont, *, batch_per_step, eps=1e-5, slope=0.2):
    def dot(x, w):
        return jnp.dot(x.astype(jnp.bfloat16), w.astype(jnp.bfloat16),
                       preferred_element_type=jnp.float32)

    def leaky(h):
        return jnp.where(h > 0, h, slope * h)

    def bn(h, g, b):
        m = jnp.mean(h, axis=0, keepdims=True)
        v = jnp.mean((h - m) ** 2, axis=0, keepdims=True)
        return (h - m) * jax.lax.rsqrt(v + eps) * g + b

    def one_batch(nz, s, c):
        sf_h = leaky(dot(s, raw["sf_w1"]) + raw["sf_b1"])
        sf_h = leaky(bn(dot(sf_h, raw["sf_w2"]), raw["sf_g2"], raw["sf_be2"]))
        ct_h = leaky(dot(c, raw["ct_w1"]) + raw["ct_b1"])
        ct_h = leaky(bn(dot(ct_h, raw["ct_w2"]), raw["ct_g2"], raw["ct_be2"]))
        nz_h = leaky(dot(nz, raw["nz_w1"]) + raw["nz_b1"])
        x = jnp.concatenate([sf_h, ct_h, nz_h], axis=1)
        h = leaky(dot(x, raw["mg_w1"]) + raw["mg_b1"])
        h = leaky(bn(dot(h, raw["mg_w2"]), raw["mg_g2"], raw["mg_be2"]))
        return dot(h, raw["out_w"]) + raw["out_b"]

    B = batch_per_step
    G = noise_z.shape[0] // B
    outs = [one_batch(noise_z[g * B:(g + 1) * B], sf[g * B:(g + 1) * B],
                      cont[g * B:(g + 1) * B]) for g in range(G)]
    return jnp.concatenate(outs, axis=0)


if __name__ == "__main__":
    # Small, forward-consistent shapes.  Four independent batches of 8 rows are
    # stacked so the single pallas_call amortizes the resident weights 4x.
    batch_per_step = 8
    num_batches = 4
    total = batch_per_step * num_batches
    input_dim = 64     # context feature dim
    noise_dim = 32
    sf_dim = 128       # fixed by the module

    key = jax.random.PRNGKey(0)
    k1, k2, k3 = jax.random.split(key, 3)
    noise_z = jax.random.normal(k1, (total, noise_dim), jnp.float32)
    sf = jax.random.normal(k2, (total, sf_dim), jnp.float32)
    cont = jax.random.normal(k3, (total, input_dim), jnp.float32)

    raw = make_mlp_g_params(input_dim, noise_dim, seed=0)
    packed = pack_mlp_g_params(raw, input_dim, noise_dim)

    out = mlp_g_forward(packed, noise_z, sf, cont, batch_per_step=batch_per_step)
    out = jax.block_until_ready(out)

    assert out.shape == (total, 128), out.shape
    assert bool(jnp.all(jnp.isfinite(out)))

    ref = jax.block_until_ready(
        mlp_g_reference(raw, noise_z, sf, cont, batch_per_step=batch_per_step))
    max_err = float(jnp.max(jnp.abs(out - ref)))
    scale = float(jnp.max(jnp.abs(ref))) + 1e-6
    assert max_err <= 5e-2 * scale + 1e-4, (max_err, scale)

    # TODO(synk): BatchNorm1d running_mean/running_var momentum updates are not
    # tracked; this is a pure training-mode (batch-statistic) forward pass.
    print("KERNEL_OK")
</pallas_src>

<mosaic_0001>
module attributes {stable_mosaic.version = 11 : i64} {
  func.func @_mlp_g_kernel(%arg0: i32, %arg1: memref<8x32xf32, #tpu.memory_space<vmem>>, %arg2: memref<8x128xf32, #tpu.memory_space<vmem>>, %arg3: memref<8x64xf32, #tpu.memory_space<vmem>>, %arg4: memref<384x256xbf16, #tpu.memory_space<vmem>>, %arg5: memref<1344x512xbf16, #tpu.memory_space<vmem>>, %arg6: memref<544x128xbf16, #tpu.memory_space<vmem>>, %arg7: memref<896x768xbf16, #tpu.memory_space<vmem>>, %arg8: memref<11x768xf32, #tpu.memory_space<vmem>>, %arg9: memref<8x128xf32, #tpu.memory_space<vmem>>) attributes {dimension_semantics = [#tpu.dimension_semantics<parallel>], iteration_bounds = array<i64: 4>, scalar_prefetch = 0 : i64, scratch_operands = 0 : i64, tpu.core_type = #tpu.core_type<tc>, window_params = [{transform_indices = @transform_0, window_bounds = array<i64: 8, 32>}, {transform_indices = @transform_1, window_bounds = array<i64: 8, 128>}, {transform_indices = @transform_2, window_bounds = array<i64: 8, 64>}, {pipeline_mode = #tpu.pipeline_mode<synchronous>, transform_indices = @transform_3, window_bounds = array<i64: 384, 256>}, {pipeline_mode = #tpu.pipeline_mode<synchronous>, transform_indices = @transform_4, window_bounds = array<i64: 1344, 512>}, {pipeline_mode = #tpu.pipeline_mode<synchronous>, transform_indices = @transform_5, window_bounds = array<i64: 544, 128>}, {pipeline_mode = #tpu.pipeline_mode<synchronous>, transform_indices = @transform_6, window_bounds = array<i64: 896, 768>}, {pipeline_mode = #tpu.pipeline_mode<synchronous>, transform_indices = @transform_7, window_bounds = array<i64: 11, 768>}, {transform_indices = @transform_8, window_bounds = array<i64: 8, 128>}]} {
    %c0 = arith.constant 0 : index
    %c0_0 = arith.constant 0 : index
    %0 = vector.load %arg8[%c0, %c0_0] : memref<11x768xf32, #tpu.memory_space<vmem>>, vector<11x768xf32>
    %c0_1 = arith.constant 0 : index
    %c0_2 = arith.constant 0 : index
    %1 = vector.load %arg2[%c0_1, %c0_2] : memref<8x128xf32, #tpu.memory_space<vmem>>, vector<8x128xf32>
    %c0_3 = arith.constant 0 : index
    %c0_4 = arith.constant 0 : index
    %2 = vector.load %arg4[%c0_3, %c0_4] : memref<384x256xbf16, #tpu.memory_space<vmem>>, vector<128x256xbf16>
    %3 = arith.truncf %1 : vector<8x128xf32> to vector<8x128xbf16>
    %cst = arith.constant dense<0.000000e+00> : vector<8x256xf32>
    %4 = tpu.matmul %3, %2, %cst {dimension_numbers = #tpu.dot_dimension_numbers<[1], [0], [0], [1], [0, 0, 1, 1], [], []>} : vector<8x128xbf16>, vector<128x256xbf16>, vector<8x256xf32> -> vector<8x256xf32>
    %5 = vector.extract_strided_slice %0 {offsets = [0, 0], sizes = [1, 256], strides = [1, 1]} : vector<11x768xf32> to vector<1x256xf32>
    %6 = vector.broadcast %5 : vector<1x256xf32> to vector<8x256xf32>
    %7 = arith.addf %4, %6 : vector<8x256xf32>
    %cst_5 = arith.constant 0.000000e+00 : f32
    %8 = vector.broadcast %cst_5 : f32 to vector<8x256xf32>
    %9 = arith.cmpf ogt, %7, %8 : vector<8x256xf32>
    %cst_6 = arith.constant 2.000000e-01 : f32
    %10 = vector.broadcast %cst_6 : f32 to vector<8x256xf32>
    %11 = arith.mulf %10, %7 : vector<8x256xf32>
    %12 = arith.select %9, %7, %11 : vector<8x256xi1>, vector<8x256xf32>
    %c128 = arith.constant 128 : index
    %c0_7 = arith.constant 0 : index
    %13 = vector.load %arg4[%c128, %c0_7] : memref<384x256xbf16, #tpu.memory_space<vmem>>, vector<256x256xbf16>
    %14 = arith.truncf %12 : vector<8x256xf32> to vector<8x256xbf16>
    %cst_8 = arith.constant dense<0.000000e+00> : vector<8x256xf32>
    %15 = tpu.matmul %14, %13, %cst_8 {dimension_numbers = #tpu.dot_dimension_numbers<[1], [0], [0], [1], [0, 0, 1, 1], [], []>} : vector<8x256xbf16>, vector<256x256xbf16>, vector<8x256xf32> -> vector<8x256xf32>
    %16 = vector.extract_strided_slice %0 {offsets = [1, 0], sizes = [1, 256], strides = [1, 1]} : vector<11x768xf32> to vector<1x256xf32>
    %17 = vector.extract_strided_slice %0 {offsets = [2, 0], sizes = [1, 256], strides = [1, 1]} : vector<11x768xf32> to vector<1x256xf32>
    %cst_9 = arith.constant dense<0.000000e+00> : vector<256xf32>
    %18 = vector.multi_reduction <add>, %15, %cst_9 [0] : vector<8x256xf32> to vector<256xf32>
    %19 = vector.shape_cast %18 : vector<256xf32> to vector<1x256xf32>
    %cst_10 = arith.constant 8.000000e+00 : f32
    %20 = vector.broadcast %cst_10 : f32 to vector<1x256xf32>
    %21 = arith.divf %19, %20 : vector<1x256xf32>
    %22 = vector.broadcast %21 : vector<1x256xf32> to vector<8x256xf32>
    %23 = arith.subf %15, %22 : vector<8x256xf32>
    %24 = arith.mulf %23, %23 : vector<8x256xf32>
    %cst_11 = arith.constant dense<0.000000e+00> : vector<256xf32>
    %25 = vector.multi_reduction <add>, %24, %cst_11 [0] : vector<8x256xf32> to vector<256xf32>
    %26 = vector.shape_cast %25 : vector<256xf32> to vector<1x256xf32>
    %cst_12 = arith.constant 8.000000e+00 : f32
    %27 = vector.broadcast %cst_12 : f32 to vector<1x256xf32>
    %28 = arith.divf %26, %27 : vector<1x256xf32>
    %29 = vector.broadcast %21 : vector<1x256xf32> to vector<8x256xf32>
    %30 = arith.subf %15, %29 : vector<8x256xf32>
    %cst_13 = arith.constant 9.99999974E-6 : f32
    %31 = vector.broadcast %cst_13 : f32 to vector<1x256xf32>
    %32 = arith.addf %28, %31 : vector<1x256xf32>
    %33 = math.rsqrt %32 : vector<1x256xf32>
    %34 = vector.broadcast %33 : vector<1x256xf32> to vector<8x256xf32>
    %35 = arith.mulf %30, %34 : vector<8x256xf32>
    %36 = vector.broadcast %16 : vector<1x256xf32> to vector<8x256xf32>
    %37 = arith.mulf %35, %36 : vector<8x256xf32>
    %38 = vector.broadcast %17 : vector<1x256xf32> to vector<8x256xf32>
    %39 = arith.addf %37, %38 : vector<8x256xf32>
    %cst_14 = arith.constant 0.000000e+00 : f32
    %40 = vector.broadcast %cst_14 : f32 to vector<8x256xf32>
    %41 = arith.cmpf ogt, %39, %40 : vector<8x256xf32>
    %cst_15 = arith.constant 2.000000e-01 : f32
    %42 = vector.broadcast %cst_15 : f32 to vector<8x256xf32>
    %43 = arith.mulf %42, %39 : vector<8x256xf32>
    %44 = arith.select %41, %39, %43 : vector<8x256xi1>, vector<8x256xf32>
    %c0_16 = arith.constant 0 : index
    %c0_17 = arith.constant 0 : index
    %45 = vector.load %arg3[%c0_16, %c0_17] : memref<8x64xf32, #tpu.memory_space<vmem>>, vector<8x64xf32>
    %c0_18 = arith.constant 0 : index
    %c0_19 = arith.constant 0 : index
    %46 = vector.load %arg5[%c0_18, %c0_19] : memref<1344x512xbf16, #tpu.memory_space<vmem>>, vector<64x512xbf16>
    %47 = arith.truncf %45 : vector<8x64xf32> to vector<8x64xbf16>
    %cst_20 = arith.constant dense<0.000000e+00> : vector<8x512xf32>
    %48 = tpu.matmul %47, %46, %cst_20 {dimension_numbers = #tpu.dot_dimension_numbers<[1], [0], [0], [1], [0, 0, 1, 1], [], []>} : vector<8x64xbf16>, vector<64x512xbf16>, vector<8x512xf32> -> vector<8x512xf32>
    %49 = vector.extract_strided_slice %0 {offsets = [3, 0], sizes = [1, 512], strides = [1, 1]} : vector<11x768xf32> to vector<1x512xf32>
    %50 = vector.broadcast %49 : vector<1x512xf32> to vector<8x512xf32>
    %51 = arith.addf %48, %50 : vector<8x512xf32>
    %cst_21 = arith.constant 0.000000e+00 : f32
    %52 = vector.broadcast %cst_21 : f32 to vector<8x512xf32>
    %53 = arith.cmpf ogt, %51, %52 : vector<8x512xf32>
    %cst_22 = arith.constant 2.000000e-01 : f32
    %54 = vector.broadcast %cst_22 : f32 to vector<8x512xf32>
    %55 = arith.mulf %54, %51 : vector<8x512xf32>
    %56 = arith.select %53, %51, %55 : vector<8x512xi1>, vector<8x512xf32>
    %c64 = arith.constant 64 : index
    %c0_23 = arith.constant 0 : index
    %57 = vector.load %arg5[%c64, %c0_23] : memref<1344x512xbf16, #tpu.memory_space<vmem>>, vector<512x512xbf16>
    %58 = arith.truncf %56 : vector<8x512xf32> to vector<8x512xbf16>
    %cst_24 = arith.constant dense<0.000000e+00> : vector<8x512xf32>
    %59 = tpu.matmul %58, %57, %cst_24 {dimension_numbers = #tpu.dot_dimension_numbers<[1], [0], [0], [1], [0, 0, 1, 1], [], []>} : vector<8x512xbf16>, vector<512x512xbf16>, vector<8x512xf32> -> vector<8x512xf32>
    %60 = vector.extract_strided_slice %0 {offsets = [4, 0], sizes = [1, 512], strides = [1, 1]} : vector<11x768xf32> to vector<1x512xf32>
    %61 = vector.extract_strided_slice %0 {offsets = [5, 0], sizes = [1, 512], strides = [1, 1]} : vector<11x768xf32> to vector<1x512xf32>
    %cst_25 = arith.constant dense<0.000000e+00> : vector<512xf32>
    %62 = vector.multi_reduction <add>, %59, %cst_25 [0] : vector<8x512xf32> to vector<512xf32>
    %63 = vector.shape_cast %62 : vector<512xf32> to vector<1x512xf32>
    %cst_26 = arith.constant 8.000000e+00 : f32
    %64 = vector.broadcast %cst_26 : f32 to vector<1x512xf32>
    %65 = arith.divf %63, %64 : vector<1x512xf32>
    %66 = vector.broadcast %65 : vector<1x512xf32> to vector<8x512xf32>
    %67 = arith.subf %59, %66 : vector<8x512xf32>
    %68 = arith.mulf %67, %67 : vector<8x512xf32>
    %cst_27 = arith.constant dense<0.000000e+00> : vector<512xf32>
    %69 = vector.multi_reduction <add>, %68, %cst_27 [0] : vector<8x512xf32> to vector<512xf32>
    %70 = vector.shape_cast %69 : vector<512xf32> to vector<1x512xf32>
    %cst_28 = arith.constant 8.000000e+00 : f32
    %71 = vector.broadcast %cst_28 : f32 to vector<1x512xf32>
    %72 = arith.divf %70, %71 : vector<1x512xf32>
    %73 = vector.broadcast %65 : vector<1x512xf32> to vector<8x512xf32>
    %74 = arith.subf %59, %73 : vector<8x512xf32>
    %cst_29 = arith.constant 9.99999974E-6 : f32
    %75 = vector.broadcast %cst_29 : f32 to vector<1x512xf32>
    %76 = arith.addf %72, %75 : vector<1x512xf32>
    %77 = math.rsqrt %76 : vector<1x512xf32>
    %78 = vector.broadcast %77 : vector<1x512xf32> to vector<8x512xf32>
    %79 = arith.mulf %74, %78 : vector<8x512xf32>
    %80 = vector.broadcast %60 : vector<1x512xf32> to vector<8x512xf32>
    %81 = arith.mulf %79, %80 : vector<8x512xf32>
    %82 = vector.broadcast %61 : vector<1x512xf32> to vector<8x512xf32>
    %83 = arith.addf %81, %82 : vector<8x512xf32>
    %cst_30 = arith.constant 0.000000e+00 : f32
    %84 = vector.broadcast %cst_30 : f32 to vector<8x512xf32>
    %85 = arith.cmpf ogt, %83, %84 : vector<8x512xf32>
    %cst_31 = arith.constant 2.000000e-01 : f32
    %86 = vector.broadcast %cst_31 : f32 to vector<8x512xf32>
    %87 = arith.mulf %86, %83 : vector<8x512xf32>
    %88 = arith.select %85, %83, %87 : vector<8x512xi1>, vector<8x512xf32>
    %c0_32 = arith.constant 0 : index
    %c0_33 = arith.constant 0 : index
    %89 = vector.load %arg1[%c0_32, %c0_33] : memref<8x32xf32, #tpu.memory_space<vmem>>, vector<8x32xf32>
    %c0_34 = arith.constant 0 : index
    %c0_35 = arith.constant 0 : index
    %90 = vector.load %arg6[%c0_34, %c0_35] : memref<544x128xbf16, #tpu.memory_space<vmem>>, vector<32x128xbf16>
    %91 = arith.truncf %89 : vector<8x32xf32> to vector<8x32xbf16>
    %cst_36 = arith.constant dense<0.000000e+00> : vector<8x128xf32>
    %92 = tpu.matmul %91, %90, %cst_36 {dimension_numbers = #tpu.dot_dimension_numbers<[1], [0], [0], [1], [0, 0, 1, 1], [], []>} : vector<8x32xbf16>, vector<32x128xbf16>, vector<8x128xf32> -> vector<8x128xf32>
    %93 = vector.extract_strided_slice %0 {offsets = [6, 0], sizes = [1, 128], strides = [1, 1]} : vector<11x768xf32> to vector<1x128xf32>
    %94 = vector.broadcast %93 : vector<1x128xf32> to vector<8x128xf32>
    %95 = arith.addf %92, %94 : vector<8x128xf32>
    %cst_37 = arith.constant 0.000000e+00 : f32
    %96 = vector.broadcast %cst_37 : f32 to vector<8x128xf32>
    %97 = arith.cmpf ogt, %95, %96 : vector<8x128xf32>
    %cst_38 = arith.constant 2.000000e-01 : f32
    %98 = vector.broadcast %cst_38 : f32 to vector<8x128xf32>
    %99 = arith.mulf %98, %95 : vector<8x128xf32>
    %100 = arith.select %97, %95, %99 : vector<8x128xi1>, vector<8x128xf32>
    %c0_39 = arith.constant 0 : index
    %c0_40 = arith.constant 0 : index
    %101 = vector.load %arg7[%c0_39, %c0_40] : memref<896x768xbf16, #tpu.memory_space<vmem>>, vector<256x768xbf16>
    %102 = arith.truncf %44 : vector<8x256xf32> to vector<8x256xbf16>
    %cst_41 = arith.constant dense<0.000000e+00> : vector<8x768xf32>
    %103 = tpu.matmul %102, %101, %cst_41 {dimension_numbers = #tpu.dot_dimension_numbers<[1], [0], [0], [1], [0, 0, 1, 1], [], []>} : vector<8x256xbf16>, vector<256x768xbf16>, vector<8x768xf32> -> vector<8x768xf32>
    %c256 = arith.constant 256 : index
    %c0_42 = arith.constant 0 : index
    %104 = vector.load %arg7[%c256, %c0_42] : memref<896x768xbf16, #tpu.memory_space<vmem>>, vector<512x768xbf16>
    %105 = arith.truncf %88 : vector<8x512xf32> to vector<8x512xbf16>
    %cst_43 = arith.constant dense<0.000000e+00> : vector<8x768xf32>
    %106 = tpu.matmul %105, %104, %cst_43 {dimension_numbers = #tpu.dot_dimension_numbers<[1], [0], [0], [1], [0, 0, 1, 1], [], []>} : vector<8x512xbf16>, vector<512x768xbf16>, vector<8x768xf32> -> vector<8x768xf32>
    %107 = arith.addf %103, %106 : vector<8x768xf32>
    %c768 = arith.constant 768 : index
    %c0_44 = arith.constant 0 : index
    %108 = vector.load %arg7[%c768, %c0_44] : memref<896x768xbf16, #tpu.memory_space<vmem>>, vector<128x768xbf16>
    %109 = arith.truncf %100 : vector<8x128xf32> to vector<8x128xbf16>
    %cst_45 = arith.constant dense<0.000000e+00> : vector<8x768xf32>
    %110 = tpu.matmul %109, %108, %cst_45 {dimension_numbers = #tpu.dot_dimension_numbers<[1], [0], [0], [1], [0, 0, 1, 1], [], []>} : vector<8x128xbf16>, vector<128x768xbf16>, vector<8x768xf32> -> vector<8x768xf32>
    %111 = arith.addf %107, %110 : vector<8x768xf32>
    %112 = vector.extract_strided_slice %0 {offsets = [7, 0], sizes = [1, 768], strides = [1, 1]} : vector<11x768xf32> to vector<1x768xf32>
    %113 = vector.broadcast %112 : vector<1x768xf32> to vector<8x768xf32>
    %114 = arith.addf %111, %113 : vector<8x768xf32>
    %cst_46 = arith.constant 0.000000e+00 : f32
    %115 = vector.broadcast %cst_46 : f32 to vector<8x768xf32>
    %116 = arith.cmpf ogt, %114, %115 : vector<8x768xf32>
    %cst_47 = arith.constant 2.000000e-01 : f32
    %117 = vector.broadcast %cst_47 : f32 to vector<8x768xf32>
    %118 = arith.mulf %117, %114 : vector<8x768xf32>
    %119 = arith.select %116, %114, %118 : vector<8x768xi1>, vector<8x768xf32>
    %c576 = arith.constant 576 : index
    %c0_48 = arith.constant 0 : index
    %120 = vector.load %arg5[%c576, %c0_48] : memref<1344x512xbf16, #tpu.memory_space<vmem>>, vector<768x512xbf16>
    %121 = arith.truncf %119 : vector<8x768xf32> to vector<8x768xbf16>
    %cst_49 = arith.constant dense<0.000000e+00> : vector<8x512xf32>
    %122 = tpu.matmul %121, %120, %cst_49 {dimension_numbers = #tpu.dot_dimension_numbers<[1], [0], [0], [1], [0, 0, 1, 1], [], []>} : vector<8x768xbf16>, vector<768x512xbf16>, vector<8x512xf32> -> vector<8x512xf32>
    %123 = vector.extract_strided_slice %0 {offsets = [8, 0], sizes = [1, 512], strides = [1, 1]} : vector<11x768xf32> to vector<1x512xf32>
    %124 = vector.extract_strided_slice %0 {offsets = [9, 0], sizes = [1, 512], strides = [1, 1]} : vector<11x768xf32> to vector<1x512xf32>
    %cst_50 = arith.constant dense<0.000000e+00> : vector<512xf32>
    %125 = vector.multi_reduction <add>, %122, %cst_50 [0] : vector<8x512xf32> to vector<512xf32>
    %126 = vector.shape_cast %125 : vector<512xf32> to vector<1x512xf32>
    %cst_51 = arith.constant 8.000000e+00 : f32
    %127 = vector.broadcast %cst_51 : f32 to vector<1x512xf32>
    %128 = arith.divf %126, %127 : vector<1x512xf32>
    %129 = vector.broadcast %128 : vector<1x512xf32> to vector<8x512xf32>
    %130 = arith.subf %122, %129 : vector<8x512xf32>
    %131 = arith.mulf %130, %130 : vector<8x512xf32>
    %cst_52 = arith.constant dense<0.000000e+00> : vector<512xf32>
    %132 = vector.multi_reduction <add>, %131, %cst_52 [0] : vector<8x512xf32> to vector<512xf32>
    %133 = vector.shape_cast %132 : vector<512xf32> to vector<1x512xf32>
    %cst_53 = arith.constant 8.000000e+00 : f32
    %134 = vector.broadcast %cst_53 : f32 to vector<1x512xf32>
    %135 = arith.divf %133, %134 : vector<1x512xf32>
    %136 = vector.broadcast %128 : vector<1x512xf32> to vector<8x512xf32>
    %137 = arith.subf %122, %136 : vector<8x512xf32>
    %cst_54 = arith.constant 9.99999974E-6 : f32
    %138 = vector.broadcast %cst_54 : f32 to vector<1x512xf32>
    %139 = arith.addf %135, %138 : vector<1x512xf32>
    %140 = math.rsqrt %139 : vector<1x512xf32>
    %141 = vector.broadcast %140 : vector<1x512xf32> to vector<8x512xf32>
    %142 = arith.mulf %137, %141 : vector<8x512xf32>
    %143 = vector.broadcast %123 : vector<1x512xf32> to vector<8x512xf32>
    %144 = arith.mulf %142, %143 : vector<8x512xf32>
    %145 = vector.broadcast %124 : vector<1x512xf32> to vector<8x512xf32>
    %146 = arith.addf %144, %145 : vector<8x512xf32>
    %cst_55 = arith.constant 0.000000e+00 : f32
    %147 = vector.broadcast %cst_55 : f32 to vector<8x512xf32>
    %148 = arith.cmpf ogt, %146, %147 : vector<8x512xf32>
    %cst_56 = arith.constant 2.000000e-01 : f32
    %149 = vector.broadcast %cst_56 : f32 to vector<8x512xf32>
    %150 = arith.mulf %149, %146 : vector<8x512xf32>
    %151 = arith.select %148, %146, %150 : vector<8x512xi1>, vector<8x512xf32>
    %c32 = arith.constant 32 : index
    %c0_57 = arith.constant 0 : index
    %152 = vector.load %arg6[%c32, %c0_57] : memref<544x128xbf16, #tpu.memory_space<vmem>>, vector<512x128xbf16>
    %153 = arith.truncf %151 : vector<8x512xf32> to vector<8x512xbf16>
    %cst_58 = arith.constant dense<0.000000e+00> : vector<8x128xf32>
    %154 = tpu.matmul %153, %152, %cst_58 {dimension_numbers = #tpu.dot_dimension_numbers<[1], [0], [0], [1], [0, 0, 1, 1], [], []>} : vector<8x512xbf16>, vector<512x128xbf16>, vector<8x128xf32> -> vector<8x128xf32>
    %155 = vector.extract_strided_slice %0 {offsets = [10, 0], sizes = [1, 128], strides = [1, 1]} : vector<11x768xf32> to vector<1x128xf32>
    %156 = vector.broadcast %155 : vector<1x128xf32> to vector<8x128xf32>
    %157 = arith.addf %154, %156 : vector<8x128xf32>
    %c0_59 = arith.constant 0 : index
    %c0_60 = arith.constant 0 : index
    %158 = vector.load %arg9[%c0_59, %c0_60] : memref<8x128xf32, #tpu.memory_space<vmem>>, vector<8x128xf32>
    tpu.vector_store %arg9[%c0_59, %c0_60], %157 {strides = array<i32>} : memref<8x128xf32, #tpu.memory_space<vmem>>, vector<8x128xf32>,
    return
  }
  func.func @transform_0(%arg0: i32) -> (i32, i32) {
    %c0_i32 = arith.constant 0 : i32
    %c0_i32_0 = arith.constant 0 : i32
    return %arg0, %c0_i32 : i32, i32
  }
  func.func @transform_1(%arg0: i32) -> (i32, i32) {
    %c0_i32 = arith.constant 0 : i32
    %c0_i32_0 = arith.constant 0 : i32
    return %arg0, %c0_i32 : i32, i32
  }
  func.func @transform_2(%arg0: i32) -> (i32, i32) {
    %c0_i32 = arith.constant 0 : i32
    %c0_i32_0 = arith.constant 0 : i32
    return %arg0, %c0_i32 : i32, i32
  }
  func.func @transform_3(%arg0: i32) -> (i32, i32) {
    %c0_i32 = arith.constant 0 : i32
    %c0_i32_0 = arith.constant 0 : i32
    %c0_i32_1 = arith.constant 0 : i32
    return %c0_i32, %c0_i32_0 : i32, i32
  }
  func.func @transform_4(%arg0: i32) -> (i32, i32) {
    %c0_i32 = arith.constant 0 : i32
    %c0_i32_0 = arith.constant 0 : i32
    %c0_i32_1 = arith.constant 0 : i32
    return %c0_i32, %c0_i32_0 : i32, i32
  }
  func.func @transform_5(%arg0: i32) -> (i32, i32) {
    %c0_i32 = arith.constant 0 : i32
    %c0_i32_0 = arith.constant 0 : i32
    %c0_i32_1 = arith.constant 0 : i32
    return %c0_i32, %c0_i32_0 : i32, i32
  }
  func.func @transform_6(%arg0: i32) -> (i32, i32) {
    %c0_i32 = arith.constant 0 : i32
    %c0_i32_0 = arith.constant 0 : i32
    %c0_i32_1 = arith.constant 0 : i32
    return %c0_i32, %c0_i32_0 : i32, i32
  }
  func.func @transform_7(%arg0: i32) -> (i32, i32) {
    %c0_i32 = arith.constant 0 : i32
    %c0_i32_0 = arith.constant 0 : i32
    %c0_i32_1 = arith.constant 0 : i32
    return %c0_i32, %c0_i32_0 : i32, i32
  }
  func.func @transform_8(%arg0: i32) -> (i32, i32) {
    %c0_i32 = arith.constant 0 : i32
    %c0_i32_0 = arith.constant 0 : i32
    return %arg0, %c0_i32 : i32, i32
  }
}

</mosaic_0001>

<bundles_post_ra>
// kernel: tpu_custom_call.1
= control target key start
LH: loop header
LB: loop body
LE: loop exit
PB: predicated region body
PF: predicated region fallthrough
CT: control target
= control target key end

     0   :  { %s9989_s0 = inlined_call_operand.hbm [shape: f32[32,32], index: 0, kind: input, shape index: {}]   ;;  %s9990_s1 = inlined_call_operand.hbm [shape: f32[32,128], index: 1, kind: input, shape index: {}]   ;;  %s9991_s2 = inlined_call_operand.hbm [shape: f32[32,64], index: 2, kind: input, shape index: {}]   ;;  %s9992_s3 = inlined_call_operand.hbm [shape: bf16[384,256], index: 3, kind: input, shape index: {}]   ;;  %s9993_s4 = inlined_call_operand.hbm [shape: bf16[1344,512], index: 4, kind: input, shape index: {}]   ;;  %s9994_s5 = inlined_call_operand.hbm [shape: bf16[544,128], index: 5, kind: input, shape index: {}]   ;;  %s9995_s6 = inlined_call_operand.hbm [shape: bf16[896,768], index: 6, kind: input, shape index: {}]   ;;  %s9996_s7 = inlined_call_operand.hbm [shape: f32[11,768], index: 7, kind: input, shape index: {}]   ;;  %s9997_s8 = inlined_call_operand.hbm [shape: f32[32,128], index: 8, kind: output, shape index: {}]  }
   0x1   :  { %10019 = sst [smem:[#allocation29_spill]] %s9990_s1 }
   0x2   :  { %10020 = sst [smem:[#allocation30_spill]] %s9992_s3 }
   0x3   :  { %10021 = sst [smem:[#allocation31_spill]] %s9994_s5 }
   0x4   :  { %10022 = sst [smem:[#allocation32_spill]] %s9997_s8 }
   0x5   :  { %13 = vsyncpa [#allocation3], 0 }
   0x6   :  { %15 = vsyncpa [#allocation3 + $0x1], 0 }
   0x7   :  { %16 = vsyncpa [#allocation6], 0 }
   0x8   :  { %18 = vsyncpa [#allocation6 + $0x1], 0 }
   0x9   :  { %19 = vsyncpa [#allocation9], 0 }
   0xa   :  { %20 = vsyncpa [#allocation12], 0 }
   0xb   :  { %21 = vsyncpa [#allocation15], 0 }
   0xc   :  { %22 = vsyncpa [#allocation4], 0 }
   0xd   :  { %24 = vsyncpa [#allocation4 + $0x1], 0  ;;  %s9402_s27 = smov 0   ;;  %s9404_s28 = smov 0  }
   0xe   :  { %s9406_s29 = smov 0   ;;  %s9408_s30 = smov 0  }
   0xf LB: > { %10023 = sst [smem:[#allocation23_spill]] %s9321_s27  ;;  %s9335_s9 = smov [#allocation8]   ;;  %s9333_s30 = sphi %s9408_s30, %s10061_s30   ;;  %s9329_s29 = sphi %s9406_s29, %s10065_s29   ;;  %s9325_s28 = sphi %s9404_s28, %s10064_s28   ;;  %s9321_s27 = sphi %s9402_s27, %s10063_s27  }
  0x10   : > { %10024 = sst [smem:[#allocation24_spill]] %s9333_s30  ;;  %s256_s10 = sshll.u32 %s9335_s9, 4  ;;  %s9428_s10 = int_to_ptr.vmem [resolvable:$true] %s256_s10 }
  0x11   : > { %s9423_s11 = sadd.s32 4294967295, %s9333_s30   ;;  %p6896_p0 = scmp.ge.s32.totalorder %s9333_s30, 1 }
  0x12   : > { %p10004_p1 = scmp.eq.s32.totalorder %s9423_s11, 0  ;;  %p244_p2 = scmp.lt.s32.totalorder %s9333_s30, 5 }
  0x13   : > { %s9336_s13 = smov [#allocation11]   ;;  %s10027_s3 = sld [smem:[#allocation30_spill]] }
  0x14   : > { %p9430_p3 = pnand %p6896_p0, %p244_p2  ;;  %s282_s14 = sshll.u32 %s9336_s13, 4  ;;  %s9442_s14 = int_to_ptr.vmem [resolvable:$true] %s282_s14 }
  0x16   : > { %s10025_s12 = scalar_select %p9430_p3, 1, 0 }
  0x17   : > { %p7787_p4 = pneg %p9430_p3 }
  0x19   : > { %p9438_p5 = pnand %p7787_p4, %p10004_p1  ;;  %s9021_s18 = scalar_lea.hbm %s10027_s3, 6144 }
  0x1a   : > { %p9022_p6 = scmp.ne.s32.totalorder %s10027_s3, %s9021_s18  ;;  %p9028_p10 = scmp.lt.u32.totalorder %s9021_s18, %s10027_s3 }
  0x1b   : > { %s10026_s15 = scalar_select %p9438_p5, 1, 0 }
  0x1c   : > { %p9452_p7 = pneg %p9438_p5 }
  0x1e   : > { %s10028_s21 = scalar_select %p9452_p7, 1, 0 }
  0x1f   : > { %p9024_p8 = pnand %p9452_p7, %p9022_p6 }
  0x21   : > { %p9025_p9 = pneg %p9024_p8 }
  0x23   : > { %p9030_p11 = pnand %p9028_p10, %p9025_p9 }
  0x25   : > { %9033 = shalt.err (!%p9030_p11)
}
  0x26   : > { %s9034_s24 = scalar_lea.vmem %s9428_s10, 6144  ;;  %p9042_p2 = scmp.lt.s32.totalorder %s9428_s10, %s9428_s10 }
  0x27   : > { %p9035_p12 = scmp.ne.s32.totalorder %s9428_s10, %s9034_s24  ;;  %p9043_p4 = scmp.lt.s32.totalorder %s9034_s24, %s9034_s24 }
  0x29   : > { %p9037_p13 = pnand %p9035_p12, %p9452_p7  ;;  %p9044_p6 = por %p9043_p4, %p9042_p2 }
  0x2b   : > { %p9038_p0 = pneg %p9037_p13 }
  0x2d   : > { %p9045_p8 = pnand %p9044_p6, %p9038_p0 }
  0x2f   : > { %9048 = shalt.err (!%p9045_p8)
}
  0x30   : > { %s9337_s25 = smov 128   ;;  %s9338_s26 = smov 8  }
  0x31   : > { %7790 = dma.hbm_to_vmem [thread:$0]  (!%p9438_p5), %s10027_s3, 6144, %s9428_s10, [#allocation9], %s9337_s25, %s9337_s25, %s9338_s26  }
  0x32   : > { %s10029_s5 = sld [smem:[#allocation31_spill]] }
  0x38   : > { %s9049_s18 = scalar_lea.hbm %s10029_s5, 4352 }
  0x39   : > { %p9050_p9 = scmp.ne.s32.totalorder %s10029_s5, %s9049_s18  ;;  %p9056_p12 = scmp.lt.u32.totalorder %s9049_s18, %s10029_s5 }
  0x3b   : > { %p9052_p10 = pnand %p9050_p9, %p9452_p7 }
  0x3d   : > { %p9053_p11 = pneg %p9052_p10 }
  0x3f   : > { %p9058_p13 = pnand %p9056_p12, %p9053_p11 }
  0x41   : > { %9061 = shalt.err (!%p9058_p13)
}
  0x42   : > { %s9062_s10 = scalar_lea.vmem %s9442_s14, 4352  ;;  %p9070_p6 = scmp.lt.s32.totalorder %s9442_s14, %s9442_s14 }
  0x43   : > { %p9063_p0 = scmp.ne.s32.totalorder %s9442_s14, %s9062_s10  ;;  %p9071_p8 = scmp.lt.s32.totalorder %s9062_s10, %s9062_s10 }
  0x45   : > { %p9065_p2 = pnand %p9063_p0, %p9452_p7  ;;  %p9072_p9 = por %p9071_p8, %p9070_p6 }
  0x47   : > { %p9066_p4 = pneg %p9065_p2 }
  0x49   : > { %p9073_p10 = pnand %p9072_p9, %p9066_p4 }
  0x4b   : > { %9076 = shalt.err (!%p9073_p10)
}
  0x4c   : > { %s9339_s24 = smov 64   ;;  %s9340_s25 = smov 4  }
  0x4d   : > { %7796 = dma.hbm_to_vmem [thread:$0]  (!%p9438_p5), %s10029_s5, 4352, %s9442_s14, [#allocation12], %s9339_s24, %s9339_s24, %s9340_s25  }
  0x4e   : > { %s6895_s13 = sadd.s32 4294967294, %s9333_s30   ;;  %s9498_s16 = sadd.s32 1, %s9333_s30  }
  0x4f   : > { %10030 = sst [smem:[#allocation25_spill]] %s9498_s16  ;;  %s34_s17 = ssub.s32 %s9333_s30, %s9498_s16 }
  0x50   : > { %s37_s18 = sadd.s32 1, %s9329_s29  ;;  %p35_p11 = scmp.eq.s32.totalorder %s34_s17, 0 }
  0x51   : > { %p44_p12 = scmp.ne.s32.totalorder %s9329_s29, %s9325_s28  ;;  %p45_p13 = scmp.eq.s32.totalorder %s9333_s30, 0 }
  0x52   : > { %p50_p0 = scmp.ne.s32.totalorder %s9325_s28, %s9321_s27  ;;  %p231_p6 = scmp.eq.s32.totalorder %s9423_s11, 3 }
  0x53   : > { %s9509_s19 = scalar_select %p35_p11, %s9329_s29, %s37_s18  }
  0x54   : > { %p46_p2 = por %p45_p13, %p44_p12  ;;  %p9513_p4 = por %p10004_p1, %p50_p0 }
  0x55   : > { %10031 = sst [smem:[#allocation26_spill]] %s9509_s19  ;;  %p237_p8 = scmp.eq.s32.totalorder %s6895_s13, 3 }
  0x56   : > { %s10032_s20 = scalar_select %p9513_p4, 1, 0 }
  0x57   : > { %p7822_p9 = scmp.lt.s32.totalorder %s9333_s30, 4  ;;  %s9999_s14 = sand.u32 1, %s9329_s29  }
  0x58   : > { %p9520_p10 = por %p231_p6, %p44_p12  ;;  %p9524_p3 = por %p237_p8, %p50_p0 }
  0x59   : > { %s9530_s10 = sshll.u32 %s9999_s14, 3  ;;  %s9533_s24 = sshll.u32 %s9333_s30, 7 }
  0x5a   : > { %s10033_s22 = scalar_select %p9520_p10, 1, 0 }
  0x5b   : > { %s10035_s23 = scalar_select %p9524_p3, 1, 0 }
  0x5c   : > { %10034 = sst [smem:[#allocation27_spill]] %s10033_s22  ;;  %p9535_p11 = pnand %p7822_p9, %p46_p2 }
  0x5d   : > { %10036 = sst [smem:[#allocation28_spill]] %s10035_s23  ;;  %s340_s26 = sand.u32 1, %s9333_s30  }
  0x5e   : > { %s10037_s25 = scalar_select %p9535_p11, 1, 0 }
  0x5f   : > { %s10038_s1 = sld [smem:[#allocation29_spill]]  ;;  %s344_s18 = scalar_lea.vmem [#allocation5], %s9530_s10 }
  0x60   : > { %s351_s14 = sshll.u32 %s344_s18, 4  ;;  %s9341_s3 = smov [#allocation10]   ;;  %s9547_s14 = int_to_ptr.vmem [resolvable:$true] %s351_s14 }
  0x61   : > { %s9549_s5 = sshll.u32 %s9341_s3, 4  ;;  %s9551_s19 = scalar_lea.sflag [#allocation6], %s340_s26  ;;  %s270_s5 = int_to_ptr.vmem [resolvable:$true] %s9549_s5 }
  0x62   : > { %p9557_p13 = pneg %p9535_p11 }
  0x64   : > { %s10039_s9 = scalar_select %p9557_p13, 1, 0 }
  0x65   : > { %s9544_s17 = scalar_lea.hbm %s10038_s1, %s9533_s24  ;;  %s9082_s23 = scalar_lea.hbm %s10038_s1, 512 }
  0x66   : > { %s9077_s16 = scalar_lea.hbm %s9544_s17, 128  ;;  %p9083_p6 = scmp.lt.u32.totalorder %s9544_s17, %s10038_s1 }
  0x67   : > { %p9078_p12 = scmp.ne.s32.totalorder %s9544_s17, %s9077_s16  ;;  %p9084_p8 = scmp.lt.u32.totalorder %s9082_s23, %s9077_s16 }
  0x68   : > { %p9086_p1 = scmp.lt.u32.totalorder %s9077_s16, %s9544_s17 }
  0x69   : > { %p9080_p0 = pnand %p9557_p13, %p9078_p12  ;;  %p9085_p9 = por %p9084_p8, %p9083_p6 }
  0x6b   : > { %p9081_p2 = pneg %p9080_p0  ;;  %p9087_p3 = por %p9086_p1, %p9085_p9 }
  0x6d   : > { %p9088_p10 = pnand %p9087_p3, %p9081_p2 }
  0x6f   : > { %9091 = shalt.err (!%p9088_p10)
}
  0x70   : > { %s9092_s26 = scalar_lea.vmem %s9547_s14, 128  ;;  %s9342_s13 = smov [#allocation5]  }
  0x71   : > { %p9093_p12 = scmp.ne.s32.totalorder %s9547_s14, %s9092_s26  ;;  %s9097_s18 = sshll.u32 %s9342_s13, 4  ;;  %s9098_s18 = int_to_ptr.vmem [resolvable:$false] %s9097_s18 }
  0x72   : > { %s9099_s27 = scalar_lea.vmem %s9098_s18, 256  ;;  %p9100_p5 = scmp.lt.s32.totalorder %s9547_s14, %s9098_s18 }
  0x73   : > { %p9095_p0 = pnand %p9093_p12, %p9557_p13  ;;  %p9101_p7 = scmp.lt.s32.totalorder %s9099_s27, %s9092_s26 }
  0x75   : > { %p9096_p4 = pneg %p9095_p0  ;;  %p9102_p6 = por %p9101_p7, %p9100_p5 }
  0x77   : > { %p9103_p8 = pnand %p9102_p6, %p9096_p4 }
  0x79   : > { %9106 = shalt.err (!%p9103_p8)
}
  0x7a   : > { %7809 = dma.hbm_to_vmem [thread:$0]  (!%p9535_p11), %s9544_s17, 128, %s9547_s14, %s9551_s19  }
  0x7b   : > { %s9107_s3 = scalar_lea.hbm %s9993_s4, 43008  ;;  %p10040_p3 = scmp.ne.s32.totalorder %s10028_s21, 0 }
  0x7c   : > { %p9108_p1 = scmp.ne.s32.totalorder %s9993_s4, %s9107_s3  ;;  %p9114_p4 = scmp.lt.u32.totalorder %s9107_s3, %s9993_s4 }
  0x7e   : > { %p9110_p5 = pnand %p9108_p1, %p10040_p3 }
  0x80   : > { %p9111_p7 = pneg %p9110_p5 }
  0x82   : > { %p9116_p10 = pnand %p9114_p4, %p9111_p7 }
  0x84   : > { %9119 = shalt.err (!%p9116_p10)
}
  0x85   : > { %s9120_s27 = scalar_lea.vmem %s270_s5, 43008  ;;  %p9128_p0 = scmp.lt.s32.totalorder %s270_s5, %s270_s5 }
  0x86   : > { %p9121_p2 = scmp.ne.s32.totalorder %s270_s5, %s9120_s27  ;;  %p9129_p6 = scmp.lt.s32.totalorder %s9120_s27, %s9120_s27 }
  0x88   : > { %p9123_p9 = pnand %p9121_p2, %p10040_p3  ;;  %p9130_p8 = por %p9129_p6, %p9128_p0 }
  0x8a   : > { %p9124_p12 = pneg %p9123_p9 }
  0x8c   : > { %p9131_p11 = pnand %p9130_p8, %p9124_p12 }
  0x8e   : > { %9134 = shalt.err (!%p9131_p11)
}
  0x8f   : > { %s9343_s1 = smov 256   ;;  %s9344_s14 = smov 16  }
  0x90   : > { %p10041_p1 = scmp.ne.s32.totalorder %s10026_s15, 0  ;;  %s9345_s23 = smov [#allocation13]  }
  0x91   : > { %s295_s3 = sshll.u32 %s9345_s23, 4  ;;  %s9135_s18 = scalar_lea.hbm %s9995_s6, 43008  ;;  %s296_s3 = int_to_ptr.vmem [resolvable:$true] %s295_s3 }
  0x92   : > { %7793 = dma.hbm_to_vmem [thread:$0]  (!%p10041_p1), %s9993_s4, 43008, %s270_s5, [#allocation9], %s9343_s1, %s9343_s1, %s9344_s14  }
  0x93   : > { %p9136_p11 = scmp.ne.s32.totalorder %s9995_s6, %s9135_s18  ;;  %p9142_p4 = scmp.lt.u32.totalorder %s9135_s18, %s9995_s6 }
  0x95   : > { %p9138_p5 = pnand %p9136_p11, %p10040_p3 }
  0x97   : > { %p9139_p7 = pneg %p9138_p5 }
  0x99   : > { %p9144_p10 = pnand %p9142_p4, %p9139_p7 }
  0x9b   : > { %9147 = shalt.err (!%p9144_p10)
}
  0x9c   : > { %s9148_s5 = scalar_lea.vmem %s296_s3, 43008  ;;  %p9156_p0 = scmp.lt.s32.totalorder %s296_s3, %s296_s3 }
  0x9d   : > { %p9149_p2 = scmp.ne.s32.totalorder %s296_s3, %s9148_s5  ;;  %p9157_p6 = scmp.lt.s32.totalorder %s9148_s5, %s9148_s5 }
  0x9f   : > { %p9151_p9 = pnand %p9149_p2, %p10040_p3  ;;  %p9158_p8 = por %p9157_p6, %p9156_p0 }
  0xa1   : > { %p9152_p12 = pneg %p9151_p9 }
  0xa3   : > { %p9159_p13 = pnand %p9158_p8, %p9152_p12 }
  0xa5   : > { %9162 = shalt.err (!%p9159_p13)
}
  0xa6   : > { %s9346_s30 = smov 384   ;;  %s9347_s1 = smov 24  }
  0xa7   : > { %7799 = dma.hbm_to_vmem [thread:$0]  (!%p10041_p1), %s9995_s6, 43008, %s296_s3, [#allocation12], %s9346_s30, %s9346_s30, %s9347_s1  }
  0xa8   : > { %s9348_s14 = smov [#allocation14]   ;;  %s9163_s13 = scalar_lea.hbm %s9996_s7, 1536 }
  0xa9   : > { %s308_s17 = sshll.u32 %s9348_s14, 4  ;;  %p9164_p13 = scmp.ne.s32.totalorder %s9996_s7, %s9163_s13  ;;  %s309_s17 = int_to_ptr.vmem [resolvable:$true] %s308_s17 }
  0xaa   : > { %p9170_p7 = scmp.lt.u32.totalorder %s9163_s13, %s9996_s7 }
  0xab   : > { %p9166_p11 = pnand %p9164_p13, %p10040_p3 }
  0xad   : > { %p9167_p5 = pneg %p9166_p11 }
  0xaf   : > { %p9172_p4 = pnand %p9170_p7, %p9167_p5 }
  0xb1   : > { %9175 = shalt.err (!%p9172_p4)
}
  0xb2   : > { %s9176_s3 = scalar_lea.vmem %s309_s17, 1536  ;;  %p9184_p12 = scmp.lt.s32.totalorder %s309_s17, %s309_s17 }
  0xb3   : > { %p9177_p10 = scmp.ne.s32.totalorder %s309_s17, %s9176_s3  ;;  %p9185_p0 = scmp.lt.s32.totalorder %s9176_s3, %s9176_s3 }
  0xb5   : > { %p9179_p2 = pnand %p9177_p10, %p10040_p3  ;;  %p9186_p6 = por %p9185_p0, %p9184_p12 }
  0xb7   : > { %p9180_p9 = pneg %p9179_p2 }
  0xb9   : > { %p9187_p8 = pnand %p9186_p6, %p9180_p9 }
  0xbb   : > { %9190 = shalt.err (!%p9187_p8)
}
  0xbc   : > { %s9349_s30 = smov 768   ;;  %s9350_s1 = smov 48  }
  0xbd   : > { %7802 = dma.hbm_to_vmem [thread:$0]  (!%p10041_p1), %s9996_s7, 1536, %s309_s17, [#allocation15], %s9349_s30, %s9349_s30, %s9350_s1  }
  0xbe   : > { %s9640_s16 = scalar_lea.hbm %s9989_s0, %s9533_s24  ;;  %s326_s23 = scalar_lea.vmem [#allocation2], %s9530_s10 }
  0xbf   : > { %s333_s13 = sshll.u32 %s326_s23, 4  ;;  %s9649_s15 = scalar_lea.hbm %s9991_s2, %s9533_s24  ;;  %s9643_s13 = int_to_ptr.vmem [resolvable:$true] %s333_s13 }
  0xc0   : > { %s10042_s27 = sand.u32 1, %s9329_s29   ;;  %s9191_s5 = scalar_lea.hbm %s9640_s16, 128 }
  0xc1   : > { %s323_s17 = scalar_lea.sflag [#allocation3], %s10042_s27  ;;  %p9192_p3 = scmp.ne.s32.totalorder %s9640_s16, %s9191_s5 }
  0xc2   : > { %p10043_p1 = scmp.ne.s32.totalorder %s10039_s9, 0  ;;  %s9196_s1 = scalar_lea.hbm %s9989_s0, 512 }
  0xc3   : > { %p9197_p5 = scmp.lt.u32.totalorder %s9640_s16, %s9989_s0  ;;  %p9198_p7 = scmp.lt.u32.totalorder %s9196_s1, %s9191_s5 }
  0xc4   : > { %p9194_p13 = pnand %p9192_p3, %p10043_p1  ;;  %p9200_p10 = scmp.lt.u32.totalorder %s9191_s5, %s9640_s16 }
  0xc5   : > { %p9199_p4 = por %p9198_p7, %p9197_p5 }
  0xc6   : > { %p9195_p11 = pneg %p9194_p13 }
  0xc7   : > { %p9201_p2 = por %p9200_p10, %p9199_p4 }
  0xc9   : > { %p9202_p9 = pnand %p9201_p2, %p9195_p11 }
  0xcb   : > { %9205 = shalt.err (!%p9202_p9)
}
  0xcc   : > { %s9206_s24 = scalar_lea.vmem %s9643_s13, 128  ;;  %s9351_s21 = smov [#allocation2]  }
  0xcd   : > { %p9207_p12 = scmp.ne.s32.totalorder %s9643_s13, %s9206_s24  ;;  %s9211_s14 = sshll.u32 %s9351_s21, 4  ;;  %s9212_s14 = int_to_ptr.vmem [resolvable:$false] %s9211_s14 }
  0xce   : > { %s9213_s23 = scalar_lea.vmem %s9212_s14, 256  ;;  %p9214_p8 = scmp.lt.s32.totalorder %s9643_s13, %s9212_s14 }
  0xcf   : > { %p9209_p0 = pnand %p9207_p12, %p10043_p1  ;;  %p9215_p3 = scmp.lt.s32.totalorder %s9213_s23, %s9206_s24 }
  0xd1   : > { %p9210_p6 = pneg %p9209_p0  ;;  %p9216_p13 = por %p9215_p3, %p9214_p8 }
  0xd3   : > { %p9217_p5 = pnand %p9216_p13, %p9210_p6 }
  0xd5   : > { %9220 = shalt.err (!%p9217_p5)
}
  0xd6   : > { %p10044_p11 = scmp.ne.s32.totalorder %s10037_s25, 0  ;;  %s362_s26 = scalar_lea.vmem [#allocation7], %s9530_s10 }
  0xd7   : > { %s369_s18 = sshll.u32 %s362_s26, 4  ;;  %s9221_s27 = scalar_lea.hbm %s9649_s15, 128  ;;  %s370_s18 = int_to_ptr.vmem [resolvable:$true] %s369_s18 }
  0xd8   : > { %7806 = dma.hbm_to_vmem [thread:$0]  (!%p10044_p11), %s9640_s16, 128, %s9643_s13, %s323_s17  }
  0xd9   : > { %p9222_p7 = scmp.ne.s32.totalorder %s9649_s15, %s9221_s27  ;;  %s9226_s30 = scalar_lea.hbm %s9991_s2, 512 }
  0xda   : > { %p9227_p2 = scmp.lt.u32.totalorder %s9649_s15, %s9991_s2  ;;  %p9228_p9 = scmp.lt.u32.totalorder %s9226_s30, %s9221_s27 }
  0xdb   : > { %p9224_p4 = pnand %p9222_p7, %p10043_p1  ;;  %p9230_p0 = scmp.lt.u32.totalorder %s9221_s27, %s9649_s15 }
  0xdc   : > { %p9229_p12 = por %p9228_p9, %p9227_p2 }
  0xdd   : > { %p9225_p10 = pneg %p9224_p4 }
  0xde   : > { %p9231_p6 = por %p9230_p0, %p9229_p12 }
  0xe0   : > { %p9232_p8 = pnand %p9231_p6, %p9225_p10 }
  0xe2   : > { %9235 = shalt.err (!%p9232_p8)
}
  0xe3   : > { %s9236_s10 = scalar_lea.vmem %s370_s18, 128  ;;  %s9352_s16 = smov [#allocation7]  }
  0xe4   : > { %p9237_p3 = scmp.ne.s32.totalorder %s370_s18, %s9236_s10  ;;  %s9241_s13 = sshll.u32 %s9352_s16, 4  ;;  %s9242_s13 = int_to_ptr.vmem [resolvable:$false] %s9241_s13 }
  0xe5   : > { %s9243_s17 = scalar_lea.vmem %s9242_s13, 256  ;;  %p9244_p7 = scmp.lt.s32.totalorder %s370_s18, %s9242_s13 }
  0xe6   : > { %p9239_p13 = pnand %p9237_p3, %p10043_p1  ;;  %p9245_p4 = scmp.lt.s32.totalorder %s9243_s17, %s9236_s10 }
  0xe8   : > { %p9240_p5 = pneg %p9239_p13  ;;  %p9246_p11 = por %p9245_p4, %p9244_p7 }
  0xea   : > { %p9247_p2 = pnand %p9246_p11, %p9240_p5 }
  0xec   : > { %9250 = shalt.err (!%p9247_p2)
}
  0xed   : > { %p10045_p9 = scmp.ne.s32.totalorder %s10037_s25, 0  ;;  %p10046_p10 = scmp.ne.s32.totalorder %s10025_s12, 0 }
  0xee   : > { %s9696_s9 = sand.u32 (!%p10046_p10), 1, %s9325_s28   ;;  %p10047_p1 = scmp.ne.s32.totalorder (!%p10046_p10), %s10032_s20, 0 }
  0xef   : > { %7812 = dma.hbm_to_vmem [thread:$0]  (!%p10045_p9), %s9649_s15, 128, %s370_s18, %s9551_s19  }
  0xf0   : > { %378 = sbr.rel (%p10046_p10) target bundleno = 1991 (0x7c7), region = 52  ;;  %s9699_s22 = sshll.u32 (!%p10046_p10), %s9696_s9, 3 }
  0xf1   : > { %s381_s24 = scalar_lea.sflag (!%p10046_p10), [#allocation3], %s9696_s9  ;;  %s384_s21 = scalar_lea.vmem (!%p10046_p10), [#allocation2], %s9699_s22 }
  0xf7   : > { %9296 = dma.done.wait (%p10047_p1), %s381_s24, 128  }
  0xf8   : > { %9298 = vsyncadd (%p10047_p1), %s381_s24, 4294967168  ;;  %s389_s12 = sand.u32 1, %s9423_s11   ;;  %s393_s25 = scalar_lea.vmem [#allocation5], %s9699_s22 }
  0xf9   : > { %s390_s19 = scalar_lea.sflag [#allocation6], %s389_s12 }
  0xfa   : > { %9300 = dma.done.wait (%p10047_p1), %s390_s19, 256  }
  0xfb   : > { %9302 = vsyncadd (%p10047_p1), %s390_s19, 4294967040  ;;  %s402_s15 = scalar_lea.vmem [#allocation7], %s9699_s22  ;;  %p10048_p11 = scmp.eq.s32.totalorder %s9423_s11, 0 }
  0xfd   : > { %9304 = dma.done.wait (%p10048_p11), [#allocation9], 49152   ;;  %p10049_p12 = pmov %p10048_p11 }
  0xfe   : > { %p10050_p0 = pmov %p10048_p11 }
  0xff   : > { %9306 = vsyncadd (%p10049_p12), [#allocation9], 4294918144 }
 0x100   : > { %9308 = dma.done.wait (%p10050_p0), [#allocation12], 47360   ;;  %p10051_p6 = pmov %p10050_p0 }
 0x101   : > { %p10052_p8 = pmov %p10050_p0 }
 0x102   : > { %9310 = vsyncadd (%p10051_p6), [#allocation12], 4294919936 }
 0x103   : > { %9312 = dma.done.wait (%p10052_p8), [#allocation15], 1536   ;;  %p10053_p3 = pmov %p10050_p0 }
 0x104   : > { %v9353_v0 = vmov 0   ;;  %v7879_v1 = vld [vmem:[#allocation8 + $0x4] ss:$8 sps:$4 sm:$0xff]   ;;  %v7881_v2 = vld [vmem:[#allocation8] ss:$8 sps:$4 sm:$0xff]   ;;  %v929_v40 = vld [vmem:[%s402_s15] sm:$0xff] }
 0x105   : > { %9314 = vsyncadd (%p10053_p3), [#allocation15], 4294965760  ;;  %614 = vmatprep.mubr.bf16.mxu0 %v9353_v0  ;;  %582 = vmatprep.subr.bf16.mxu0 %v7879_v1  ;;  %v7882_v3 = vld [vmem:[#allocation8 + $0x14] ss:$8 sps:$4 sm:$0xff]   ;;  %v7884_v4 = vld [vmem:[#allocation8 + $0x10] ss:$8 sps:$4 sm:$0xff]   ;;  %v946_v43 = vpack.c.bf16 %v929_v40, %v929_v40  ;;  %v494_v40 = vlaneseq }
 0x106   : > { %583 = vmatpush1.bf16.msra.mxu0 %v7881_v2  ;;  %v7885_v5 = vld [vmem:[#allocation8 + $0x24] ss:$8 sps:$4 sm:$0xff]   ;;  %v7887_v6 = vld [vmem:[#allocation8 + $0x20] ss:$8 sps:$4 sm:$0xff]   ;;  %v7888_v7 = vld [vmem:[#allocation8 + $0x34] ss:$8 sps:$4 sm:$0xff]  }
 0x107   : > { %584 = vmatprep.subr.bf16.mxu0 %v7882_v3  ;;  %v7890_v8 = vld [vmem:[#allocation8 + $0x30] ss:$8 sps:$4 sm:$0xff]   ;;  %v7891_v9 = vld [vmem:[#allocation8 + $0x44] ss:$8 sps:$4 sm:$0xff]   ;;  %v7893_v10 = vld [vmem:[#allocation8 + $0x40] ss:$8 sps:$4 sm:$0xff]  }
 0x108   : > { %v7894_v11 = vld [vmem:[#allocation8 + $0x54] ss:$8 sps:$4 sm:$0xff]   ;;  %v7896_v12 = vld [vmem:[#allocation8 + $0x50] ss:$8 sps:$4 sm:$0xff]   ;;  %v7897_v13 = vld [vmem:[#allocation8 + $0x64] ss:$8 sps:$4 sm:$0xff]  }
 0x109   : > { %v7899_v14 = vld [vmem:[#allocation8 + $0x60] ss:$8 sps:$4 sm:$0xff]   ;;  %v7927_v15 = vld [vmem:[#allocation8 + $0x84] ss:$8 sps:$4 sm:$0xff]   ;;  %v7900_v17 = vld [vmem:[#allocation8 + $0x74] ss:$8 sps:$4 sm:$0xff]  }
 0x10a   : > { %585 = vmatpush1.bf16.msra.mxu0 %v7884_v4  ;;  %v7929_v16 = vld [vmem:[#allocation8 + $0x80] ss:$8 sps:$4 sm:$0xff]   ;;  %823 = vmatprep.subr.bf16.mxu1 %v7927_v15  ;;  %v7930_v18 = vld [vmem:[#allocation8 + $0x94] ss:$8 sps:$4 sm:$0xff]   ;;  %v7902_v19 = vld [vmem:[#allocation8 + $0x70] ss:$8 sps:$4 sm:$0xff]  }
 0x10b   : > { %586 = vmatprep.subr.bf16.mxu0 %v7885_v5  ;;  %824 = vmatpush1.bf16.msra.mxu1 %v7929_v16  ;;  %v7932_v20 = vld [vmem:[#allocation8 + $0x90] ss:$8 sps:$4 sm:$0xff]   ;;  %v7933_v21 = vld [vmem:[#allocation8 + $0xa4] ss:$8 sps:$4 sm:$0xff]   ;;  %v7935_v24 = vld [vmem:[#allocation8 + $0xa0] ss:$8 sps:$4 sm:$0xff]  }
 0x10c   : > { %825 = vmatprep.subr.bf16.mxu1 %v7930_v18  ;;  %v476_v22 = vld [vmem:[%s393_s25] sm:$0xff]  ;;  %v7936_v26 = vld [vmem:[#allocation8 + $0xb4] ss:$8 sps:$4 sm:$0xff]   ;;  %v7938_v29 = vld [vmem:[#allocation8 + $0xb0] ss:$8 sps:$4 sm:$0xff]   ;;  %vm1043_vm0 = vcmask 523264  }
 0x10d   : > { %v7905_v23 = vld [vmem:[#allocation10 + $0x4] ss:$16 sps:$4 sm:$0xff]   ;;  %v493_v25 = vpack.c.bf16 %v476_v22, %v476_v22  ;;  %v7903_v27 = vld [vmem:[#allocation10] ss:$16 sps:$4 sm:$0xff]   ;;  %v7917_v41 = vld [vmem:[#allocation10 + $0xc] ss:$16 sps:$4 sm:$0xff]  }
 0x10e   : > { %587 = vmatpush1.bf16.msra.mxu0 %v7887_v6  ;;  %v7908_v28 = vld [vmem:[#allocation10 + $0x24] ss:$16 sps:$4 sm:$0xff]   ;;  %v7906_v31 = vld [vmem:[#allocation10 + $0x20] ss:$16 sps:$4 sm:$0xff]   ;;  %v7915_v45 = vld [vmem:[#allocation10 + $0x8] ss:$16 sps:$4 sm:$0xff]  }
 0x10f   : > { %588 = vmatprep.subr.bf16.mxu0 %v7888_v7  ;;  %826 = vmatpush1.bf16.msra.mxu1 %v7932_v20  ;;  %v7939_v30 = vld [vmem:[#allocation8 + $0xc4] ss:$8 sps:$4 sm:$0xff]   ;;  %v7944_v33 = vld [vmem:[#allocation8 + $0xc0] ss:$8 sps:$4 sm:$0xff]   ;;  %v7945_v34 = vld [vmem:[#allocation8 + $0xd4] ss:$8 sps:$4 sm:$0xff]  }
 0x110   : > { %827 = vmatprep.subr.bf16.mxu1 %v7933_v21  ;;  %v7911_v32 = vld [vmem:[#allocation10 + $0x44] ss:$16 sps:$4 sm:$0xff]   ;;  %v7909_v35 = vld [vmem:[#allocation10 + $0x40] ss:$16 sps:$4 sm:$0xff]   ;;  %v7920_v46 = vld [vmem:[#allocation10 + $0x2c] ss:$16 sps:$4 sm:$0xff]  }
 0x111   : > { %v7914_v36 = vld [vmem:[#allocation10 + $0x64] ss:$16 sps:$4 sm:$0xff]   ;;  %v7950_v37 = vld [vmem:[#allocation8 + $0xd0] ss:$8 sps:$4 sm:$0xff]   ;;  %v7956_v42 = vld [vmem:[#allocation8 + $0xe0] ss:$8 sps:$4 sm:$0xff]  }
 0x112   : > { %589 = vmatpush1.bf16.msra.mxu0 %v7890_v8  ;;  %v7912_v38 = vld [vmem:[#allocation10 + $0x60] ss:$16 sps:$4 sm:$0xff]   ;;  %v7951_v39 = vld [vmem:[#allocation8 + $0xe4] ss:$8 sps:$4 sm:$0xff]   ;;  %v7957_v44 = vld [vmem:[#allocation8 + $0xf4] ss:$8 sps:$4 sm:$0xff]  }
 0x113   : > { %590 = vmatprep.subr.bf16.mxu0 %v7891_v9  ;;  %828 = vmatpush1.bf16.msra.mxu1 %v7935_v24  ;;  %v7962_v47 = vld [vmem:[#allocation8 + $0xf0] ss:$8 sps:$4 sm:$0xff]   ;;  %v7963_v48 = vld [vmem:[#allocation8 + $0x104] ss:$8 sps:$4 sm:$0xff]   ;;  %v7968_v52 = vld [vmem:[#allocation8 + $0x100] ss:$8 sps:$4 sm:$0xff]  }
 0x114   : > { %829 = vmatprep.subr.bf16.mxu1 %v7936_v26  ;;  %v7918_v49 = vld [vmem:[#allocation10 + $0x28] ss:$16 sps:$4 sm:$0xff]   ;;  %v7923_v50 = vld [vmem:[#allocation10 + $0x4c] ss:$16 sps:$4 sm:$0xff]   ;;  %v7943_v58 = vld [vmem:[#allocation10 + $0x84] ss:$16 sps:$4 sm:$0xff]  }
 0x115   : > { %v7921_v51 = vld [vmem:[#allocation10 + $0x48] ss:$16 sps:$4 sm:$0xff]   ;;  %v7926_v53 = vld [vmem:[#allocation10 + $0x6c] ss:$16 sps:$4 sm:$0xff]   ;;  %v7941_v61 = vld [vmem:[#allocation10 + $0x80] ss:$16 sps:$4 sm:$0xff]  }
 0x116   : > { %591 = vmatpush1.bf16.msra.mxu0 %v7893_v10  ;;  %v7969_v54 = vld [vmem:[#allocation8 + $0x114] ss:$8 sps:$4 sm:$0xff]   ;;  %v7974_v55 = vld [vmem:[#allocation8 + $0x110] ss:$8 sps:$4 sm:$0xff]   ;;  %v7975_v56 = vld [vmem:[#allocation8 + $0x124] ss:$8 sps:$4 sm:$0xff]  }
 0x117   : > { %592 = vmatprep.subr.bf16.mxu0 %v7894_v11  ;;  %830 = vmatpush1.bf16.msra.mxu1 %v7938_v29  ;;  %v7924_v57 = vld [vmem:[#allocation10 + $0x68] ss:$16 sps:$4 sm:$0xff]   ;;  %v7981_v60 = vld [vmem:[#allocation8 + $0x134] ss:$8 sps:$4 sm:$0xff]   ;;  %v7987_v1 = vld [vmem:[#allocation8 + $0x144] ss:$8 sps:$4 sm:$0xff]  }
 0x118   : > { %831 = vmatprep.subr.bf16.mxu1 %v7939_v30  ;;  %v7980_v59 = vld [vmem:[#allocation8 + $0x120] ss:$8 sps:$4 sm:$0xff]   ;;  %v7949_v62 = vld [vmem:[#allocation10 + $0xa4] ss:$16 sps:$4 sm:$0xff]   ;;  %v7986_v63 = vld [vmem:[#allocation8 + $0x130] ss:$8 sps:$4 sm:$0xff]  }
 0x119   : > { %v7947_v2 = vld [vmem:[#allocation10 + $0xa0] ss:$16 sps:$4 sm:$0xff]   ;;  %v7955_v3 = vld [vmem:[#allocation10 + $0xc4] ss:$16 sps:$4 sm:$0xff]   ;;  %vm9355_vm7 = vmmov 0   ;;  %vm2227_vm8 = vcmask 261120  }
 0x11a   : > { %593 = vmatpush1.bf16.msra.mxu0 %v7896_v12  ;;  %v7992_v4 = vld [vmem:[#allocation8 + $0x140] ss:$8 sps:$4 sm:$0xff]   ;;  %v7993_v5 = vld [vmem:[#allocation8 + $0x154] ss:$8 sps:$4 sm:$0xff]   ;;  %v7998_v8 = vld [vmem:[#allocation8 + $0x150] ss:$8 sps:$4 sm:$0xff]  }
 0x11b   : > { %594 = vmatprep.subr.bf16.mxu0 %v7897_v13  ;;  %832 = vmatpush1.bf16.msra.mxu1 %v7944_v33  ;;  %v7953_v6 = vld [vmem:[#allocation10 + $0xc0] ss:$16 sps:$4 sm:$0xff]   ;;  %v7961_v7 = vld [vmem:[#allocation10 + $0xe4] ss:$16 sps:$4 sm:$0xff]   ;;  %s10054_s20 = sld [smem:[#allocation27_spill]]  ;;  %s7677_s14 = sshll.u32 %s9423_s11, 7 }
 0x11c   : > { %833 = vmatprep.subr.bf16.mxu1 %v7945_v34  ;;  %v7959_v9 = vld [vmem:[#allocation10 + $0xe0] ss:$16 sps:$4 sm:$0xff]   ;;  %v7967_v10 = vld [vmem:[#allocation10 + $0x104] ss:$16 sps:$4 sm:$0xff]   ;;  %s464_s23 = scalar_lea.vmem [#allocation16], %s9699_s22  ;;  %s10055_s5 = sld [smem:[#allocation32_spill]] }
 0x11d   : > { %v7965_v11 = vld [vmem:[#allocation10 + $0x100] ss:$16 sps:$4 sm:$0xff]   ;;  %v7973_v12 = vld [vmem:[#allocation10 + $0x124] ss:$16 sps:$4 sm:$0xff]   ;;  %s6734_s26 = sshll.u32 %s464_s23, 4  ;;  %s6721_s30 = scalar_lea.sflag [#allocation4], %s9696_s9  ;;  %s9948_s26 = int_to_ptr.vmem [resolvable:$true] %s6734_s26 }
 0x11e   : > { %595 = vmatpush1.bf16.msra.mxu0 %v7899_v14  ;;  %v7971_v13 = vld [vmem:[#allocation10 + $0x120] ss:$16 sps:$4 sm:$0xff]   ;;  %v7979_v14 = vld [vmem:[#allocation10 + $0x144] ss:$16 sps:$4 sm:$0xff]   ;;  %s9251_s1 = scalar_lea.vmem %s9948_s26, 128  ;;  %s9356_s11 = smov [#allocation16]  }
 0x11f   : > { %596 = vmatprep.subr.bf16.mxu0 %v7900_v17  ;;  %834 = vmatpush1.bf16.msra.mxu1 %v7950_v37  ;;  %v7977_v15 = vld [vmem:[#allocation10 + $0x140] ss:$16 sps:$4 sm:$0xff]   ;;  %v7985_v16 = vld [vmem:[#allocation10 + $0x164] ss:$16 sps:$4 sm:$0xff]   ;;  %p9252_p13 = scmp.ne.s32.totalorder %s9948_s26, %s9251_s1  ;;  %s9255_s8 = sshll.u32 %s9356_s11, 4  ;;  %s9256_s8 = int_to_ptr.vmem [resolvable:$false] %s9255_s8 }
 0x120   : > { %835 = vmatprep.subr.bf16.mxu1 %v7951_v39  ;;  %v7983_v17 = vld [vmem:[#allocation10 + $0x160] ss:$16 sps:$4 sm:$0xff]   ;;  %v7991_v18 = vld [vmem:[#allocation10 + $0x184] ss:$16 sps:$4 sm:$0xff]   ;;  %s9257_s10 = scalar_lea.vmem %s9256_s8, 256  ;;  %p9258_p2 = scmp.lt.s32.totalorder %s9948_s26, %s9256_s8 }
 0x121   : > { %v7997_v20 = vld [vmem:[#allocation10 + $0x1a4] ss:$16 sps:$4 sm:$0xff]   ;;  %v7995_v21 = vld [vmem:[#allocation10 + $0x1a0] ss:$16 sps:$4 sm:$0xff]   ;;  %p10056_p5 = scmp.ne.s32.totalorder %s10054_s20, 0  ;;  %p9259_p9 = scmp.lt.s32.totalorder %s9257_s10, %s9251_s1 }
 0x122   : > { %597 = vmatpush1.bf16.msra.mxu0 %v7902_v19  ;;  %v7989_v19 = vld [vmem:[#allocation10 + $0x180] ss:$16 sps:$4 sm:$0xff]   ;;  %v7999_v22 = vld [vmem:[#allocation8 + $0x164] ss:$8 sps:$4 sm:$0xff]   ;;  %v8005_v26 = vld [vmem:[#allocation8 + $0x174] ss:$8 sps:$4 sm:$0xff]   ;;  %s9946_s3 = scalar_lea.hbm %s10055_s5, %s7677_s14 }
 0x123   : > { %1047 = vmatprep.subr.bf16.mxu0 %v7905_v23  ;;  %836 = vmatpush1.bf16.msra.mxu1 %v7956_v42  ;;  %v8003_v23 = vld [vmem:[#allocation10 + $0x1c4] ss:$16 sps:$4 sm:$0xff]   ;;  %v8001_v24 = vld [vmem:[#allocation10 + $0x1c0] ss:$16 sps:$4 sm:$0xff]   ;;  %p9253_p7 = pnand %p9252_p13, %p10056_p5  ;;  %p9260_p10 = por %p9259_p9, %p9258_p2 }
 0x124   : > { %837 = vmatprep.subr.bf16.mxu1 %v7957_v44  ;;  %v8010_v29 = vld [vmem:[#allocation8 + $0x170] ss:$8 sps:$4 sm:$0xff]   ;;  %v8013_v30 = vld [vmem:[#allocation10 + $0x204] ss:$16 sps:$4 sm:$0xff]  }
 0x125   : > { %615 = vmatmul.mubr.bf16.vlgmr.msra.gmra.mrb[0].mxu0 %v493_v25  ;;  %v8004_v25 = vld [vmem:[#allocation8 + $0x160] ss:$8 sps:$4 sm:$0xff]   ;;  %v8019_v34 = vld [vmem:[#allocation10 + $0x224] ss:$16 sps:$4 sm:$0xff]   ;;  %v467_v44 = vld [vmem:[#allocation14 + $0x8] sm:$0xff]  ;;  %p9254_p4 = pneg %p9253_p7 }
 0x126   : > { %1048 = vmatpush1.bf16.msra.mxu0 %v7903_v27  ;;  %1079 = vmatprep.mubr.bf16.mxu0 %v9353_v0  ;;  %v8007_v27 = vld [vmem:[#allocation10 + $0x1e0] ss:$16 sps:$4 sm:$0xff]   ;;  %v8031_v37 = vld [vmem:[#allocation10 + $0x264] ss:$16 sps:$4 sm:$0xff]  }
 0x127   : > { %1049 = vmatprep.subr.bf16.mxu0 %v7908_v28  ;;  %838 = vmatpush1.bf16.msra.mxu1 %v7962_v47  ;;  %v8009_v28 = vld [vmem:[#allocation10 + $0x1e4] ss:$16 sps:$4 sm:$0xff]   ;;  %v8017_v33 = vld [vmem:[#allocation10 + $0x220] ss:$16 sps:$4 sm:$0xff]   ;;  %p9261_p1 = pnand %p9260_p10, %p9254_p4 }
 0x128   : > { %839 = vmatprep.subr.bf16.mxu1 %v7963_v48  ;;  %v8037_v39 = vld [vmem:[#allocation10 + $0x284] ss:$16 sps:$4 sm:$0xff]  }
 0x129   : > { %v466_v42 = vld [vmem:[#allocation14] sm:$0xff] }
 0x12a   : > { %1050 = vmatpush1.bf16.msra.mxu0 %v7906_v31  ;;  %v8016_v31 = vld [vmem:[#allocation10 + $0x8c] ss:$16 sps:$4 sm:$0xff]  }
 0x12b   : > { %1051 = vmatprep.subr.bf16.mxu0 %v7911_v32  ;;  %840 = vmatpush1.bf16.msra.mxu1 %v7968_v52  ;;  %v8011_v32 = vld [vmem:[#allocation10 + $0x200] ss:$16 sps:$4 sm:$0xff]  }
 0x12c   : > { %841 = vmatprep.subr.bf16.mxu1 %v7969_v54 }
 0x12e   : > { %1052 = vmatpush1.bf16.msra.mxu0 %v7909_v35  ;;  %v8025_v35 = vld [vmem:[#allocation10 + $0x244] ss:$16 sps:$4 sm:$0xff]  }
 0x12f   : > { %1053 = vmatprep.subr.bf16.mxu0 %v7914_v36  ;;  %842 = vmatpush1.bf16.msra.mxu1 %v7974_v55  ;;  %v8023_v36 = vld [vmem:[#allocation10 + $0x240] ss:$16 sps:$4 sm:$0xff]   ;;  %v8014_v55 = vld [vmem:[#allocation10 + $0x88] ss:$16 sps:$4 sm:$0xff]  }
 0x130   : > { %843 = vmatprep.subr.bf16.mxu1 %v7975_v56 }
 0x132   : > { %1054 = vmatpush1.bf16.msra.mxu0 %v7912_v38  ;;  %v8029_v38 = vld [vmem:[#allocation10 + $0x260] ss:$16 sps:$4 sm:$0xff]  }
 0x133   : > { %1088 = vmatprep.subr.bf16.mxu0 %v7917_v41  ;;  %844 = vmatpush1.bf16.msra.mxu1 %v7980_v59  ;;  %v9735_v41 = vshrl.u32 %v494_v40, 7  ;;  %v8061_v40 = vld [vmem:[#allocation10 + $0x304] ss:$16 sps:$4 sm:$0xff]  }
 0x134   : > { %845 = vmatprep.subr.bf16.mxu1 %v7981_v60 }
 0x135   : > { %6983 = vmatmul.mubr.msk.bf16.vlgmr.msra.gmra.mrb[4].mxu0 %vm1043_vm0, %v946_v43 }
 0x136   : > { %1089 = vmatpush1.bf16.msra.mxu0 %v7915_v45  ;;  %1120 = vmatprep.mubr.bf16.mxu0 %v9353_v0 }
 0x137   : > { %1090 = vmatprep.subr.bf16.mxu0 %v7920_v46  ;;  %846 = vmatpush1.bf16.msra.mxu1 %v7986_v63  ;;  %v8028_v63 = vld [vmem:[#allocation10 + $0xcc] ss:$16 sps:$4 sm:$0xff]  }
 0x138   : > { %847 = vmatprep.subr.bf16.mxu1 %v7987_v1 }
 0x13a   : > { %1091 = vmatpush1.bf16.msra.mxu0 %v7918_v49 }
 0x13b   : > { %1092 = vmatprep.subr.bf16.mxu0 %v7923_v50  ;;  %848 = vmatpush1.bf16.msra.mxu1 %v7992_v4  ;;  %v8034_v4 = vld [vmem:[#allocation10 + $0xec] ss:$16 sps:$4 sm:$0xff]  }
 0x13c   : > { %849 = vmatprep.subr.bf16.mxu1 %v7993_v5 }
 0x13e   : > { %1093 = vmatpush1.bf16.msra.mxu0 %v7921_v51 }
 0x13f   : > { %1094 = vmatprep.subr.bf16.mxu0 %v7926_v53  ;;  %850 = vmatpush1.bf16.msra.mxu1 %v7998_v8  ;;  %v8032_v8 = vld [vmem:[#allocation10 + $0xe8] ss:$16 sps:$4 sm:$0xff]  }
 0x140   : > { %851 = vmatprep.subr.bf16.mxu1 %v7999_v22 }
 0x142   : > { %1095 = vmatpush1.bf16.msra.mxu0 %v7924_v57 }
 0x143   : > { %1913 = vmatprep.subr.bf16.mxu0 %v7943_v58  ;;  %852 = vmatpush1.bf16.msra.mxu1 %v8004_v25  ;;  %v8022_v58 = vld [vmem:[#allocation10 + $0xac] ss:$16 sps:$4 sm:$0xff]   ;;  %v8044_v25 = vld [vmem:[#allocation10 + $0x128] ss:$16 sps:$4 sm:$0xff]  }
 0x144   : > { %853 = vmatprep.subr.bf16.mxu1 %v8005_v26  ;;  %v469_v26 = vld [vmem:[#allocation14 + $0x18] sm:$0xff] }
 0x145   : > { %6984 = vmatmul.mubr.msk.bf16.vlgmr.msra.gmra.mrb[8].mxu0 %vm1043_vm0, %v946_v43  ;;  %v9738_v43 = vsub.s32 0, %v9735_v41 }
 0x146   : > { %1914 = vmatpush1.bf16.msra.mxu0 %v7941_v61  ;;  %v8020_v61 = vld [vmem:[#allocation10 + $0xa8] ss:$16 sps:$4 sm:$0xff]  }
 0x147   : > { %1915 = vmatprep.subr.bf16.mxu0 %v7949_v62  ;;  %854 = vmatpush1.bf16.msra.mxu1 %v8010_v29  ;;  %v497_v45 = vrot.slane %v466_v42, %v9738_v43  ;;  %v501_v46 = vrot.slane %v467_v44, %v9738_v43  ;;  %v9743_v62 = vsub.s32 3, %v9735_v41  ;;  %v8047_v29 = vld [vmem:[#allocation10 + $0x2c0] ss:$16 sps:$4 sm:$0xff]  }
 0x148   : > { %1995 = vmatprep.subr.bf16.mxu1 %v8016_v31 }
 0x149   : > { %v950_v1 = vrot.slane %v466_v42, %v9743_v62 }
 0x14a   : > { %1916 = vmatpush1.bf16.msra.mxu0 %v7947_v2  ;;  %v8026_v2 = vld [vmem:[#allocation10 + $0xc8] ss:$16 sps:$4 sm:$0xff]  }
 0x14b   : > { %1917 = vmatprep.subr.bf16.mxu0 %v7955_v3  ;;  %v954_v3 = vrot.slane %v467_v44, %v9743_v62 }
 0x14e   : > { %1918 = vmatpush1.bf16.msra.mxu0 %v7953_v6 }
 0x14f   : > { %1919 = vmatprep.subr.bf16.mxu0 %v7961_v7 }
 0x152   : > { %1920 = vmatpush1.bf16.msra.mxu0 %v7959_v9 }
 0x153   : > { %1921 = vmatprep.subr.bf16.mxu0 %v7967_v10  ;;  %v8040_v10 = vld [vmem:[#allocation10 + $0x10c] ss:$16 sps:$4 sm:$0xff]  }
 0x156   : > { %1922 = vmatpush1.bf16.msra.mxu0 %v7965_v11 }
 0x157   : > { %1923 = vmatprep.subr.bf16.mxu0 %v7973_v12 }
 0x15a   : > { %1924 = vmatpush1.bf16.msra.mxu0 %v7971_v13 }
 0x15b   : > { %1925 = vmatprep.subr.bf16.mxu0 %v7979_v14 }
 0x15e   : > { %1926 = vmatpush1.bf16.msra.mxu0 %v7977_v15 }
 0x15f   : > { %1927 = vmatprep.subr.bf16.mxu0 %v7985_v16  ;;  %v8035_v16 = vld [vmem:[#allocation10 + $0x280] ss:$16 sps:$4 sm:$0xff]  }
 0x162   : > { %1928 = vmatpush1.bf16.msra.mxu0 %v7983_v17  ;;  %v8038_v17 = vld [vmem:[#allocation10 + $0x108] ss:$16 sps:$4 sm:$0xff]  }
 0x163   : > { %1929 = vmatprep.subr.bf16.mxu0 %v7991_v18 }
 0x166   : > { %1930 = vmatpush1.bf16.msra.mxu0 %v7989_v19 }
 0x167   : > { %1931 = vmatprep.subr.bf16.mxu0 %v7997_v20  ;;  %v8043_v20 = vld [vmem:[#allocation10 + $0x2a4] ss:$16 sps:$4 sm:$0xff]  }
 0x16a   : > { %1932 = vmatpush1.bf16.msra.mxu0 %v7995_v21  ;;  %v8046_v21 = vld [vmem:[#allocation10 + $0x12c] ss:$16 sps:$4 sm:$0xff]  }
 0x16b   : > { %1933 = vmatprep.subr.bf16.mxu0 %v8003_v23  ;;  %v468_v23 = vld [vmem:[#allocation14 + $0x10] sm:$0xff] }
 0x16c   : > { %v958_v31 = vrot.slane %v468_v23, %v9743_v62  ;;  %v8115_v23 = vld [vmem:[#allocation10 + $0x424] ss:$16 sps:$4 sm:$0xff]  }
 0x16e   : > { %1934 = vmatpush1.bf16.msra.mxu0 %v8001_v24  ;;  %v8041_v24 = vld [vmem:[#allocation10 + $0x2a0] ss:$16 sps:$4 sm:$0xff]  }
 0x16f   : > { %1935 = vmatprep.subr.bf16.mxu0 %v8009_v28  ;;  %v8052_v28 = vld [vmem:[#allocation10 + $0x14c] ss:$16 sps:$4 sm:$0xff]  }
 0x172   : > { %1936 = vmatpush1.bf16.msra.mxu0 %v8007_v27  ;;  %v8049_v27 = vld [vmem:[#allocation10 + $0x2c4] ss:$16 sps:$4 sm:$0xff]  }
 0x173   : > { %1937 = vmatprep.subr.bf16.mxu0 %v8013_v30  ;;  %v8050_v30 = vld [vmem:[#allocation10 + $0x148] ss:$16 sps:$4 sm:$0xff]  }
 0x176   : > { %1938 = vmatpush1.bf16.msra.mxu0 %v8011_v32  ;;  %v8055_v32 = vld [vmem:[#allocation10 + $0x2e4] ss:$16 sps:$4 sm:$0xff]  }
 0x177   : > { %1939 = vmatprep.subr.bf16.mxu0 %v8019_v34  ;;  %v962_v34 = vrot.slane %v469_v26, %v9743_v62  ;;  %v8077_v62 = vld [vmem:[#allocation10 + $0x360] ss:$16 sps:$4 sm:$0xff]   ;;  %v8116_v26 = vld [vmem:[#allocation10 + $0x2a8] ss:$16 sps:$4 sm:$0xff]  }
 0x17a   : > { %1940 = vmatpush1.bf16.msra.mxu0 %v8017_v33  ;;  %v8058_v33 = vld [vmem:[#allocation10 + $0x16c] ss:$16 sps:$4 sm:$0xff]  }
 0x17b   : > { %1941 = vmatprep.subr.bf16.mxu0 %v8025_v35 }
 0x17e   : > { %1942 = vmatpush1.bf16.msra.mxu0 %v8023_v36  ;;  %v8053_v36 = vld [vmem:[#allocation10 + $0x2e0] ss:$16 sps:$4 sm:$0xff]  }
 0x17f   : > { %1943 = vmatprep.subr.bf16.mxu0 %v8031_v37  ;;  %v8056_v37 = vld [vmem:[#allocation10 + $0x168] ss:$16 sps:$4 sm:$0xff]  }
 0x182   : > { %1944 = vmatpush1.bf16.msra.mxu0 %v8029_v38 }
 0x183   : > { %1954 = vmatprep.subr.bf16.mxu0 %v8037_v39 }
 0x1f8   : > { %v616_v47 = vpop.f32.mrb[0].mxu0 }
 0x1f9   : > { %v617_v48 = vadd.f32 %v616_v47, %v497_v45  ;;  %v618_v49 = vpop.f32.mrb[1].mxu0  ;;  %v8064_v45 = vld [vmem:[#allocation10 + $0x18c] ss:$16 sps:$4 sm:$0xff]  }
 0x1fa   : > { %v619_v50 = vadd.f32 %v618_v49, %v501_v46  ;;  %v620_v51 = vpop.f32.mrb[2].mxu0  ;;  %v8062_v49 = vld [vmem:[#allocation10 + $0x188] ss:$16 sps:$4 sm:$0xff]  }
 0x1fb   : > { %vm623_vm1 = vcmp.gt.f32.partialorder %v617_v48, 0.0  ;;  %v625_v52 = vmul.f32 0.2, %v617_v48  ;;  %v621_v53 = vpop.f32.mrb[3].mxu0  ;;  %v8070_v51 = vld [vmem:[#allocation10 + $0x1ac] ss:$16 sps:$4 sm:$0xff]  }
 0x1fc   : > { %vm624_vm2 = vcmp.gt.f32.partialorder %v619_v50, 0.0  ;;  %v626_v54 = vmul.f32 0.2, %v619_v50 }
 0x1fd   : > { %v627_v56 = vsel %vm623_vm1, %v617_v48, %v625_v52  ;;  %v8059_v48 = vld [vmem:[#allocation10 + $0x300] ss:$16 sps:$4 sm:$0xff]  }
 0x1fe   : > { %v628_v57 = vsel %vm624_vm2, %v619_v50, %v626_v54  ;;  %v661_v60 = vpack.c.bf16 %v627_v56, %v627_v56  ;;  %v8067_v50 = vld [vmem:[#allocation10 + $0x324] ss:$16 sps:$4 sm:$0xff]   ;;  %v8065_v54 = vld [vmem:[#allocation10 + $0x320] ss:$16 sps:$4 sm:$0xff]  }
 0x1ff   : > { %v662_v59 = vpack.c.bf16 %v628_v57, %v628_v57  ;;  %v8073_v56 = vld [vmem:[#allocation10 + $0x344] ss:$16 sps:$4 sm:$0xff]   ;;  %v8076_v57 = vld [vmem:[#allocation10 + $0x1cc] ss:$16 sps:$4 sm:$0xff]  }
 0x201   : > { %855 = vmatprep.mubr.bf16.mxu1 %v662_v59  ;;  %v8074_v59 = vld [vmem:[#allocation10 + $0x1c8] ss:$16 sps:$4 sm:$0xff]  }
 0x202   : > { %856 = vmatmul.mubr.bf16.vlgmr.msra.gmra.mrb[0].mxu1 %v661_v60  ;;  %v8079_v60 = vld [vmem:[#allocation10 + $0x364] ss:$16 sps:$4 sm:$0xff]  }
 0x203   : > { %1996 = vmatpush1.bf16.msra.mxu1 %v8014_v55  ;;  %v8068_v55 = vld [vmem:[#allocation10 + $0x1a8] ss:$16 sps:$4 sm:$0xff]  }
 0x204   : > { %1997 = vmatprep.subr.bf16.mxu1 %v8022_v58  ;;  %v8071_v58 = vld [vmem:[#allocation10 + $0x340] ss:$16 sps:$4 sm:$0xff]  }
 0x207   : > { %1998 = vmatpush1.bf16.msra.mxu1 %v8020_v61  ;;  %v8082_v61 = vld [vmem:[#allocation10 + $0x1ec] ss:$16 sps:$4 sm:$0xff]  }
 0x208   : > { %v1081_v5 = vpop.f32.mrb[4].mxu0  ;;  %1999 = vmatprep.subr.bf16.mxu1 %v8028_v63  ;;  %v8080_v63 = vld [vmem:[#allocation10 + $0x1e8] ss:$16 sps:$4 sm:$0xff]  }
 0x209   : > { %v1082_v6 = vadd.f32 %v1081_v5, %v950_v1  ;;  %v1083_v7 = vpop.f32.mrb[5].mxu0  ;;  %v8085_v1 = vld [vmem:[#allocation10 + $0x384] ss:$16 sps:$4 sm:$0xff]  }
 0x20a   : > { %v1084_v9 = vadd.f32 %v1083_v7, %v954_v3  ;;  %v1085_v11 = vpop.f32.mrb[6].mxu0  ;;  %v8083_v3 = vld [vmem:[#allocation10 + $0x380] ss:$16 sps:$4 sm:$0xff]   ;;  %v8091_v5 = vld [vmem:[#allocation10 + $0x3a4] ss:$16 sps:$4 sm:$0xff]  }
 0x20b   : > { %vm1129_vm3 = vcmp.gt.f32.partialorder %v1082_v6, 0.0  ;;  %v1133_v12 = vmul.f32 0.2, %v1082_v6  ;;  %2000 = vmatpush1.bf16.msra.mxu1 %v8026_v2  ;;  %v1086_v13 = vpop.f32.mrb[7].mxu0  ;;  %v8088_v2 = vld [vmem:[#allocation10 + $0x20c] ss:$16 sps:$4 sm:$0xff]  }
 0x20c   : > { %vm1130_vm4 = vcmp.gt.f32.partialorder %v1084_v9, 0.0  ;;  %v1134_v14 = vmul.f32 0.2, %v1084_v9  ;;  %2001 = vmatprep.subr.bf16.mxu1 %v8034_v4  ;;  %v8086_v4 = vld [vmem:[#allocation10 + $0x208] ss:$16 sps:$4 sm:$0xff]  }
 0x20d   : > { %v1137_v15 = vsel %vm1129_vm3, %v1082_v6, %v1133_v12  ;;  %v8094_v6 = vld [vmem:[#allocation10 + $0x22c] ss:$16 sps:$4 sm:$0xff]   ;;  %v8089_v7 = vld [vmem:[#allocation10 + $0x3a0] ss:$16 sps:$4 sm:$0xff]   ;;  %v8098_v12 = vld [vmem:[#allocation10 + $0x248] ss:$16 sps:$4 sm:$0xff]  }
 0x20e   : > { %v9747_v18 = vpack.c.bf16 %v1137_v15, %v1137_v15  ;;  %v1138_v19 = vsel %vm1130_vm4, %v1084_v9, %v1134_v14  ;;  %v8097_v9 = vld [vmem:[#allocation10 + $0x3c4] ss:$16 sps:$4 sm:$0xff]   ;;  %v8095_v11 = vld [vmem:[#allocation10 + $0x3c0] ss:$16 sps:$4 sm:$0xff]   ;;  %v8106_v14 = vld [vmem:[#allocation10 + $0x26c] ss:$16 sps:$4 sm:$0xff]  }
 0x20f   : > { %2002 = vmatpush1.bf16.msra.mxu1 %v8032_v8  ;;  %v1270_v22 = vpack.c.bf16 %v1138_v19, %v1138_v19  ;;  %v8092_v8 = vld [vmem:[#allocation10 + $0x228] ss:$16 sps:$4 sm:$0xff]   ;;  %v8103_v13 = vld [vmem:[#allocation10 + $0x3e4] ss:$16 sps:$4 sm:$0xff]  }
 0x210   : > { %2003 = vmatprep.subr.bf16.mxu1 %v8040_v10  ;;  %v8100_v10 = vld [vmem:[#allocation10 + $0x24c] ss:$16 sps:$4 sm:$0xff]   ;;  %v8109_v19 = vld [vmem:[#allocation10 + $0x404] ss:$16 sps:$4 sm:$0xff]  }
 0x211   : > { %1945 = vmatprep.mubr.bf16.mxu0 %v1270_v22  ;;  %2027 = vmatprep.mubr.bf16.mxu1 %v1270_v22  ;;  %v8110_v22 = vld [vmem:[#allocation10 + $0x288] ss:$16 sps:$4 sm:$0xff]  }
 0x212   : > { %1946 = vmatmul.mubr.bf16.vlgmr.msra.gmra.mrb[12].mxu0 %v9747_v18 }
 0x213   : > { %1955 = vmatpush1.bf16.msra.mxu0 %v8035_v16  ;;  %2004 = vmatpush1.bf16.msra.mxu1 %v8038_v17  ;;  %v8101_v16 = vld [vmem:[#allocation10 + $0x3e0] ss:$16 sps:$4 sm:$0xff]   ;;  %v8104_v17 = vld [vmem:[#allocation10 + $0x268] ss:$16 sps:$4 sm:$0xff]  }
 0x214   : > { %1956 = vmatprep.subr.bf16.mxu0 %v8043_v20  ;;  %2005 = vmatprep.subr.bf16.mxu1 %v8046_v21  ;;  %v8112_v20 = vld [vmem:[#allocation10 + $0x28c] ss:$16 sps:$4 sm:$0xff]   ;;  %v8107_v21 = vld [vmem:[#allocation10 + $0x400] ss:$16 sps:$4 sm:$0xff]  }
 0x217   : > { %1957 = vmatpush1.bf16.msra.mxu0 %v8041_v24  ;;  %2006 = vmatpush1.bf16.msra.mxu1 %v8044_v25  ;;  %v8118_v24 = vld [vmem:[#allocation10 + $0x2ac] ss:$16 sps:$4 sm:$0xff]   ;;  %v8113_v25 = vld [vmem:[#allocation10 + $0x420] ss:$16 sps:$4 sm:$0xff]  }
 0x218   : > { %1958 = vmatprep.subr.bf16.mxu0 %v8049_v27  ;;  %2007 = vmatprep.subr.bf16.mxu1 %v8052_v28  ;;  %v1122_v35 = vpop.f32.mrb[8].mxu0  ;;  %v8121_v27 = vld [vmem:[#allocation10 + $0x444] ss:$16 sps:$4 sm:$0xff]   ;;  %v8124_v28 = vld [vmem:[#allocation10 + $0x2cc] ss:$16 sps:$4 sm:$0xff]  }
 0x219   : > { %v9752_v38 = vadd.f32 %v1122_v35, %v958_v31  ;;  %v1124_v39 = vpop.f32.mrb[9].mxu0  ;;  %v8127_v31 = vld [vmem:[#allocation10 + $0x464] ss:$16 sps:$4 sm:$0xff]   ;;  %v8133_v35 = vld [vmem:[#allocation10 + $0x30c] ss:$16 sps:$4 sm:$0xff]  }
 0x21a   : > { %v1125_v42 = vadd.f32 %v1124_v39, %v962_v34  ;;  %v1126_v44 = vpop.f32.mrb[10].mxu0  ;;  %v8128_v34 = vld [vmem:[#allocation10 + $0x2e8] ss:$16 sps:$4 sm:$0xff]   ;;  %v8136_v39 = vld [vmem:[#allocation10 + $0x32c] ss:$16 sps:$4 sm:$0xff]  }
 0x21b   : > { %1959 = vmatpush1.bf16.msra.mxu0 %v8047_v29  ;;  %2008 = vmatpush1.bf16.msra.mxu1 %v8050_v30  ;;  %v1127_v46 = vpop.f32.mrb[11].mxu0  ;;  %v1135_v15 = vmul.f32 0.2, %v9752_v38  ;;  %vm1131_vm6 = vcmp.gt.f32.partialorder %v9752_v38, 0.0  ;;  %v8119_v29 = vld [vmem:[#allocation10 + $0x440] ss:$16 sps:$4 sm:$0xff]  }
 0x21c   : > { %1960 = vmatprep.subr.bf16.mxu0 %v8055_v32  ;;  %2009 = vmatprep.subr.bf16.mxu1 %v8058_v33  ;;  %vm1132_vm5 = vcmp.gt.f32.partialorder %v1125_v42, 0.0  ;;  %v1136_v47 = vmul.f32 0.2, %v1125_v42  ;;  %v8122_v30 = vld [vmem:[#allocation10 + $0x2c8] ss:$16 sps:$4 sm:$0xff]  }
 0x21d   : > { %v8130_v32 = vld [vmem:[#allocation10 + $0x2ec] ss:$16 sps:$4 sm:$0xff]   ;;  %v8125_v33 = vld [vmem:[#allocation10 + $0x460] ss:$16 sps:$4 sm:$0xff]   ;;  %v8137_v44 = vld [vmem:[#allocation10 + $0x348] ss:$16 sps:$4 sm:$0xff]  }
 0x21e   : > { %v1140_v52 = vsel %vm1132_vm5, %v1125_v42, %v1136_v47  ;;  %v8139_v42 = vld [vmem:[#allocation10 + $0x34c] ss:$16 sps:$4 sm:$0xff]   ;;  %v8143_v47 = vld [vmem:[#allocation10 + $0x388] ss:$16 sps:$4 sm:$0xff]  }
 0x21f   : > { %1961 = vmatpush1.bf16.msra.mxu0 %v8053_v36  ;;  %2010 = vmatpush1.bf16.msra.mxu1 %v8056_v37  ;;  %v9754_v53 = vpack.c.bf16 %v1140_v52, %v1140_v52  ;;  %v8131_v37 = vld [vmem:[#allocation10 + $0x308] ss:$16 sps:$4 sm:$0xff]   ;;  %v8145_v46 = vld [vmem:[#allocation10 + $0x38c] ss:$16 sps:$4 sm:$0xff]  }
 0x220   : > { %1962 = vmatprep.subr.bf16.mxu0 %v8061_v40  ;;  %2011 = vmatprep.subr.bf16.mxu1 %v8064_v45  ;;  %v8134_v40 = vld [vmem:[#allocation10 + $0x328] ss:$16 sps:$4 sm:$0xff]   ;;  %v8142_v45 = vld [vmem:[#allocation10 + $0x36c] ss:$16 sps:$4 sm:$0xff]  }
 0x221   : > { %1986 = vmatprep.mubr.bf16.mxu0 %v9754_v53  ;;  %v8154_v52 = vld [vmem:[#allocation10 + $0x3ec] ss:$16 sps:$4 sm:$0xff]  }
 0x223   : > { %1963 = vmatpush1.bf16.msra.mxu0 %v8059_v48  ;;  %2012 = vmatpush1.bf16.msra.mxu1 %v8062_v49  ;;  %v8148_v48 = vld [vmem:[#allocation10 + $0x3ac] ss:$16 sps:$4 sm:$0xff]   ;;  %v8146_v49 = vld [vmem:[#allocation10 + $0x3a8] ss:$16 sps:$4 sm:$0xff]  }
 0x224   : > { %1964 = vmatprep.subr.bf16.mxu0 %v8067_v50  ;;  %2013 = vmatprep.subr.bf16.mxu1 %v8070_v51  ;;  %v8151_v50 = vld [vmem:[#allocation10 + $0x3cc] ss:$16 sps:$4 sm:$0xff]   ;;  %v8149_v51 = vld [vmem:[#allocation10 + $0x3c8] ss:$16 sps:$4 sm:$0xff]  }
 0x227   : > { %1965 = vmatpush1.bf16.msra.mxu0 %v8065_v54  ;;  %2014 = vmatpush1.bf16.msra.mxu1 %v8068_v55  ;;  %v8157_v54 = vld [vmem:[#allocation10 + $0x40c] ss:$16 sps:$4 sm:$0xff]   ;;  %v8155_v55 = vld [vmem:[#allocation10 + $0x408] ss:$16 sps:$4 sm:$0xff]  }
 0x228   : > { %1966 = vmatprep.subr.bf16.mxu0 %v8073_v56  ;;  %2015 = vmatprep.subr.bf16.mxu1 %v8076_v57  ;;  %v8160_v56 = vld [vmem:[#allocation10 + $0x42c] ss:$16 sps:$4 sm:$0xff]   ;;  %v8158_v57 = vld [vmem:[#allocation10 + $0x428] ss:$16 sps:$4 sm:$0xff]  }
 0x22b   : > { %1967 = vmatpush1.bf16.msra.mxu0 %v8071_v58  ;;  %2016 = vmatpush1.bf16.msra.mxu1 %v8074_v59  ;;  %v8163_v58 = vld [vmem:[#allocation10 + $0x44c] ss:$16 sps:$4 sm:$0xff]   ;;  %v8161_v59 = vld [vmem:[#allocation10 + $0x448] ss:$16 sps:$4 sm:$0xff]  }
 0x22c   : > { %1968 = vmatprep.subr.bf16.mxu0 %v8079_v60  ;;  %2017 = vmatprep.subr.bf16.mxu1 %v8082_v61  ;;  %v8166_v60 = vld [vmem:[#allocation10 + $0x46c] ss:$16 sps:$4 sm:$0xff]   ;;  %v8164_v61 = vld [vmem:[#allocation10 + $0x468] ss:$16 sps:$4 sm:$0xff]  }
 0x22f   : > { %1969 = vmatpush1.bf16.msra.mxu0 %v8077_v62  ;;  %2018 = vmatpush1.bf16.msra.mxu1 %v8080_v63  ;;  %v8167_v62 = vld [vmem:[#allocation13 + $0x300] ss:$24 sps:$4 sm:$0xff]   ;;  %v8169_v63 = vld [vmem:[#allocation13 + $0x304] ss:$24 sps:$4 sm:$0xff]  }
 0x230   : > { %1970 = vmatprep.subr.bf16.mxu0 %v8085_v1  ;;  %2019 = vmatprep.subr.bf16.mxu1 %v8088_v2  ;;  %v8172_v1 = vld [vmem:[#allocation13 + $0x334] ss:$24 sps:$4 sm:$0xff]   ;;  %v8170_v2 = vld [vmem:[#allocation13 + $0x330] ss:$24 sps:$4 sm:$0xff]  }
 0x233   : > { %1971 = vmatpush1.bf16.msra.mxu0 %v8083_v3  ;;  %2020 = vmatpush1.bf16.msra.mxu1 %v8086_v4  ;;  %v8175_v3 = vld [vmem:[#allocation13 + $0x364] ss:$24 sps:$4 sm:$0xff]   ;;  %v8173_v4 = vld [vmem:[#allocation13 + $0x360] ss:$24 sps:$4 sm:$0xff]  }
 0x234   : > { %1972 = vmatprep.subr.bf16.mxu0 %v8091_v5  ;;  %2021 = vmatprep.subr.bf16.mxu1 %v8094_v6  ;;  %v8178_v5 = vld [vmem:[#allocation13 + $0x394] ss:$24 sps:$4 sm:$0xff]   ;;  %v8176_v6 = vld [vmem:[#allocation13 + $0x390] ss:$24 sps:$4 sm:$0xff]  }
 0x237   : > { %1973 = vmatpush1.bf16.msra.mxu0 %v8089_v7  ;;  %2022 = vmatpush1.bf16.msra.mxu1 %v8092_v8  ;;  %v8181_v7 = vld [vmem:[#allocation13 + $0x3c4] ss:$24 sps:$4 sm:$0xff]   ;;  %v8179_v8 = vld [vmem:[#allocation13 + $0x3c0] ss:$24 sps:$4 sm:$0xff]  }
 0x238   : > { %1974 = vmatprep.subr.bf16.mxu0 %v8097_v9  ;;  %2023 = vmatprep.subr.bf16.mxu1 %v8100_v10  ;;  %v8184_v9 = vld [vmem:[#allocation13 + $0x3f4] ss:$24 sps:$4 sm:$0xff]   ;;  %v8182_v10 = vld [vmem:[#allocation13 + $0x3f0] ss:$24 sps:$4 sm:$0xff]  }
 0x23b   : > { %1975 = vmatpush1.bf16.msra.mxu0 %v8095_v11  ;;  %2024 = vmatpush1.bf16.msra.mxu1 %v8098_v12  ;;  %v8187_v11 = vld [vmem:[#allocation13 + $0x424] ss:$24 sps:$4 sm:$0xff]   ;;  %v8185_v12 = vld [vmem:[#allocation13 + $0x420] ss:$24 sps:$4 sm:$0xff]  }
 0x23c   : > { %1976 = vmatprep.subr.bf16.mxu0 %v8103_v13  ;;  %2025 = vmatprep.subr.bf16.mxu1 %v8106_v14  ;;  %v8190_v13 = vld [vmem:[#allocation13 + $0x454] ss:$24 sps:$4 sm:$0xff]   ;;  %v8188_v14 = vld [vmem:[#allocation13 + $0x450] ss:$24 sps:$4 sm:$0xff]  }
 0x23f   : > { %1977 = vmatpush1.bf16.msra.mxu0 %v8101_v16  ;;  %2026 = vmatpush1.bf16.msra.mxu1 %v8104_v17  ;;  %v8191_v16 = vld [vmem:[#allocation13 + $0x480] ss:$24 sps:$4 sm:$0xff]   ;;  %v8196_v17 = vld [vmem:[#allocation13 + $0x4b4] ss:$24 sps:$4 sm:$0xff]  }
 0x240   : > { %1978 = vmatprep.subr.bf16.mxu0 %v8109_v19  ;;  %2036 = vmatprep.subr.bf16.mxu1 %v8112_v20  ;;  %v8194_v19 = vld [vmem:[#allocation13 + $0x4b0] ss:$24 sps:$4 sm:$0xff]  }
 0x241   : > { %v8197_v20 = vld [vmem:[#allocation11] sm:$0xff]  }
 0x242   : > { %2028 = vmatmul.mubr.bf16.vlgmr.msra.gmra.mrb[4].mxu1 %v9747_v18  ;;  %v1139_v18 = vsel %vm1131_vm6, %v9752_v38, %v1135_v15  ;;  %v8140_v38 = vld [vmem:[#allocation10 + $0x368] ss:$16 sps:$4 sm:$0xff]   ;;  %v8193_v15 = vld [vmem:[#allocation13 + $0x484] ss:$24 sps:$4 sm:$0xff]  }
 0x243   : > { %1979 = vmatpush1.bf16.msra.mxu0 %v8107_v21  ;;  %2037 = vmatpush1.bf16.msra.mxu1 %v8110_v22  ;;  %v1271_v36 = vpack.c.bf16 %v1139_v18, %v1139_v18  ;;  %v9354_v21 = vmov 0.0   ;;  %v8200_v22 = vld [vmem:[#allocation13 + $0x4e4] ss:$24 sps:$4 sm:$0xff]   ;;  %v8214_v18 = vld [vmem:[#allocation13 + $0x630] ss:$24 sps:$4 sm:$0xff]  }
 0x244   : > { %1980 = vmatprep.subr.bf16.mxu0 %v8115_v23  ;;  %2038 = vmatprep.subr.bf16.mxu1 %v8118_v24  ;;  %v8198_v23 = vld [vmem:[#allocation13 + $0x4e0] ss:$24 sps:$4 sm:$0xff]  }
 0x245   : > { %2068 = vmatprep.mubr.bf16.mxu1 %v9754_v53  ;;  %v8152_v53 = vld [vmem:[#allocation10 + $0x3e8] ss:$16 sps:$4 sm:$0xff]  }
 0x246   : > { %v8201_v24 = vld [vmem:[#allocation11 + $0x8] sm:$0xff]  }
 0x247   : > { %1981 = vmatpush1.bf16.msra.mxu0 %v8113_v25  ;;  %2039 = vmatpush1.bf16.msra.mxu1 %v8116_v26  ;;  %v8204_v25 = vld [vmem:[#allocation13 + $0x514] ss:$24 sps:$4 sm:$0xff]   ;;  %v8202_v26 = vld [vmem:[#allocation13 + $0x510] ss:$24 sps:$4 sm:$0xff]  }
 0x248   : > { %1982 = vmatprep.subr.bf16.mxu0 %v8121_v27  ;;  %2040 = vmatprep.subr.bf16.mxu1 %v8124_v28  ;;  %v2205_v27 = vld [vmem:[%s384_s21] sm:$0xff] }
 0x249   : > { %v2210_v28 = vpack.c.bf16 %v2205_v27, %v2205_v27 }
 0x24b   : > { %1983 = vmatpush1.bf16.msra.mxu0 %v8119_v29  ;;  %2041 = vmatpush1.bf16.msra.mxu1 %v8122_v30  ;;  %v8207_v29 = vld [vmem:[#allocation13 + $0x544] ss:$24 sps:$4 sm:$0xff]  }
 0x24c   : > { %1984 = vmatprep.subr.bf16.mxu0 %v8127_v31  ;;  %2042 = vmatprep.subr.bf16.mxu1 %v8130_v32  ;;  %v8210_v30 = vld [vmem:[#allocation13 + $0x604] ss:$24 sps:$4 sm:$0xff]   ;;  %v8205_v31 = vld [vmem:[#allocation13 + $0x540] ss:$24 sps:$4 sm:$0xff]  }
 0x24d   : > { %v8208_v32 = vld [vmem:[#allocation13 + $0x600] ss:$24 sps:$4 sm:$0xff]  }
 0x24f   : > { %1985 = vmatpush1.bf16.msra.mxu0 %v8125_v33  ;;  %2043 = vmatpush1.bf16.msra.mxu1 %v8128_v34  ;;  %v8213_v33 = vld [vmem:[#allocation13 + $0x574] ss:$24 sps:$4 sm:$0xff]  }
 0x250   : > { %2044 = vmatprep.subr.bf16.mxu1 %v8133_v35  ;;  %7727 = vmatprep.subr.bf16.mxu0 %v9354_v21  ;;  %v8216_v34 = vld [vmem:[#allocation13 + $0x634] ss:$24 sps:$4 sm:$0xff]   ;;  %v8211_v35 = vld [vmem:[#allocation13 + $0x570] ss:$24 sps:$4 sm:$0xff]  }
 0x252   : > { %1987 = vmatmul.mubr.bf16.vlgmr.msra.gmra.mrb[12].mxu0 %v1271_v36 }
 0x253   : > { %2045 = vmatpush1.bf16.msra.mxu1 %v8131_v37  ;;  %7728 = vmatpush3.bf16.msra.mxu0 %v8197_v20  ;;  %v8219_v37 = vld [vmem:[#allocation13 + $0x5a4] ss:$24 sps:$4 sm:$0xff]  }
 0x254   : > { %2046 = vmatprep.subr.bf16.mxu1 %v8136_v39  ;;  %7729 = vmatprep.subr.bf16.mxu0 %v9354_v21  ;;  %v8222_v39 = vld [vmem:[#allocation13 + $0x664] ss:$24 sps:$4 sm:$0xff]  }
 0x255   : > { %7731 = vmatprep.mubr.msk.bf16.mxu0 %vm9355_vm7, %v9354_v21 }
 0x257   : > { %2047 = vmatpush1.bf16.msra.mxu1 %v8134_v40  ;;  %7730 = vmatpush3.bf16.msra.mxu0 %v8201_v24 }
 0x258   : > { %2048 = vmatprep.subr.bf16.mxu1 %v8139_v42  ;;  %3569 = vmatprep.subr.bf16.mxu0 %v8210_v30  ;;  %v8217_v42 = vld [vmem:[#allocation13 + $0x5a0] ss:$24 sps:$4 sm:$0xff]  }
 0x25a   : > { %7732 = vmatmul.mubr.msk.bf16.vlgmr.msra.gmra.mrb[16].mxu0 %vm2227_vm8, %v2210_v28 }
 0x25b   : > { %2049 = vmatpush1.bf16.msra.mxu1 %v8137_v44  ;;  %3570 = vmatpush1.bf16.msra.mxu0 %v8208_v32  ;;  %v8220_v44 = vld [vmem:[#allocation13 + $0x660] ss:$24 sps:$4 sm:$0xff]  }
 0x25c   : > { %2050 = vmatprep.subr.bf16.mxu1 %v8142_v45  ;;  %3571 = vmatprep.subr.bf16.mxu0 %v8216_v34 }
 0x25f   : > { %2051 = vmatpush1.bf16.msra.mxu1 %v8140_v38  ;;  %3572 = vmatpush1.bf16.msra.mxu0 %v8214_v18 }
 0x260   : > { %2052 = vmatprep.subr.bf16.mxu1 %v8145_v46  ;;  %3573 = vmatprep.subr.bf16.mxu0 %v8222_v39  ;;  %v8225_v46 = vld [vmem:[#allocation13 + $0x5d4] ss:$24 sps:$4 sm:$0xff]  }
 0x263   : > { %2053 = vmatpush1.bf16.msra.mxu1 %v8143_v47  ;;  %3574 = vmatpush1.bf16.msra.mxu0 %v8220_v44  ;;  %v8228_v47 = vld [vmem:[#allocation13 + $0x694] ss:$24 sps:$4 sm:$0xff]  }
 0x264   : > { %2054 = vmatprep.subr.bf16.mxu1 %v8148_v48  ;;  %v8223_v48 = vld [vmem:[#allocation13 + $0x5d0] ss:$24 sps:$4 sm:$0xff]   ;;  %3575 = vmatprep.subr.bf16.mxu0 %v8228_v47 }
 0x267   : > { %2055 = vmatpush1.bf16.msra.mxu1 %v8146_v49  ;;  %v8226_v49 = vld [vmem:[#allocation13 + $0x690] ss:$24 sps:$4 sm:$0xff]  }
 0x268   : > { %2056 = vmatprep.subr.bf16.mxu1 %v8151_v50  ;;  %3576 = vmatpush1.bf16.msra.mxu0 %v8226_v49  ;;  %v8231_v50 = vld [vmem:[#allocation13 + $0x6c4] ss:$24 sps:$4 sm:$0xff]  }
 0x269   : > { %3577 = vmatprep.subr.bf16.mxu0 %v8231_v50 }
 0x26b   : > { %2057 = vmatpush1.bf16.msra.mxu1 %v8149_v51  ;;  %v8234_v51 = vld [vmem:[#allocation13 + $0x30c] ss:$24 sps:$4 sm:$0xff]  }
 0x26c   : > { %2058 = vmatprep.subr.bf16.mxu1 %v8154_v52  ;;  %v8229_v52 = vld [vmem:[#allocation13 + $0x6c0] ss:$24 sps:$4 sm:$0xff]  }
 0x26d   : > { %3578 = vmatpush1.bf16.msra.mxu0 %v8229_v52 }
 0x26f   : > { %2059 = vmatpush1.bf16.msra.mxu1 %v8152_v53  ;;  %v8237_v53 = vld [vmem:[#allocation13 + $0x6f4] ss:$24 sps:$4 sm:$0xff]  }
 0x270   : > { %2060 = vmatprep.subr.bf16.mxu1 %v8157_v54  ;;  %v8235_v54 = vld [vmem:[#allocation13 + $0x6f0] ss:$24 sps:$4 sm:$0xff]   ;;  %3579 = vmatprep.subr.bf16.mxu0 %v8237_v53 }
 0x271   : > { %3580 = vmatpush1.bf16.msra.mxu0 %v8235_v54 }
 0x273   : > { %2061 = vmatpush1.bf16.msra.mxu1 %v8155_v55  ;;  %v8243_v55 = vld [vmem:[#allocation13 + $0x724] ss:$24 sps:$4 sm:$0xff]  }
 0x274   : > { %2062 = vmatprep.subr.bf16.mxu1 %v8160_v56  ;;  %v8241_v56 = vld [vmem:[#allocation13 + $0x720] ss:$24 sps:$4 sm:$0xff]   ;;  %3581 = vmatprep.subr.bf16.mxu0 %v8243_v55  ;;  %v9771_v55 = vsub.s32 4, %v9735_v41 }
 0x275   : > { %3582 = vmatpush1.bf16.msra.mxu0 %v8241_v56  ;;  %v9774_v56 = vsub.s32 5, %v9735_v41 }
 0x277   : > { %2063 = vmatpush1.bf16.msra.mxu1 %v8158_v57  ;;  %v8249_v57 = vld [vmem:[#allocation13 + $0x754] ss:$24 sps:$4 sm:$0xff]  }
 0x278   : > { %2064 = vmatprep.subr.bf16.mxu1 %v8163_v58  ;;  %v8247_v58 = vld [vmem:[#allocation13 + $0x750] ss:$24 sps:$4 sm:$0xff]   ;;  %3583 = vmatprep.subr.bf16.mxu0 %v8249_v57  ;;  %v9776_v57 = vld [vmem:[#allocation14] sm:$0xff] }
 0x279   : > { %3584 = vmatpush1.bf16.msra.mxu0 %v8247_v58  ;;  %v2156_v58 = vrot.slane %v9776_v57, %v9771_v55 }
 0x27b   : > { %2065 = vmatpush1.bf16.msra.mxu1 %v8161_v59  ;;  %v8255_v59 = vld [vmem:[#allocation13 + $0x784] ss:$24 sps:$4 sm:$0xff]  }
 0x27c   : > { %2066 = vmatprep.subr.bf16.mxu1 %v8166_v60  ;;  %v8253_v60 = vld [vmem:[#allocation13 + $0x780] ss:$24 sps:$4 sm:$0xff]   ;;  %3585 = vmatprep.subr.bf16.mxu0 %v8255_v59 }
 0x27d   : > { %3586 = vmatpush1.bf16.msra.mxu0 %v8253_v60  ;;  %v9780_v60 = vld [vmem:[#allocation14 + $0x8] sm:$0xff] }
 0x27f   : > { %2067 = vmatpush1.bf16.msra.mxu1 %v8164_v61  ;;  %v8261_v61 = vld [vmem:[#allocation13 + $0x7b4] ss:$24 sps:$4 sm:$0xff]  }
 0x280   : > { %3528 = vmatprep.subr.bf16.mxu1 %v8169_v63  ;;  %3587 = vmatprep.subr.bf16.mxu0 %v8261_v61  ;;  %v8267_v63 = vld [vmem:[#allocation13 + $0x7e4] ss:$24 sps:$4 sm:$0xff]   ;;  %v2160_v61 = vrot.slane %v9780_v60, %v9771_v55 }
 0x282   : > { %2069 = vmatmul.mubr.bf16.vlgmr.msra.gmra.mrb[4].mxu1 %v1271_v36 }
 0x283   : > { %3529 = vmatpush1.bf16.msra.mxu1 %v8167_v62  ;;  %v8259_v62 = vld [vmem:[#allocation13 + $0x7b0] ss:$24 sps:$4 sm:$0xff]  }
 0x284   : > { %3530 = vmatprep.subr.bf16.mxu1 %v8172_v1  ;;  %3588 = vmatpush1.bf16.msra.mxu0 %v8259_v62  ;;  %v8265_v1 = vld [vmem:[#allocation13 + $0x7e0] ss:$24 sps:$4 sm:$0xff]  }
 0x285   : > { %3589 = vmatprep.subr.bf16.mxu0 %v8267_v63 }
 0x287   : > { %3531 = vmatpush1.bf16.msra.mxu1 %v8170_v2  ;;  %v8273_v2 = vld [vmem:[#allocation13 + $0x814] ss:$24 sps:$4 sm:$0xff]  }
 0x288   : > { %3532 = vmatprep.subr.bf16.mxu1 %v8175_v3  ;;  %3590 = vmatpush1.bf16.msra.mxu0 %v8265_v1  ;;  %v8271_v3 = vld [vmem:[#allocation13 + $0x810] ss:$24 sps:$4 sm:$0xff]   ;;  %v2176_v1 = vrot.slane %v9776_v57, %v9774_v56 }
 0x289   : > { %3591 = vmatprep.subr.bf16.mxu0 %v8273_v2 }
 0x28b   : > { %3533 = vmatpush1.bf16.msra.mxu1 %v8173_v4  ;;  %v8279_v4 = vld [vmem:[#allocation13 + $0x844] ss:$24 sps:$4 sm:$0xff]  }
 0x28c   : > { %3534 = vmatprep.subr.bf16.mxu1 %v8178_v5  ;;  %3592 = vmatpush1.bf16.msra.mxu0 %v8271_v3  ;;  %v8277_v5 = vld [vmem:[#allocation13 + $0x840] ss:$24 sps:$4 sm:$0xff]   ;;  %v2180_v3 = vrot.slane %v9780_v60, %v9774_v56 }
 0x28d   : > { %3593 = vmatprep.subr.bf16.mxu0 %v8279_v4 }
 0x28f   : > { %3535 = vmatpush1.bf16.msra.mxu1 %v8176_v6  ;;  %v8285_v6 = vld [vmem:[#allocation13 + $0x874] ss:$24 sps:$4 sm:$0xff]  }
 0x290   : > { %3536 = vmatprep.subr.bf16.mxu1 %v8181_v7  ;;  %3594 = vmatpush1.bf16.msra.mxu0 %v8277_v5  ;;  %v8283_v7 = vld [vmem:[#allocation13 + $0x870] ss:$24 sps:$4 sm:$0xff]  }
 0x291   : > { %3595 = vmatprep.subr.bf16.mxu0 %v8285_v6 }
 0x293   : > { %3537 = vmatpush1.bf16.msra.mxu1 %v8179_v8  ;;  %v8291_v8 = vld [vmem:[#allocation13 + $0x8a4] ss:$24 sps:$4 sm:$0xff]  }
 0x294   : > { %3538 = vmatprep.subr.bf16.mxu1 %v8184_v9  ;;  %3596 = vmatpush1.bf16.msra.mxu0 %v8283_v7  ;;  %v8289_v9 = vld [vmem:[#allocation13 + $0x8a0] ss:$24 sps:$4 sm:$0xff]  }
 0x295   : > { %3597 = vmatprep.subr.bf16.mxu0 %v8291_v8 }
 0x297   : > { %3539 = vmatpush1.bf16.msra.mxu1 %v8182_v10  ;;  %v8295_v10 = vld [vmem:[#allocation13 + $0x8d0] ss:$24 sps:$4 sm:$0xff]  }
 0x298   : > { %3540 = vmatprep.subr.bf16.mxu1 %v8187_v11  ;;  %3598 = vmatpush1.bf16.msra.mxu0 %v8289_v9  ;;  %v8297_v11 = vld [vmem:[#allocation13 + $0x8d4] ss:$24 sps:$4 sm:$0xff]  }
 0x299   : > { %3599 = vmatprep.subr.bf16.mxu0 %v8297_v11 }
 0x29b   : > { %3541 = vmatpush1.bf16.msra.mxu1 %v8185_v12  ;;  %v8306_v12 = vld [vmem:[#allocation13 + $0x60c] ss:$24 sps:$4 sm:$0xff]  }
 0x29c   : > { %3542 = vmatprep.subr.bf16.mxu1 %v8190_v13  ;;  %3600 = vmatpush1.bf16.msra.mxu0 %v8295_v10 }
 0x29d   : > { %3651 = vmatprep.subr.bf16.mxu0 %v8306_v12 }
 0x29f   : > { %3543 = vmatpush1.bf16.msra.mxu1 %v8188_v14 }
 0x2a0   : > { %3544 = vmatprep.subr.bf16.mxu1 %v8193_v15 }
 0x2a3   : > { %3545 = vmatpush1.bf16.msra.mxu1 %v8191_v16 }
 0x2a4   : > { %3546 = vmatprep.subr.bf16.mxu1 %v8196_v17 }
 0x2a7   : > { %3547 = vmatpush1.bf16.msra.mxu1 %v8194_v19 }
 0x2a8   : > { %3548 = vmatprep.subr.bf16.mxu1 %v8200_v22 }
 0x2ab   : > { %3549 = vmatpush1.bf16.msra.mxu1 %v8198_v23 }
 0x2ac   : > { %3550 = vmatprep.subr.bf16.mxu1 %v8204_v25 }
 0x2af   : > { %3551 = vmatpush1.bf16.msra.mxu1 %v8202_v26 }
 0x2b0   : > { %3552 = vmatprep.subr.bf16.mxu1 %v8207_v29 }
 0x2b3   : > { %3553 = vmatpush1.bf16.msra.mxu1 %v8205_v31 }
 0x2b4   : > { %3554 = vmatprep.subr.bf16.mxu1 %v8213_v33 }
 0x2b7   : > { %3555 = vmatpush1.bf16.msra.mxu1 %v8211_v35 }
 0x2b8   : > { %3556 = vmatprep.subr.bf16.mxu1 %v8219_v37 }
 0x2bb   : > { %3557 = vmatpush1.bf16.msra.mxu1 %v8217_v42 }
 0x2bc   : > { %3558 = vmatprep.subr.bf16.mxu1 %v8225_v46 }
 0x2bf   : > { %3559 = vmatpush1.bf16.msra.mxu1 %v8223_v48 }
 0x2c0   : > { %3610 = vmatprep.subr.bf16.mxu1 %v8234_v51 }
 0x2d5   : > { %v9766_v36 = vpop.f32.mrb[0].mxu1 }
 0x2d6   : > { %v9768_v40 = vpop.f32.mrb[1].mxu1 }
 0x2d7   : > { %v861_v45 = vpop.f32.mrb[2].mxu1 }
 0x2d8   : > { %v862_v38 = vpop.f32.mrb[3].mxu1 }
 0x325   : > { %v1988_v13 = vpop.f32.mrb[12].mxu0 }
 0x326   : > { %v2077_v14 = vrot.slane %v1988_v13, 4  ;;  %v1990_v15 = vpop.f32.mrb[13].mxu0 }
 0x327   : > { %v2083_v16 = vrot.slane %v1990_v15, 4  ;;  %v1992_v17 = vpop.f32.mrb[14].mxu0 }
 0x328   : > { %v2078_v19 = vadd.f32 %v2077_v14, %v1988_v13  ;;  %v1993_v20 = vpop.f32.mrb[15].mxu0 }
 0x329   : > { %v2084_v21 = vadd.f32 %v2083_v16, %v1990_v15 }
 0x32a   : > { %v2079_v22 = vrot.slane %v2078_v19, 2 }
 0x32b   : > { %v2085_v23 = vrot.slane %v2084_v21, 2 }
 0x32c   : > { %v2080_v24 = vadd.f32 %v2079_v22, %v2078_v19 }
 0x32d   : > { %v2086_v25 = vadd.f32 %v2085_v23, %v2084_v21 }
 0x32e   : > { %v2081_v26 = vrot.slane %v2080_v24, 1 }
 0x32f   : > { %v2087_v27 = vrot.slane %v2086_v25, 1 }
 0x330   : > { %v2082_v28 = vadd.f32 %v2081_v26, %v2080_v24  ;;  %v8232_v26 = vld [vmem:[#allocation13 + $0x308] ss:$24 sps:$4 sm:$0xff]  }
 0x331   : > { %v2088_v29 = vadd.f32 %v2087_v27, %v2086_v25 }
 0x332   : > { %v2101_v30 = vmul.f32 0.125, %v2082_v28 }
 0x333   : > { %v2102_v31 = vmul.f32 0.125, %v2088_v29  ;;  %v8240_v29 = vld [vmem:[#allocation13 + $0x33c] ss:$24 sps:$4 sm:$0xff]  }
 0x334   : > { %v2105_v32 = vsub.f32 %v1988_v13, %v2101_v30 }
 0x335   : > { %v2106_v33 = vsub.f32 %v1990_v15, %v2102_v31 }
 0x336   : > { %v2109_v34 = vmul.f32 %v2105_v32, %v2105_v32 }
 0x337   : > { %v2110_v35 = vmul.f32 %v2106_v33, %v2106_v33 }
 0x338   : > { %v2113_v18 = vrot.slane %v2109_v34, 4 }
 0x339   : > { %v2119_v37 = vrot.slane %v2110_v35, 4 }
 0x33a   : > { %v2114_v39 = vadd.f32 %v2113_v18, %v2109_v34 }
 0x33b   : > { %v2120_v42 = vadd.f32 %v2119_v37, %v2110_v35  ;;  %v8246_v35 = vld [vmem:[#allocation13 + $0x36c] ss:$24 sps:$4 sm:$0xff]  }
 0x33c   : > { %v2115_v44 = vrot.slane %v2114_v39, 2 }
 0x33d   : > { %v2121_v45 = vrot.slane %v2120_v42, 2 }
 0x33e   : > { %v2116_v38 = vadd.f32 %v2115_v44, %v2114_v39 }
 0x33f   : > { %v2122_v46 = vadd.f32 %v2121_v45, %v2120_v42  ;;  %v8244_v42 = vld [vmem:[#allocation13 + $0x368] ss:$24 sps:$4 sm:$0xff]   ;;  %v8252_v45 = vld [vmem:[#allocation13 + $0x39c] ss:$24 sps:$4 sm:$0xff]  }
 0x340   : > { %v2117_v47 = vrot.slane %v2116_v38, 1 }
 0x341   : > { %v2123_v48 = vrot.slane %v2122_v46, 1 }
 0x342   : > { %v2118_v49 = vadd.f32 %v2117_v47, %v2116_v38 }
 0x343   : > { %v2124_v50 = vadd.f32 %v2123_v48, %v2122_v46  ;;  %v8250_v48 = vld [vmem:[#allocation13 + $0x398] ss:$24 sps:$4 sm:$0xff]  }
 0x344   : > { %v2137_v51 = vmul.f32 0.125, %v2118_v49 }
 0x345   : > { %v2138_v52 = vmul.f32 0.125, %v2124_v50  ;;  %v8258_v50 = vld [vmem:[#allocation13 + $0x3cc] ss:$24 sps:$4 sm:$0xff]  }
 0x346   : > { %v2141_v53 = vadd.f32 1e-05, %v2137_v51 }
 0x347   : > { %v2142_v54 = vadd.f32 1e-05, %v2138_v52 }
 0x348   : > { %8993 = vrsqrt.f32 %v2141_v53 }
 0x349   : > { %8995 = vrsqrt.f32 %v2142_v54  ;;  %v8256_v54 = vld [vmem:[#allocation13 + $0x3c8] ss:$24 sps:$4 sm:$0xff]  }
 0x352   : > { %v8994_v59 = vpop.eup %8993 }
 0x353   : > { %v8996_v62 = vpop.eup %8995  ;;  %v2149_v63 = vmul.f32 %v8994_v59, %v2105_v32  ;;  %v8264_v59 = vld [vmem:[#allocation13 + $0x3fc] ss:$24 sps:$4 sm:$0xff]  }
 0x354   : > { %v2150_v2 = vmul.f32 %v8996_v62, %v2106_v33  ;;  %v8238_v33 = vld [vmem:[#allocation13 + $0x338] ss:$24 sps:$4 sm:$0xff]  }
 0x355   : > { %v2169_v4 = vmul.f32 %v2156_v58, %v2149_v63  ;;  %v2070_v5 = vpop.f32.mrb[4].mxu1 }
 0x356   : > { %v2170_v6 = vmul.f32 %v2160_v61, %v2150_v2  ;;  %v2089_v7 = vrot.slane %v2070_v5, 4  ;;  %v2072_v8 = vpop.f32.mrb[5].mxu1 }
 0x357   : > { %v2189_v9 = vadd.f32 %v2176_v1, %v2169_v4  ;;  %v2095_v10 = vrot.slane %v2072_v8, 4  ;;  %v2074_v11 = vpop.f32.mrb[6].mxu1  ;;  %v8262_v1 = vld [vmem:[#allocation13 + $0x3f8] ss:$24 sps:$4 sm:$0xff]  }
 0x358   : > { %v2090_v12 = vadd.f32 %v2089_v7, %v2070_v5  ;;  %v2075_v13 = vpop.f32.mrb[7].mxu1  ;;  %v2190_v14 = vadd.f32 %v2180_v3, %v2170_v6  ;;  %v8270_v3 = vld [vmem:[#allocation13 + $0x42c] ss:$24 sps:$4 sm:$0xff]   ;;  %v8268_v7 = vld [vmem:[#allocation13 + $0x428] ss:$24 sps:$4 sm:$0xff]  }
 0x359   : > { %v2096_v15 = vadd.f32 %v2095_v10, %v2072_v8  ;;  %vm2193_vm9 = vcmp.gt.f32.partialorder %v2189_v9, 0.0  ;;  %v2197_v16 = vmul.f32 0.2, %v2189_v9  ;;  %v8274_v11 = vld [vmem:[#allocation13 + $0x458] ss:$24 sps:$4 sm:$0xff]   ;;  %v870_v13 = vrot.slane %v9768_v40, 4 }
 0x35a   : > { %v2091_v17 = vrot.slane %v2090_v12, 2  ;;  %vm2194_vm10 = vcmp.gt.f32.partialorder %v2190_v14, 0.0  ;;  %v2198_v19 = vmul.f32 0.2, %v2190_v14 }
 0x35b   : > { %v2097_v20 = vrot.slane %v2096_v15, 2  ;;  %v2201_v21 = vsel %vm2193_vm9, %v2189_v9, %v2197_v16  ;;  %v8276_v9 = vld [vmem:[#allocation13 + $0x45c] ss:$24 sps:$4 sm:$0xff]   ;;  %v871_v16 = vadd.f32 %v870_v13, %v9768_v40 }
 0x35c   : > { %v2092_v22 = vadd.f32 %v2091_v17, %v2090_v12  ;;  %v2202_v23 = vsel %vm2194_vm10, %v2190_v14, %v2198_v19  ;;  %v9790_v28 = vpack.c.bf16 %v2201_v21, %v2201_v21  ;;  %v8282_v12 = vld [vmem:[#allocation13 + $0x48c] ss:$24 sps:$4 sm:$0xff]   ;;  %v8280_v14 = vld [vmem:[#allocation13 + $0x488] ss:$24 sps:$4 sm:$0xff]   ;;  %v9015_v17 = vld [vmem:[#allocation14 + $0x10] sm:$0xff] }
 0x35d   : > { %v2098_v24 = vadd.f32 %v2097_v20, %v2096_v15  ;;  %v9788_v25 = vpack.c.bf16 %v2202_v23, %v2202_v23  ;;  %v8288_v15 = vld [vmem:[#allocation13 + $0x4bc] ss:$24 sps:$4 sm:$0xff]   ;;  %v2164_v19 = vrot.slane %v9015_v17, %v9771_v55  ;;  %v8286_v20 = vld [vmem:[#allocation13 + $0x4b8] ss:$24 sps:$4 sm:$0xff]  }
 0x35e   : > { %v2093_v27 = vrot.slane %v2092_v22, 1  ;;  %v8333_v13 = vld [vmem:[#allocation13 + $0x6fc] ss:$24 sps:$4 sm:$0xff]  }
 0x35f   : > { %v2099_v30 = vrot.slane %v2098_v24, 1  ;;  %3560 = vmatprep.mubr.bf16.mxu1 %v9788_v25 }
 0x360   : > { %v2094_v31 = vadd.f32 %v2093_v27, %v2092_v22  ;;  %3561 = vmatmul.mubr.bf16.vlgmr.msra.gmra.mrb[8].mxu1 %v9790_v28  ;;  %v9016_v22 = vld [vmem:[#allocation14 + $0x18] sm:$0xff]  ;;  %v2184_v27 = vrot.slane %v9015_v17, %v9774_v56 }
 0x361   : > { %v2100_v32 = vadd.f32 %v2099_v30, %v2098_v24  ;;  %3611 = vmatpush1.bf16.msra.mxu1 %v8232_v26  ;;  %3642 = vmatprep.mubr.bf16.mxu1 %v9788_v25  ;;  %v2168_v23 = vrot.slane %v9016_v22, %v9771_v55  ;;  %v8294_v24 = vld [vmem:[#allocation13 + $0x4ec] ss:$24 sps:$4 sm:$0xff]   ;;  %v2188_v30 = vrot.slane %v9016_v22, %v9774_v56  ;;  %v8334_v17 = vld [vmem:[#allocation13 + $0x340] ss:$24 sps:$4 sm:$0xff]  }
 0x362   : > { %v2103_v34 = vmul.f32 0.125, %v2094_v31  ;;  %3612 = vmatprep.subr.bf16.mxu1 %v8240_v29  ;;  %v872_v31 = vrot.slane %v871_v16, 2  ;;  %v8303_v56 = vld [vmem:[#allocation13 + $0x54c] ss:$24 sps:$4 sm:$0xff]  }
 0x363   : > { %v2104_v18 = vmul.f32 0.125, %v2100_v32 }
 0x364   : > { %v9795_v37 = vsub.f32 %v2070_v5, %v2103_v34  ;;  %v8292_v34 = vld [vmem:[#allocation13 + $0x4e8] ss:$24 sps:$4 sm:$0xff]   ;;  %v873_v55 = vadd.f32 %v872_v31, %v871_v16  ;;  %v8331_v16 = vld [vmem:[#allocation13 + $0x6f8] ss:$24 sps:$4 sm:$0xff]  }
 0x365   : > { %v9797_v39 = vsub.f32 %v2072_v8, %v2104_v18  ;;  %3613 = vmatpush1.bf16.msra.mxu1 %v8238_v33  ;;  %v8300_v18 = vld [vmem:[#allocation13 + $0x51c] ss:$24 sps:$4 sm:$0xff]  }
 0x366   : > { %v2111_v44 = vmul.f32 %v9795_v37, %v9795_v37  ;;  %3614 = vmatprep.subr.bf16.mxu1 %v8246_v35 }
 0x367   : > { %v2112_v38 = vmul.f32 %v9797_v39, %v9797_v39 }
 0x368   : > { %v2125_v46 = vrot.slane %v2111_v44, 4 }
 0x369   : > { %v2131_v47 = vrot.slane %v2112_v38, 4  ;;  %3615 = vmatpush1.bf16.msra.mxu1 %v8244_v42 }
 0x36a   : > { %v2126_v49 = vadd.f32 %v2125_v46, %v2111_v44  ;;  %3616 = vmatprep.subr.bf16.mxu1 %v8252_v45  ;;  %v8298_v45 = vld [vmem:[#allocation13 + $0x518] ss:$24 sps:$4 sm:$0xff]  }
 0x36b   : > { %v2132_v51 = vadd.f32 %v2131_v47, %v2112_v38  ;;  %v874_v47 = vrot.slane %v873_v55, 1 }
 0x36c   : > { %v2127_v52 = vrot.slane %v2126_v49, 2 }
 0x36d   : > { %v2133_v53 = vrot.slane %v2132_v51, 2  ;;  %3617 = vmatpush1.bf16.msra.mxu1 %v8250_v48 }
 0x36e   : > { %v2128_v58 = vadd.f32 %v2127_v52, %v2126_v49  ;;  %3618 = vmatprep.subr.bf16.mxu1 %v8258_v50  ;;  %v8301_v49 = vld [vmem:[#allocation13 + $0x548] ss:$24 sps:$4 sm:$0xff]   ;;  %v8309_v52 = vld [vmem:[#allocation13 + $0x57c] ss:$24 sps:$4 sm:$0xff]  }
 0x36f   : > { %v2134_v61 = vadd.f32 %v2133_v53, %v2132_v51  ;;  %v8304_v50 = vld [vmem:[#allocation13 + $0x608] ss:$24 sps:$4 sm:$0xff]   ;;  %v8312_v53 = vld [vmem:[#allocation13 + $0x63c] ss:$24 sps:$4 sm:$0xff]  }
 0x370   : > { %v2129_v62 = vrot.slane %v2128_v58, 1 }
 0x371   : > { %v2135_v63 = vrot.slane %v2134_v61, 1  ;;  %3619 = vmatpush1.bf16.msra.mxu1 %v8256_v54  ;;  %v875_v54 = vadd.f32 %v874_v47, %v873_v55  ;;  %v8357_v55 = vld [vmem:[#allocation13 + $0x7bc] ss:$24 sps:$4 sm:$0xff]  }
 0x372   : > { %v2130_v2 = vadd.f32 %v2129_v62, %v2128_v58  ;;  %3620 = vmatprep.subr.bf16.mxu1 %v8264_v59  ;;  %v8307_v58 = vld [vmem:[#allocation13 + $0x578] ss:$24 sps:$4 sm:$0xff]   ;;  %v8318_v62 = vld [vmem:[#allocation13 + $0x66c] ss:$24 sps:$4 sm:$0xff]  }
 0x373   : > { %v2136_v4 = vadd.f32 %v2135_v63, %v2134_v61  ;;  %v8310_v59 = vld [vmem:[#allocation13 + $0x638] ss:$24 sps:$4 sm:$0xff]   ;;  %v8315_v61 = vld [vmem:[#allocation13 + $0x5ac] ss:$24 sps:$4 sm:$0xff]   ;;  %v878_v63 = vmul.f32 0.125, %v875_v54 }
 0x374   : > { %v2139_v5 = vmul.f32 0.125, %v2130_v2  ;;  %v8316_v2 = vld [vmem:[#allocation13 + $0x668] ss:$24 sps:$4 sm:$0xff]   ;;  %v8367_v54 = vld [vmem:[#allocation13 + $0x818] ss:$24 sps:$4 sm:$0xff]  }
 0x375   : > { %v2140_v6 = vmul.f32 0.125, %v2136_v4  ;;  %3621 = vmatpush1.bf16.msra.mxu1 %v8262_v1  ;;  %v8313_v1 = vld [vmem:[#allocation13 + $0x5a8] ss:$24 sps:$4 sm:$0xff]   ;;  %v8324_v4 = vld [vmem:[#allocation13 + $0x69c] ss:$24 sps:$4 sm:$0xff]  }
 0x376   : > { %v2143_v8 = vadd.f32 1e-05, %v2139_v5  ;;  %3622 = vmatprep.subr.bf16.mxu1 %v8270_v3  ;;  %v8321_v3 = vld [vmem:[#allocation13 + $0x5dc] ss:$24 sps:$4 sm:$0xff]   ;;  %v9819_v5 = vsub.f32 %v9768_v40, %v878_v63 }
 0x377   : > { %v2144_v10 = vadd.f32 1e-05, %v2140_v6  ;;  %v8319_v6 = vld [vmem:[#allocation13 + $0x5d8] ss:$24 sps:$4 sm:$0xff]   ;;  %v8336_v40 = vld [vmem:[#allocation13 + $0x344] ss:$24 sps:$4 sm:$0xff]  }
 0x378   : > { %8997 = vrsqrt.f32 %v2143_v8  ;;  %v8327_v8 = vld [vmem:[#allocation13 + $0x6cc] ss:$24 sps:$4 sm:$0xff]  }
 0x379   : > { %8999 = vrsqrt.f32 %v2144_v10  ;;  %3623 = vmatpush1.bf16.msra.mxu1 %v8268_v7  ;;  %v8322_v7 = vld [vmem:[#allocation13 + $0x698] ss:$24 sps:$4 sm:$0xff]   ;;  %v882_v10 = vmul.f32 %v9819_v5, %v9819_v5 }
 0x37a   : > { %3624 = vmatprep.subr.bf16.mxu1 %v8276_v9  ;;  %v8330_v9 = vld [vmem:[#allocation13 + $0x314] ss:$24 sps:$4 sm:$0xff]  }
 0x37d   : > { %3625 = vmatpush1.bf16.msra.mxu1 %v8274_v11  ;;  %v8325_v11 = vld [vmem:[#allocation13 + $0x6c8] ss:$24 sps:$4 sm:$0xff]  }
 0x37e   : > { %3626 = vmatprep.subr.bf16.mxu1 %v8282_v12  ;;  %v8328_v12 = vld [vmem:[#allocation13 + $0x310] ss:$24 sps:$4 sm:$0xff]  }
 0x381   : > { %3627 = vmatpush1.bf16.msra.mxu1 %v8280_v14  ;;  %v889_v14 = vrot.slane %v882_v10, 4 }
 0x382   : > { %v8998_v21 = vpop.eup %8997  ;;  %3628 = vmatprep.subr.bf16.mxu1 %v8288_v15  ;;  %v9824_v15 = vpop.f32.mrb[16].mxu0 }
 0x383   : > { %v9000_v26 = vpop.eup %8999  ;;  %v2151_v29 = vmul.f32 %v8998_v21, %v9795_v37  ;;  %v8342_v21 = vld [vmem:[#allocation13 + $0x374] ss:$24 sps:$4 sm:$0xff]  }
 0x384   : > { %v2152_v32 = vmul.f32 %v9000_v26, %v9797_v39  ;;  %v8337_v26 = vld [vmem:[#allocation13 + $0x728] ss:$24 sps:$4 sm:$0xff]  }
 0x385   : > { %v2171_v33 = vmul.f32 %v2164_v19, %v2151_v29  ;;  %3629 = vmatpush1.bf16.msra.mxu1 %v8286_v20  ;;  %v7733_v19 = vpop.f32.mrb[17].mxu0  ;;  %v8339_v20 = vld [vmem:[#allocation13 + $0x72c] ss:$24 sps:$4 sm:$0xff]   ;;  %v8345_v29 = vld [vmem:[#allocation13 + $0x75c] ss:$24 sps:$4 sm:$0xff]  }
 0x386   : > { %v2172_v35 = vmul.f32 %v2168_v23, %v2152_v32  ;;  %3630 = vmatprep.subr.bf16.mxu1 %v8294_v24  ;;  %v2268_v22 = vpop.f32.mrb[18].mxu0  ;;  %v890_v24 = vadd.f32 %v889_v14, %v882_v10  ;;  %v8343_v32 = vld [vmem:[#allocation13 + $0x758] ss:$24 sps:$4 sm:$0xff]   ;;  %v8387_v10 = vld [vmem:[#allocation13 + $0x8ac] ss:$24 sps:$4 sm:$0xff]  }
 0x387   : > { %v2191_v42 = vadd.f32 %v2184_v27, %v2171_v33  ;;  %v7734_v23 = vpop.f32.mrb[19].mxu0  ;;  %v8340_v27 = vld [vmem:[#allocation13 + $0x370] ss:$24 sps:$4 sm:$0xff]   ;;  %v8351_v33 = vld [vmem:[#allocation13 + $0x78c] ss:$24 sps:$4 sm:$0xff]  }
 0x388   : > { %v2192_v44 = vadd.f32 %v2188_v30, %v2172_v35  ;;  %v8348_v30 = vld [vmem:[#allocation13 + $0x3a4] ss:$24 sps:$4 sm:$0xff]   ;;  %v891_v31 = vrot.slane %v890_v24, 2  ;;  %v8391_v19 = vld [vmem:[#allocation13 + $0x8d8] ss:$24 sps:$4 sm:$0xff]  }
 0x389   : > { %3631 = vmatpush1.bf16.msra.mxu1 %v8292_v34  ;;  %vm2195_vm11 = vcmp.gt.f32.partialorder %v2191_v42, 0.0  ;;  %v2199_v38 = vmul.f32 0.2, %v2191_v42  ;;  %v8354_v34 = vld [vmem:[#allocation13 + $0x3d4] ss:$24 sps:$4 sm:$0xff]  }
 0x38a   : > { %3632 = vmatprep.subr.bf16.mxu1 %v8300_v18  ;;  %vm2196_vm12 = vcmp.gt.f32.partialorder %v2192_v44, 0.0  ;;  %v2200_v37 = vmul.f32 0.2, %v2192_v44  ;;  %v892_v35 = vadd.f32 %v891_v31, %v890_v24  ;;  %v8349_v18 = vld [vmem:[#allocation13 + $0x788] ss:$24 sps:$4 sm:$0xff]  }
 0x38b   : > { %v2203_v46 = vsel %vm2195_vm11, %v2191_v42, %v2199_v38  ;;  %v8352_v42 = vld [vmem:[#allocation13 + $0x3d0] ss:$24 sps:$4 sm:$0xff]   ;;  %v8393_v14 = vld [vmem:[#allocation13 + $0x8dc] ss:$24 sps:$4 sm:$0xff]  }
 0x38c   : > { %v2204_v39 = vsel %vm2196_vm12, %v2192_v44, %v2200_v37  ;;  %v9813_v51 = vpack.c.bf16 %v2203_v46, %v2203_v46  ;;  %v8360_v44 = vld [vmem:[#allocation13 + $0x404] ss:$24 sps:$4 sm:$0xff]   ;;  %v8355_v38 = vld [vmem:[#allocation13 + $0x7b8] ss:$24 sps:$4 sm:$0xff]   ;;  %v8366_v46 = vld [vmem:[#allocation13 + $0x434] ss:$24 sps:$4 sm:$0xff]  }
 0x38d   : > { %3633 = vmatpush1.bf16.msra.mxu1 %v8298_v45  ;;  %v9811_v48 = vpack.c.bf16 %v2204_v39, %v2204_v39  ;;  %v893_v45 = vrot.slane %v892_v35, 1  ;;  %v8358_v37 = vld [vmem:[#allocation13 + $0x400] ss:$24 sps:$4 sm:$0xff]   ;;  %v8399_v23 = vld [vmem:[#allocation13 + $0x554] ss:$24 sps:$4 sm:$0xff]  }
 0x38e   : > { %3634 = vmatprep.subr.bf16.mxu1 %v8303_v56  ;;  %v8363_v56 = vld [vmem:[#allocation13 + $0x7ec] ss:$24 sps:$4 sm:$0xff]   ;;  %v8361_v39 = vld [vmem:[#allocation13 + $0x7e8] ss:$24 sps:$4 sm:$0xff]  }
 0x38f   : > { %3601 = vmatprep.mubr.bf16.mxu0 %v9811_v48  ;;  %v894_v47 = vadd.f32 %v893_v45, %v892_v35  ;;  %v8402_v24 = vld [vmem:[#allocation13 + $0x614] ss:$24 sps:$4 sm:$0xff]   ;;  %v8400_v31 = vld [vmem:[#allocation13 + $0x610] ss:$24 sps:$4 sm:$0xff]   ;;  %v8403_v35 = vld [vmem:[#allocation13 + $0x580] ss:$24 sps:$4 sm:$0xff]  }
 0x390   : > { %3602 = vmatmul.mubr.bf16.vlgmr.msra.gmra.mrb[20].mxu0 %v9813_v51  ;;  %v8409_v45 = vld [vmem:[#allocation13 + $0x5b0] ss:$24 sps:$4 sm:$0xff]  }
 0x391   : > { %3635 = vmatpush1.bf16.msra.mxu1 %v8301_v49  ;;  %3652 = vmatpush1.bf16.msra.mxu0 %v8304_v50  ;;  %v8364_v49 = vld [vmem:[#allocation13 + $0x430] ss:$24 sps:$4 sm:$0xff]   ;;  %v8369_v50 = vld [vmem:[#allocation13 + $0x81c] ss:$24 sps:$4 sm:$0xff]  }
 0x392   : > { %3683 = vmatprep.mubr.bf16.mxu0 %v9811_v48  ;;  %3636 = vmatprep.subr.bf16.mxu1 %v8309_v52  ;;  %v8372_v52 = vld [vmem:[#allocation13 + $0x464] ss:$24 sps:$4 sm:$0xff]  }
 0x393   : > { %3653 = vmatprep.subr.bf16.mxu0 %v8312_v53  ;;  %v896_v53 = vmul.f32 0.125, %v894_v47  ;;  %v8420_v47 = vld [vmem:[#allocation13 + $0x6a4] ss:$24 sps:$4 sm:$0xff]  }
 0x395   : > { %3637 = vmatpush1.bf16.msra.mxu1 %v8307_v58  ;;  %3654 = vmatpush1.bf16.msra.mxu0 %v8310_v59  ;;  %v8370_v58 = vld [vmem:[#allocation13 + $0x460] ss:$24 sps:$4 sm:$0xff]   ;;  %v864_v59 = vrot.slane %v9766_v36, 4  ;;  %v898_v63 = vadd.f32 1e-05, %v896_v53 }
 0x396   : > { %3638 = vmatprep.subr.bf16.mxu1 %v8315_v61  ;;  %3655 = vmatprep.subr.bf16.mxu0 %v8318_v62  ;;  %v8375_v61 = vld [vmem:[#allocation13 + $0x84c] ss:$24 sps:$4 sm:$0xff]   ;;  %v8424_v53 = vld [vmem:[#allocation13] ss:$24 sps:$4 sm:$0xff]  }
 0x397   : > { %v8378_v62 = vld [vmem:[#allocation13 + $0x494] ss:$24 sps:$4 sm:$0xff]   ;;  %9001 = vrsqrt.f32 %v898_v63  ;;  %v8427_v63 = vld [vmem:[#allocation13 + $0x700] ss:$24 sps:$4 sm:$0xff]  }
 0x399   : > { %3639 = vmatpush1.bf16.msra.mxu1 %v8313_v1  ;;  %3656 = vmatpush1.bf16.msra.mxu0 %v8316_v2  ;;  %v8373_v1 = vld [vmem:[#allocation13 + $0x848] ss:$24 sps:$4 sm:$0xff]  }
 0x39a   : > { %3640 = vmatprep.subr.bf16.mxu1 %v8321_v3  ;;  %3657 = vmatprep.subr.bf16.mxu0 %v8324_v4  ;;  %v8376_v2 = vld [vmem:[#allocation13 + $0x490] ss:$24 sps:$4 sm:$0xff]   ;;  %v865_v3 = vadd.f32 %v864_v59, %v9766_v36  ;;  %v8381_v4 = vld [vmem:[#allocation13 + $0x87c] ss:$24 sps:$4 sm:$0xff]  }
 0x39b   : > { %v8429_v59 = vld [vmem:[#allocation13 + $0x704] ss:$24 sps:$4 sm:$0xff]  }
 0x39d   : > { %3641 = vmatpush1.bf16.msra.mxu1 %v8319_v6  ;;  %3658 = vmatpush1.bf16.msra.mxu0 %v8322_v7  ;;  %v8384_v6 = vld [vmem:[#allocation13 + $0x4c4] ss:$24 sps:$4 sm:$0xff]   ;;  %v8379_v7 = vld [vmem:[#allocation13 + $0x878] ss:$24 sps:$4 sm:$0xff]  }
 0x39e   : > { %3659 = vmatprep.subr.bf16.mxu0 %v8327_v8  ;;  %3692 = vmatprep.subr.bf16.mxu1 %v8330_v9  ;;  %v8382_v8 = vld [vmem:[#allocation13 + $0x4c0] ss:$24 sps:$4 sm:$0xff]   ;;  %v866_v9 = vrot.slane %v865_v3, 2 }
 0x3a0   : > { %3643 = vmatmul.mubr.bf16.vlgmr.msra.gmra.mrb[12].mxu1 %v9790_v28 }
 0x3a1   : > { %3660 = vmatpush1.bf16.msra.mxu0 %v8325_v11  ;;  %3693 = vmatpush1.bf16.msra.mxu1 %v8328_v12  ;;  %v8390_v11 = vld [vmem:[#allocation13 + $0x4f4] ss:$24 sps:$4 sm:$0xff]   ;;  %v8385_v12 = vld [vmem:[#allocation13 + $0x8a8] ss:$24 sps:$4 sm:$0xff]  }
 0x3a2   : > { %3724 = vmatprep.mubr.bf16.mxu1 %v9788_v25  ;;  %3661 = vmatprep.subr.bf16.mxu0 %v8333_v13  ;;  %v8346_v25 = vld [vmem:[#allocation13 + $0x3a0] ss:$24 sps:$4 sm:$0xff]   ;;  %v8388_v13 = vld [vmem:[#allocation13 + $0x4f0] ss:$24 sps:$4 sm:$0xff]  }
 0x3a3   : > { %3694 = vmatprep.subr.bf16.mxu1 %v8336_v40  ;;  %v867_v40 = vadd.f32 %v866_v9, %v865_v3  ;;  %v8435_v3 = vld [vmem:[#allocation13 + $0x734] ss:$24 sps:$4 sm:$0xff]  }
 0x3a4   : > { %v8444_v9 = vld [vmem:[#allocation13 + $0x94] ss:$24 sps:$4 sm:$0xff]  }
 0x3a5   : > { %3662 = vmatpush1.bf16.msra.mxu0 %v8331_v16  ;;  %3695 = vmatpush1.bf16.msra.mxu1 %v8334_v17  ;;  %v8396_v16 = vld [vmem:[#allocation13 + $0x524] ss:$24 sps:$4 sm:$0xff]   ;;  %v9830_v17 = vsub.s32 1, %v9735_v41  ;;  %v868_v22 = vrot.slane %v867_v40, 1 }
 0x3a6   : > { %3663 = vmatprep.subr.bf16.mxu0 %v8339_v20  ;;  %3696 = vmatprep.subr.bf16.mxu1 %v8342_v21  ;;  %v8394_v20 = vld [vmem:[#allocation13 + $0x520] ss:$24 sps:$4 sm:$0xff]   ;;  %v9002_v21 = vpop.eup %9001 }
 0x3a9   : > { %3664 = vmatpush1.bf16.msra.mxu0 %v8337_v26  ;;  %3697 = vmatpush1.bf16.msra.mxu1 %v8340_v27  ;;  %v9833_v26 = vsub.s32 2, %v9735_v41  ;;  %v902_v27 = vmul.f32 %v9002_v21, %v9819_v5  ;;  %v8456_v21 = vld [vmem:[#allocation13 + $0xf4] ss:$24 sps:$4 sm:$0xff]  }
 0x3aa   : > { %3665 = vmatprep.subr.bf16.mxu0 %v8345_v29  ;;  %3698 = vmatprep.subr.bf16.mxu1 %v8348_v30  ;;  %v910_v29 = vrot.slane %v9780_v60, %v9830_v17  ;;  %v8397_v30 = vld [vmem:[#allocation13 + $0x550] ss:$24 sps:$4 sm:$0xff]  }
 0x3ab   : > { %v920_v5 = vrot.slane %v9780_v60, %v9833_v26  ;;  %v8415_v60 = vld [vmem:[#allocation13 + $0x5e0] ss:$24 sps:$4 sm:$0xff]  }
 0x3ad   : > { %3666 = vmatpush1.bf16.msra.mxu0 %v8343_v32  ;;  %3699 = vmatpush1.bf16.msra.mxu1 %v8346_v25  ;;  %v869_v32 = vadd.f32 %v868_v22, %v867_v40  ;;  %v8405_v25 = vld [vmem:[#allocation13 + $0x584] ss:$24 sps:$4 sm:$0xff]   ;;  %v8451_v22 = vld [vmem:[#allocation13 + $0x7c0] ss:$24 sps:$4 sm:$0xff]  }
 0x3ae   : > { %3667 = vmatprep.subr.bf16.mxu0 %v8351_v33  ;;  %3700 = vmatprep.subr.bf16.mxu1 %v8354_v34  ;;  %v8408_v33 = vld [vmem:[#allocation13 + $0x644] ss:$24 sps:$4 sm:$0xff]   ;;  %v912_v34 = vmul.f32 %v910_v29, %v902_v27  ;;  %v8459_v27 = vld [vmem:[#allocation13 + $0x7f4] ss:$24 sps:$4 sm:$0xff]  }
 0x3af   : > { %v8450_v40 = vld [vmem:[#allocation13 + $0xc4] ss:$24 sps:$4 sm:$0xff]  }
 0x3b0   : > { %v8462_v29 = vld [vmem:[#allocation13 + $0x124] ss:$24 sps:$4 sm:$0xff]  }
 0x3b1   : > { %3668 = vmatpush1.bf16.msra.mxu0 %v8349_v18  ;;  %3701 = vmatpush1.bf16.msra.mxu1 %v8352_v42  ;;  %v8406_v18 = vld [vmem:[#allocation13 + $0x640] ss:$24 sps:$4 sm:$0xff]   ;;  %v877_v42 = vmul.f32 0.125, %v869_v32 }
 0x3b2   : > { %3669 = vmatprep.subr.bf16.mxu0 %v8357_v55  ;;  %3702 = vmatprep.subr.bf16.mxu1 %v8360_v44  ;;  %v8411_v55 = vld [vmem:[#allocation13 + $0x5b4] ss:$24 sps:$4 sm:$0xff]  }
 0x3b3   : > { %v8414_v44 = vld [vmem:[#allocation13 + $0x674] ss:$24 sps:$4 sm:$0xff]  }
 0x3b5   : > { %3670 = vmatpush1.bf16.msra.mxu0 %v8355_v38  ;;  %3703 = vmatpush1.bf16.msra.mxu1 %v8358_v37  ;;  %v8412_v38 = vld [vmem:[#allocation13 + $0x670] ss:$24 sps:$4 sm:$0xff]   ;;  %v922_v37 = vadd.f32 %v920_v5, %v912_v34  ;;  %v8463_v34 = vld [vmem:[#allocation13 + $0x820] ss:$24 sps:$4 sm:$0xff]   ;;  %v8471_v5 = vld [vmem:[#allocation13 + $0x854] ss:$24 sps:$4 sm:$0xff]  }
 0x3b6   : > { %3671 = vmatprep.subr.bf16.mxu0 %v8363_v56  ;;  %3704 = vmatprep.subr.bf16.mxu1 %v8366_v46  ;;  %v9843_v56 = vsub.f32 %v9766_v36, %v877_v42  ;;  %v8417_v46 = vld [vmem:[#allocation13 + $0x5e4] ss:$24 sps:$4 sm:$0xff]   ;;  %v8421_v36 = vld [vmem:[#allocation13 + $0x6d0] ss:$24 sps:$4 sm:$0xff]  }
 0x3b7   : > { %vm924_vm13 = vcmp.gt.f32.partialorder %v922_v37, 0.0  ;;  %v8474_v42 = vld [vmem:[#allocation13 + $0x184] ss:$24 sps:$4 sm:$0xff]  }
 0x3b9   : > { %3672 = vmatpush1.bf16.msra.mxu0 %v8361_v39  ;;  %3705 = vmatpush1.bf16.msra.mxu1 %v8364_v49  ;;  %v926_v39 = vmul.f32 0.2, %v922_v37  ;;  %v881_v49 = vmul.f32 %v9843_v56, %v9843_v56 }
 0x3ba   : > { %3673 = vmatprep.subr.bf16.mxu0 %v8369_v50  ;;  %3706 = vmatprep.subr.bf16.mxu1 %v8372_v52  ;;  %v8423_v50 = vld [vmem:[#allocation13 + $0x6d4] ss:$24 sps:$4 sm:$0xff]   ;;  %v8426_v52 = vld [vmem:[#allocation13 + $0x4] ss:$24 sps:$4 sm:$0xff]  }
 0x3bd   : > { %3674 = vmatpush1.bf16.msra.mxu0 %v8367_v54  ;;  %3707 = vmatpush1.bf16.msra.mxu1 %v8370_v58  ;;  %v928_v54 = vsel %vm924_vm13, %v922_v37, %v926_v39  ;;  %v883_v58 = vrot.slane %v881_v49, 4  ;;  %v8475_v37 = vld [vmem:[#allocation13 + $0x880] ss:$24 sps:$4 sm:$0xff]  }
 0x3be   : > { %3675 = vmatprep.subr.bf16.mxu0 %v8375_v61  ;;  %3708 = vmatprep.subr.bf16.mxu1 %v8378_v62  ;;  %v8432_v61 = vld [vmem:[#allocation13 + $0x34] ss:$24 sps:$4 sm:$0xff]   ;;  %v9848_v62 = vpack.c.bf16 %v928_v54, %v928_v54  ;;  %v8484_v39 = vld [vmem:[#allocation13 + $0x1e0] ss:$24 sps:$4 sm:$0xff]   ;;  %v8495_v54 = vld [vmem:[#allocation13 + $0x244] ss:$24 sps:$4 sm:$0xff]  }
 0x3c1   : > { %3676 = vmatpush1.bf16.msra.mxu0 %v8373_v1  ;;  %3709 = vmatpush1.bf16.msra.mxu1 %v8376_v2  ;;  %v8430_v1 = vld [vmem:[#allocation13 + $0x30] ss:$24 sps:$4 sm:$0xff]   ;;  %v884_v2 = vadd.f32 %v883_v58, %v881_v49  ;;  %v8489_v49 = vld [vmem:[#allocation13 + $0x8e4] ss:$24 sps:$4 sm:$0xff]  }
 0x3c2   : > { %3677 = vmatprep.subr.bf16.mxu0 %v8381_v4  ;;  %3710 = vmatprep.subr.bf16.mxu1 %v8384_v6  ;;  %v8438_v4 = vld [vmem:[#allocation13 + $0x64] ss:$24 sps:$4 sm:$0xff]   ;;  %v8433_v6 = vld [vmem:[#allocation13 + $0x730] ss:$24 sps:$4 sm:$0xff]  }
 0x3c3   : > { %v8498_v58 = vld [vmem:[#allocation13 + $0xc] ss:$24 sps:$4 sm:$0xff]  }
 0x3c5   : > { %3678 = vmatpush1.bf16.msra.mxu0 %v8379_v7  ;;  %3711 = vmatpush1.bf16.msra.mxu1 %v8382_v8  ;;  %v8436_v7 = vld [vmem:[#allocation13 + $0x60] ss:$24 sps:$4 sm:$0xff]   ;;  %v885_v8 = vrot.slane %v884_v2, 2 }
 0x3c6   : > { %3679 = vmatprep.subr.bf16.mxu0 %v8387_v10  ;;  %3712 = vmatprep.subr.bf16.mxu1 %v8390_v11  ;;  %v8439_v10 = vld [vmem:[#allocation13 + $0x760] ss:$24 sps:$4 sm:$0xff]   ;;  %v8442_v11 = vld [vmem:[#allocation13 + $0x90] ss:$24 sps:$4 sm:$0xff]  }
 0x3c9   : > { %3680 = vmatpush1.bf16.msra.mxu0 %v8385_v12  ;;  %3713 = vmatpush1.bf16.msra.mxu1 %v8388_v13  ;;  %v886_v12 = vadd.f32 %v885_v8, %v884_v2  ;;  %v8447_v13 = vld [vmem:[#allocation13 + $0x794] ss:$24 sps:$4 sm:$0xff]   ;;  %v8507_v8 = vld [vmem:[#allocation13 + $0x2a4] ss:$24 sps:$4 sm:$0xff]  }
 0x3ca   : > { %3681 = vmatprep.subr.bf16.mxu0 %v8393_v14  ;;  %3714 = vmatprep.subr.bf16.mxu1 %v8396_v16  ;;  %v8445_v14 = vld [vmem:[#allocation13 + $0x790] ss:$24 sps:$4 sm:$0xff]   ;;  %v8448_v16 = vld [vmem:[#allocation13 + $0xc0] ss:$24 sps:$4 sm:$0xff]   ;;  %v8501_v2 = vld [vmem:[#allocation13 + $0x274] ss:$24 sps:$4 sm:$0xff]  }
 0x3cd   : > { %3682 = vmatpush1.bf16.msra.mxu0 %v8391_v19  ;;  %3715 = vmatpush1.bf16.msra.mxu1 %v8394_v20  ;;  %v887_v19 = vrot.slane %v886_v12, 1  ;;  %v8453_v20 = vld [vmem:[#allocation13 + $0x7c4] ss:$24 sps:$4 sm:$0xff]  }
 0x3ce   : > { %3716 = vmatprep.subr.bf16.mxu1 %v8399_v23  ;;  %3733 = vmatprep.subr.bf16.mxu0 %v8402_v24  ;;  %v8454_v23 = vld [vmem:[#allocation13 + $0xf0] ss:$24 sps:$4 sm:$0xff]  }
 0x3cf   : > { %v888_v24 = vadd.f32 %v887_v19, %v886_v12  ;;  %v8516_v12 = vld [vmem:[#allocation13 + $0x9c] ss:$24 sps:$4 sm:$0xff]  }
 0x3d0   : > { %3684 = vmatmul.mubr.bf16.vlgmr.msra.gmra.mrb[24].mxu0 %v9813_v51 }
 0x3d1   : > { %3717 = vmatpush1.bf16.msra.mxu1 %v8397_v30  ;;  %3734 = vmatpush1.bf16.msra.mxu0 %v8400_v31  ;;  %v8457_v30 = vld [vmem:[#allocation13 + $0x7f0] ss:$24 sps:$4 sm:$0xff]   ;;  %v8460_v31 = vld [vmem:[#allocation13 + $0x120] ss:$24 sps:$4 sm:$0xff]   ;;  %v895_v32 = vmul.f32 0.125, %v888_v24 }
 0x3d2   : > { %3765 = vmatprep.mubr.bf16.mxu0 %v9811_v48  ;;  %3718 = vmatprep.subr.bf16.mxu1 %v8405_v25  ;;  %v8418_v48 = vld [vmem:[#allocation13 + $0x6a0] ss:$24 sps:$4 sm:$0xff]   ;;  %v8465_v25 = vld [vmem:[#allocation13 + $0x824] ss:$24 sps:$4 sm:$0xff]  }
 0x3d3   : > { %3735 = vmatprep.subr.bf16.mxu0 %v8408_v33  ;;  %v8468_v33 = vld [vmem:[#allocation13 + $0x154] ss:$24 sps:$4 sm:$0xff]   ;;  %v8528_v24 = vld [vmem:[#allocation13 + $0x44] ss:$24 sps:$4 sm:$0xff]  }
 0x3d5   : > { %3719 = vmatpush1.bf16.msra.mxu1 %v8403_v35  ;;  %3736 = vmatpush1.bf16.msra.mxu0 %v8406_v18  ;;  %v8466_v35 = vld [vmem:[#allocation13 + $0x150] ss:$24 sps:$4 sm:$0xff]   ;;  %v897_v18 = vadd.f32 1e-05, %v895_v32 }
 0x3d6   : > { %3720 = vmatprep.subr.bf16.mxu1 %v8411_v55  ;;  %3737 = vmatprep.subr.bf16.mxu0 %v8414_v44  ;;  %v8469_v55 = vld [vmem:[#allocation13 + $0x850] ss:$24 sps:$4 sm:$0xff]   ;;  %v8472_v44 = vld [vmem:[#allocation13 + $0x180] ss:$24 sps:$4 sm:$0xff]  }
 0x3d7   : > { %9003 = vrsqrt.f32 %v897_v18  ;;  %v8529_v32 = vld [vmem:[#allocation13 + $0x128] ss:$24 sps:$4 sm:$0xff]  }
 0x3d8   : > { %v8538_v18 = vld [vmem:[#allocation13 + $0xa0] ss:$24 sps:$4 sm:$0xff]  }
 0x3d9   : > { %3721 = vmatpush1.bf16.msra.mxu1 %v8409_v45  ;;  %3738 = vmatpush1.bf16.msra.mxu0 %v8412_v38  ;;  %v8477_v45 = vld [vmem:[#allocation13 + $0x884] ss:$24 sps:$4 sm:$0xff]   ;;  %v8480_v38 = vld [vmem:[#allocation13 + $0x1b4] ss:$24 sps:$4 sm:$0xff]  }
 0x3da   : > { %3722 = vmatprep.subr.bf16.mxu1 %v8417_v46  ;;  %3739 = vmatprep.subr.bf16.mxu0 %v8420_v47  ;;  %v8478_v46 = vld [vmem:[#allocation13 + $0x1b0] ss:$24 sps:$4 sm:$0xff]   ;;  %v8483_v47 = vld [vmem:[#allocation13 + $0x8b4] ss:$24 sps:$4 sm:$0xff]  }
 0x3dd   : > { %3723 = vmatpush1.bf16.msra.mxu1 %v8415_v60  ;;  %3740 = vmatpush1.bf16.msra.mxu0 %v8418_v48  ;;  %v8486_v60 = vld [vmem:[#allocation13 + $0x1e4] ss:$24 sps:$4 sm:$0xff]   ;;  %v8481_v48 = vld [vmem:[#allocation13 + $0x8b0] ss:$24 sps:$4 sm:$0xff]  }
 0x3de   : > { %3741 = vmatprep.subr.bf16.mxu0 %v8423_v50  ;;  %4254 = vmatprep.subr.bf16.mxu1 %v8426_v52  ;;  %v8492_v50 = vld [vmem:[#allocation13 + $0x214] ss:$24 sps:$4 sm:$0xff]  }
 0x3e0   : > { %3725 = vmatmul.mubr.bf16.vlgmr.msra.gmra.mrb[16].mxu1 %v9790_v28  ;;  %v8441_v28 = vld [vmem:[#allocation13 + $0x764] ss:$24 sps:$4 sm:$0xff]  }
 0x3e1   : > { %3742 = vmatpush1.bf16.msra.mxu0 %v8421_v36  ;;  %4255 = vmatpush1.bf16.msra.mxu1 %v8424_v53  ;;  %v9004_v52 = vpop.eup %9003  ;;  %v8487_v36 = vld [vmem:[#allocation13 + $0x8e0] ss:$24 sps:$4 sm:$0xff]   ;;  %v8490_v53 = vld [vmem:[#allocation13 + $0x210] ss:$24 sps:$4 sm:$0xff]  }
 0x3e2   : > { %4286 = vmatprep.mubr.bf16.mxu1 %v9848_v62  ;;  %3743 = vmatprep.subr.bf16.mxu0 %v8429_v59  ;;  %v901_v59 = vmul.f32 %v9004_v52, %v9843_v56  ;;  %v8499_v56 = vld [vmem:[#allocation13 + $0x270] ss:$24 sps:$4 sm:$0xff]  }
 0x3e3   : > { %4256 = vmatprep.subr.bf16.mxu1 %v8432_v61  ;;  %v906_v61 = vrot.slane %v9776_v57, %v9830_v17 }
 0x3e5   : > { %3744 = vmatpush1.bf16.msra.mxu0 %v8427_v63  ;;  %4257 = vmatpush1.bf16.msra.mxu1 %v8430_v1  ;;  %v8493_v63 = vld [vmem:[#allocation13 + $0x240] ss:$24 sps:$4 sm:$0xff]  }
 0x3e6   : > { %3745 = vmatprep.subr.bf16.mxu0 %v8435_v3  ;;  %4258 = vmatprep.subr.bf16.mxu1 %v8438_v4  ;;  %v8496_v1 = vld [vmem:[#allocation13 + $0x8] ss:$24 sps:$4 sm:$0xff]   ;;  %v911_v3 = vmul.f32 %v906_v61, %v901_v59  ;;  %v916_v4 = vrot.slane %v9776_v57, %v9833_v26  ;;  %v8513_v57 = vld [vmem:[#allocation13 + $0x2d4] ss:$24 sps:$4 sm:$0xff]  }
 0x3e7   : > { %v8567_v59 = vld [vmem:[#allocation13 + $0x24c] ss:$24 sps:$4 sm:$0xff]  }
 0x3e8   : > { %v8570_v61 = vld [vmem:[#allocation13 + $0x194] ss:$24 sps:$4 sm:$0xff]  }
 0x3e9   : > { %3746 = vmatpush1.bf16.msra.mxu0 %v8433_v6  ;;  %4259 = vmatpush1.bf16.msra.mxu1 %v8436_v7  ;;  %v8504_v6 = vld [vmem:[#allocation13 + $0x3c] ss:$24 sps:$4 sm:$0xff]   ;;  %v8502_v7 = vld [vmem:[#allocation13 + $0x38] ss:$24 sps:$4 sm:$0xff]  }
 0x3ea   : > { %3747 = vmatprep.subr.bf16.mxu0 %v8441_v28  ;;  %4260 = vmatprep.subr.bf16.mxu1 %v8444_v9  ;;  %v8510_v28 = vld [vmem:[#allocation13 + $0x6c] ss:$24 sps:$4 sm:$0xff]   ;;  %v921_v9 = vadd.f32 %v916_v4, %v911_v3  ;;  %v8571_v4 = vld [vmem:[#allocation13 + $0x278] ss:$24 sps:$4 sm:$0xff]  }
 0x3eb   : > { %v8576_v3 = vld [vmem:[#allocation13 + $0x1c4] ss:$24 sps:$4 sm:$0xff]  }
 0x3ec   : > { %vm923_vm14 = vcmp.gt.f32.partialorder %v921_v9, 0.0 }
 0x3ed   : > { %3748 = vmatpush1.bf16.msra.mxu0 %v8439_v10  ;;  %4261 = vmatpush1.bf16.msra.mxu1 %v8442_v11  ;;  %v8505_v10 = vld [vmem:[#allocation13 + $0x2a0] ss:$24 sps:$4 sm:$0xff]  }
 0x3ee   : > { %3749 = vmatprep.subr.bf16.mxu0 %v8447_v13  ;;  %4262 = vmatprep.subr.bf16.mxu1 %v8450_v40  ;;  %v8508_v11 = vld [vmem:[#allocation13 + $0x68] ss:$24 sps:$4 sm:$0xff]   ;;  %v8514_v40 = vld [vmem:[#allocation13 + $0x98] ss:$24 sps:$4 sm:$0xff]  }
 0x3ef   : > { %v8511_v13 = vld [vmem:[#allocation13 + $0x2d0] ss:$24 sps:$4 sm:$0xff]  }
 0x3f1   : > { %3750 = vmatpush1.bf16.msra.mxu0 %v8445_v14  ;;  %4263 = vmatpush1.bf16.msra.mxu1 %v8448_v16  ;;  %v8519_v14 = vld [vmem:[#allocation13 + $0xcc] ss:$24 sps:$4 sm:$0xff]  }
 0x3f2   : > { %3751 = vmatprep.subr.bf16.mxu0 %v8453_v20  ;;  %4264 = vmatprep.subr.bf16.mxu1 %v8456_v21  ;;  %v8522_v16 = vld [vmem:[#allocation13 + $0x14] ss:$24 sps:$4 sm:$0xff]   ;;  %v8517_v20 = vld [vmem:[#allocation13 + $0xc8] ss:$24 sps:$4 sm:$0xff]  }
 0x3f3   : > { %v8520_v21 = vld [vmem:[#allocation13 + $0x10] ss:$24 sps:$4 sm:$0xff]  }
 0x3f5   : > { %3752 = vmatpush1.bf16.msra.mxu0 %v8451_v22  ;;  %4265 = vmatpush1.bf16.msra.mxu1 %v8454_v23  ;;  %v8525_v23 = vld [vmem:[#allocation13 + $0xfc] ss:$24 sps:$4 sm:$0xff]  }
 0x3f6   : > { %3753 = vmatprep.subr.bf16.mxu0 %v8459_v27  ;;  %4266 = vmatprep.subr.bf16.mxu1 %v8462_v29  ;;  %v8523_v27 = vld [vmem:[#allocation13 + $0xf8] ss:$24 sps:$4 sm:$0xff]  }
 0x3f7   : > { %v8526_v29 = vld [vmem:[#allocation13 + $0x40] ss:$24 sps:$4 sm:$0xff]  }
 0x3f9   : > { %3754 = vmatpush1.bf16.msra.mxu0 %v8457_v30  ;;  %4267 = vmatpush1.bf16.msra.mxu1 %v8460_v31  ;;  %v8531_v30 = vld [vmem:[#allocation13 + $0x12c] ss:$24 sps:$4 sm:$0xff]  }
 0x3fa   : > { %3755 = vmatprep.subr.bf16.mxu0 %v8465_v25  ;;  %4268 = vmatprep.subr.bf16.mxu1 %v8468_v33  ;;  %v8534_v31 = vld [vmem:[#allocation13 + $0x74] ss:$24 sps:$4 sm:$0xff]   ;;  %v8532_v25 = vld [vmem:[#allocation13 + $0x70] ss:$24 sps:$4 sm:$0xff]  }
 0x3fb   : > { %v8537_v33 = vld [vmem:[#allocation13 + $0x15c] ss:$24 sps:$4 sm:$0xff]  }
 0x3fd   : > { %3756 = vmatpush1.bf16.msra.mxu0 %v8463_v34  ;;  %4269 = vmatpush1.bf16.msra.mxu1 %v8466_v35  ;;  %v8540_v34 = vld [vmem:[#allocation13 + $0xa4] ss:$24 sps:$4 sm:$0xff]   ;;  %v8535_v35 = vld [vmem:[#allocation13 + $0x158] ss:$24 sps:$4 sm:$0xff]  }
 0x3fe   : > { %3757 = vmatprep.subr.bf16.mxu0 %v8471_v5  ;;  %4270 = vmatprep.subr.bf16.mxu1 %v8474_v42  ;;  %v8543_v5 = vld [vmem:[#allocation13 + $0x18c] ss:$24 sps:$4 sm:$0xff]   ;;  %v8541_v42 = vld [vmem:[#allocation13 + $0x188] ss:$24 sps:$4 sm:$0xff]  }
 0x401   : > { %3758 = vmatpush1.bf16.msra.mxu0 %v8469_v55  ;;  %4271 = vmatpush1.bf16.msra.mxu1 %v8472_v44  ;;  %v8544_v55 = vld [vmem:[#allocation13 + $0xd0] ss:$24 sps:$4 sm:$0xff]   ;;  %v8549_v44 = vld [vmem:[#allocation13 + $0x1bc] ss:$24 sps:$4 sm:$0xff]  }
 0x402   : > { %3759 = vmatprep.subr.bf16.mxu0 %v8477_v45  ;;  %4272 = vmatprep.subr.bf16.mxu1 %v8480_v38  ;;  %v8552_v45 = vld [vmem:[#allocation13 + $0x104] ss:$24 sps:$4 sm:$0xff]   ;;  %v8547_v38 = vld [vmem:[#allocation13 + $0x1b8] ss:$24 sps:$4 sm:$0xff]  }
 0x405   : > { %3760 = vmatpush1.bf16.msra.mxu0 %v8475_v37  ;;  %4273 = vmatpush1.bf16.msra.mxu1 %v8478_v46  ;;  %v8550_v37 = vld [vmem:[#allocation13 + $0x100] ss:$24 sps:$4 sm:$0xff]   ;;  %v8555_v46 = vld [vmem:[#allocation13 + $0x1ec] ss:$24 sps:$4 sm:$0xff]  }
 0x406   : > { %3761 = vmatprep.subr.bf16.mxu0 %v8483_v47  ;;  %4274 = vmatprep.subr.bf16.mxu1 %v8486_v60  ;;  %v8558_v47 = vld [vmem:[#allocation13 + $0x134] ss:$24 sps:$4 sm:$0xff]  }
 0x409   : > { %3762 = vmatpush1.bf16.msra.mxu0 %v8481_v48  ;;  %4275 = vmatpush1.bf16.msra.mxu1 %v8484_v39 }
 0x40a   : > { %3763 = vmatprep.subr.bf16.mxu0 %v8489_v49  ;;  %4276 = vmatprep.subr.bf16.mxu1 %v8492_v50  ;;  %v8553_v49 = vld [vmem:[#allocation13 + $0x1e8] ss:$24 sps:$4 sm:$0xff]  }
 0x40b   : > { %v8556_v50 = vld [vmem:[#allocation13 + $0x130] ss:$24 sps:$4 sm:$0xff]  }
 0x40d   : > { %3764 = vmatpush1.bf16.msra.mxu0 %v8487_v36  ;;  %4277 = vmatpush1.bf16.msra.mxu1 %v8490_v53  ;;  %v8561_v36 = vld [vmem:[#allocation13 + $0x21c] ss:$24 sps:$4 sm:$0xff]  }
 0x40e   : > { %4278 = vmatprep.subr.bf16.mxu1 %v8495_v54  ;;  %4295 = vmatprep.subr.bf16.mxu0 %v8498_v58  ;;  %v8564_v53 = vld [vmem:[#allocation13 + $0x164] ss:$24 sps:$4 sm:$0xff]   ;;  %v8559_v54 = vld [vmem:[#allocation13 + $0x218] ss:$24 sps:$4 sm:$0xff]  }
 0x40f   : > { %v8562_v58 = vld [vmem:[#allocation13 + $0x160] ss:$24 sps:$4 sm:$0xff]  }
 0x410   : > { %3766 = vmatmul.mubr.bf16.vlgmr.msra.gmra.mrb[28].mxu0 %v9813_v51  ;;  %v925_v51 = vmul.f32 0.2, %v921_v9 }
 0x411   : > { %4279 = vmatpush1.bf16.msra.mxu1 %v8493_v63  ;;  %4296 = vmatpush1.bf16.msra.mxu0 %v8496_v1  ;;  %v8565_v63 = vld [vmem:[#allocation13 + $0x248] ss:$24 sps:$4 sm:$0xff]  }
 0x412   : > { %4327 = vmatprep.mubr.bf16.mxu0 %v9848_v62  ;;  %4280 = vmatprep.subr.bf16.mxu1 %v8501_v2  ;;  %v927_v19 = vsel %vm923_vm14, %v921_v9, %v925_v51  ;;  %v8568_v1 = vld [vmem:[#allocation13 + $0x190] ss:$24 sps:$4 sm:$0xff]   ;;  %v8573_v2 = vld [vmem:[#allocation13 + $0x27c] ss:$24 sps:$4 sm:$0xff]  }
 0x413   : > { %4297 = vmatprep.subr.bf16.mxu0 %v8504_v6  ;;  %v9858_v22 = vpack.c.bf16 %v927_v19, %v927_v19  ;;  %v8574_v6 = vld [vmem:[#allocation13 + $0x1c0] ss:$24 sps:$4 sm:$0xff]   ;;  %v8585_v9 = vld [vmem:[#allocation13 + $0x2dc] ss:$24 sps:$4 sm:$0xff]  }
 0x414   : > { %v8594_v51 = vld [vmem:[#allocation13 + $0x904] ss:$24 sps:$4 sm:$0xff]   ;;  %v8595_v19 = vld [vmem:[#allocation13 + $0x280] ss:$24 sps:$4 sm:$0xff]  }
 0x415   : > { %4281 = vmatpush1.bf16.msra.mxu1 %v8499_v56  ;;  %4298 = vmatpush1.bf16.msra.mxu0 %v8502_v7  ;;  %v8579_v56 = vld [vmem:[#allocation13 + $0x2ac] ss:$24 sps:$4 sm:$0xff]  }
 0x416   : > { %4282 = vmatprep.subr.bf16.mxu1 %v8507_v8  ;;  %4299 = vmatprep.subr.bf16.mxu0 %v8510_v28  ;;  %v8582_v7 = vld [vmem:[#allocation13 + $0x1f4] ss:$24 sps:$4 sm:$0xff]   ;;  %v8577_v8 = vld [vmem:[#allocation13 + $0x2a8] ss:$24 sps:$4 sm:$0xff]  }
 0x417   : > { %v8580_v28 = vld [vmem:[#allocation13 + $0x1f0] ss:$24 sps:$4 sm:$0xff]  }
 0x419   : > { %4283 = vmatpush1.bf16.msra.mxu1 %v8505_v10  ;;  %4300 = vmatpush1.bf16.msra.mxu0 %v8508_v11  ;;  %v8588_v10 = vld [vmem:[#allocation13 + $0x224] ss:$24 sps:$4 sm:$0xff]   ;;  %v8583_v11 = vld [vmem:[#allocation13 + $0x2d8] ss:$24 sps:$4 sm:$0xff]  }
 0x41a   : > { %4284 = vmatprep.subr.bf16.mxu1 %v8513_v57  ;;  %4301 = vmatprep.subr.bf16.mxu0 %v8516_v12  ;;  %v8586_v57 = vld [vmem:[#allocation13 + $0x220] ss:$24 sps:$4 sm:$0xff]   ;;  %v8591_v12 = vld [vmem:[#allocation13 + $0x254] ss:$24 sps:$4 sm:$0xff]  }
 0x41d   : > { %4285 = vmatpush1.bf16.msra.mxu1 %v8511_v13  ;;  %4302 = vmatpush1.bf16.msra.mxu0 %v8514_v40  ;;  %v8589_v13 = vld [vmem:[#allocation13 + $0x250] ss:$24 sps:$4 sm:$0xff]   ;;  %v8592_v40 = vld [vmem:[#allocation13 + $0x900] ss:$24 sps:$4 sm:$0xff]  }
 0x41e   : > { %4303 = vmatprep.subr.bf16.mxu0 %v8519_v14  ;;  %4336 = vmatprep.subr.bf16.mxu1 %v8522_v16  ;;  %v8597_v14 = vld [vmem:[#allocation13 + $0x284] ss:$24 sps:$4 sm:$0xff]   ;;  %v8600_v16 = vld [vmem:[#allocation13 + $0x934] ss:$24 sps:$4 sm:$0xff]  }
 0x420   : > { %4287 = vmatmul.mubr.bf16.vlgmr.msra.gmra.mrb[20].mxu1 %v9858_v22 }
 0x421   : > { %4304 = vmatpush1.bf16.msra.mxu0 %v8517_v20  ;;  %4337 = vmatpush1.bf16.msra.mxu1 %v8520_v21  ;;  %v8598_v20 = vld [vmem:[#allocation13 + $0x930] ss:$24 sps:$4 sm:$0xff]   ;;  %v8603_v21 = vld [vmem:[#allocation13 + $0x2b4] ss:$24 sps:$4 sm:$0xff]  }
 0x422   : > { %4368 = vmatprep.mubr.bf16.mxu1 %v9848_v62  ;;  %4305 = vmatprep.subr.bf16.mxu0 %v8525_v23  ;;  %v8546_v62 = vld [vmem:[#allocation13 + $0xd4] ss:$24 sps:$4 sm:$0xff]   ;;  %v8606_v23 = vld [vmem:[#allocation13 + $0x964] ss:$24 sps:$4 sm:$0xff]  }
 0x423   : > { %4338 = vmatprep.subr.bf16.mxu1 %v8528_v24  ;;  %v8601_v24 = vld [vmem:[#allocation13 + $0x2b0] ss:$24 sps:$4 sm:$0xff]  }
 0x425   : > { %4306 = vmatpush1.bf16.msra.mxu0 %v8523_v27  ;;  %4339 = vmatpush1.bf16.msra.mxu1 %v8526_v29  ;;  %v8604_v27 = vld [vmem:[#allocation13 + $0x960] ss:$24 sps:$4 sm:$0xff]   ;;  %v8609_v29 = vld [vmem:[#allocation13 + $0x2e4] ss:$24 sps:$4 sm:$0xff]  }
 0x426   : > { %4307 = vmatprep.subr.bf16.mxu0 %v8531_v30  ;;  %4340 = vmatprep.subr.bf16.mxu1 %v8534_v31  ;;  %v8612_v30 = vld [vmem:[#allocation13 + $0x994] ss:$24 sps:$4 sm:$0xff]   ;;  %v8607_v31 = vld [vmem:[#allocation13 + $0x2e0] ss:$24 sps:$4 sm:$0xff]  }
 0x429   : > { %4308 = vmatpush1.bf16.msra.mxu0 %v8529_v32  ;;  %4341 = vmatpush1.bf16.msra.mxu1 %v8532_v25  ;;  %v8610_v32 = vld [vmem:[#allocation13 + $0x990] ss:$24 sps:$4 sm:$0xff]   ;;  %v8615_v25 = vld [vmem:[#allocation13 + $0x9c4] ss:$24 sps:$4 sm:$0xff]  }
 0x42a   : > { %4309 = vmatprep.subr.bf16.mxu0 %v8537_v33  ;;  %4342 = vmatprep.subr.bf16.mxu1 %v8540_v34  ;;  %v8618_v33 = vld [vmem:[#allocation13 + $0x914] ss:$24 sps:$4 sm:$0xff]   ;;  %v2213_v34 = vsub.s32 6, %v9735_v41 }
 0x42d   : > { %4310 = vmatpush1.bf16.msra.mxu0 %v8535_v35  ;;  %4343 = vmatpush1.bf16.msra.mxu1 %v8538_v18  ;;  %v8613_v35 = vld [vmem:[#allocation13 + $0x9c0] ss:$24 sps:$4 sm:$0xff]   ;;  %v8616_v18 = vld [vmem:[#allocation13 + $0x910] ss:$24 sps:$4 sm:$0xff]  }
 0x42e   : > { %4311 = vmatprep.subr.bf16.mxu0 %v8543_v5  ;;  %4344 = vmatprep.subr.bf16.mxu1 %v8546_v62  ;;  %v8621_v5 = vld [vmem:[#allocation13 + $0x9f4] ss:$24 sps:$4 sm:$0xff]   ;;  %v8624_v62 = vld [vmem:[#allocation13 + $0x944] ss:$24 sps:$4 sm:$0xff]  }
 0x431   : > { %4312 = vmatpush1.bf16.msra.mxu0 %v8541_v42  ;;  %4345 = vmatpush1.bf16.msra.mxu1 %v8544_v55  ;;  %v9869_v42 = vld [vmem:[#allocation14] sm:$0xff] }
 0x432   : > { %4313 = vmatprep.subr.bf16.mxu0 %v8549_v44  ;;  %4346 = vmatprep.subr.bf16.mxu1 %v8552_v45  ;;  %v2214_v55 = vrot.slane %v9869_v42, %v2213_v34  ;;  %v8619_v44 = vld [vmem:[#allocation13 + $0x9f0] ss:$24 sps:$4 sm:$0xff]   ;;  %v8622_v45 = vld [vmem:[#allocation13 + $0x940] ss:$24 sps:$4 sm:$0xff]   ;;  %v8696_v34 = vld [vmem:[#allocation10 + $0x4ec] ss:$16 sps:$4 sm:$0xff]  }
 0x433   : > { %v9862_v60 = vpop.f32.mrb[8].mxu1 }
 0x434   : > { %v9864_v48 = vpop.f32.mrb[9].mxu1 }
 0x435   : > { %4314 = vmatpush1.bf16.msra.mxu0 %v8547_v38  ;;  %4347 = vmatpush1.bf16.msra.mxu1 %v8550_v37  ;;  %v3566_v39 = vpop.f32.mrb[10].mxu1  ;;  %v8627_v38 = vld [vmem:[#allocation13 + $0xa24] ss:$24 sps:$4 sm:$0xff]   ;;  %v8630_v37 = vld [vmem:[#allocation13 + $0x974] ss:$24 sps:$4 sm:$0xff]  }
 0x436   : > { %v3567_v52 = vpop.f32.mrb[11].mxu1  ;;  %4315 = vmatprep.subr.bf16.mxu0 %v8555_v46  ;;  %4348 = vmatprep.subr.bf16.mxu1 %v8558_v47  ;;  %v2266_v46 = vadd.f32 %v9824_v15, %v2214_v55  ;;  %v8636_v15 = vld [vmem:[#allocation13 + $0x9a4] ss:$24 sps:$4 sm:$0xff]   ;;  %v8673_v55 = vld [vmem:[#allocation10 + $0x480] ss:$16 sps:$4 sm:$0xff]  }
 0x437   : > { %v8625_v52 = vld [vmem:[#allocation13 + $0xa20] ss:$24 sps:$4 sm:$0xff]  }
 0x438   : > { %vm2271_vm15 = vcmp.gt.f32.partialorder %v2266_v46, 0.0 }
 0x439   : > { %4316 = vmatpush1.bf16.msra.mxu0 %v8553_v49  ;;  %4349 = vmatpush1.bf16.msra.mxu1 %v8556_v50 }
 0x43a   : > { %4317 = vmatprep.subr.bf16.mxu0 %v8561_v36  ;;  %4350 = vmatprep.subr.bf16.mxu1 %v8564_v53  ;;  %v8628_v36 = vld [vmem:[#allocation13 + $0x970] ss:$24 sps:$4 sm:$0xff]  }
 0x43d   : > { %4318 = vmatpush1.bf16.msra.mxu0 %v8559_v54  ;;  %4351 = vmatpush1.bf16.msra.mxu1 %v8562_v58  ;;  %v8633_v54 = vld [vmem:[#allocation13 + $0xa54] ss:$24 sps:$4 sm:$0xff]   ;;  %v2272_v58 = vmul.f32 0.2, %v2266_v46 }
 0x43e   : > { %4319 = vmatprep.subr.bf16.mxu0 %v8567_v59  ;;  %4352 = vmatprep.subr.bf16.mxu1 %v8570_v61  ;;  %v8634_v59 = vld [vmem:[#allocation13 + $0x9a0] ss:$24 sps:$4 sm:$0xff]   ;;  %v8642_v61 = vld [vmem:[#allocation13 + $0x9d4] ss:$24 sps:$4 sm:$0xff]  }
 0x441   : > { %4320 = vmatpush1.bf16.msra.mxu0 %v8565_v63  ;;  %4353 = vmatpush1.bf16.msra.mxu1 %v8568_v1  ;;  %v2273_v63 = vsel %vm2271_vm15, %v2266_v46, %v2272_v58  ;;  %v8637_v1 = vld [vmem:[#allocation13 + $0x908] ss:$24 sps:$4 sm:$0xff]  }
 0x442   : > { %4321 = vmatprep.subr.bf16.mxu0 %v8573_v2  ;;  %4354 = vmatprep.subr.bf16.mxu1 %v8576_v3  ;;  %v8640_v2 = vld [vmem:[#allocation13 + $0x9d0] ss:$24 sps:$4 sm:$0xff]   ;;  %v9881_v3 = vpack.c.bf16 %v2273_v63, %v2273_v63  ;;  %v8711_v63 = vld [vmem:[#allocation10 + $0x544] ss:$16 sps:$4 sm:$0xff]  }
 0x443   : > { %v8706_v46 = vld [vmem:[#allocation10 + $0x528] ss:$16 sps:$4 sm:$0xff]  }
 0x445   : > { %4322 = vmatpush1.bf16.msra.mxu0 %v8571_v4  ;;  %4355 = vmatpush1.bf16.msra.mxu1 %v8574_v6  ;;  %v8645_v4 = vld [vmem:[#allocation13 + $0x93c] ss:$24 sps:$4 sm:$0xff]  }
 0x446   : > { %4323 = vmatprep.subr.bf16.mxu0 %v8579_v56  ;;  %4356 = vmatprep.subr.bf16.mxu1 %v8582_v7  ;;  %v8648_v6 = vld [vmem:[#allocation13 + $0xa04] ss:$24 sps:$4 sm:$0xff]   ;;  %v8643_v56 = vld [vmem:[#allocation13 + $0x938] ss:$24 sps:$4 sm:$0xff]  }
 0x447   : > { %v8646_v7 = vld [vmem:[#allocation13 + $0xa00] ss:$24 sps:$4 sm:$0xff]  }
 0x449   : > { %4324 = vmatpush1.bf16.msra.mxu0 %v8577_v8  ;;  %4357 = vmatpush1.bf16.msra.mxu1 %v8580_v28  ;;  %v8651_v8 = vld [vmem:[#allocation13 + $0x96c] ss:$24 sps:$4 sm:$0xff]  }
 0x44a   : > { %4325 = vmatprep.subr.bf16.mxu0 %v8585_v9  ;;  %4358 = vmatprep.subr.bf16.mxu1 %v8588_v10  ;;  %v8654_v28 = vld [vmem:[#allocation13 + $0xa34] ss:$24 sps:$4 sm:$0xff]  }
 0x44d   : > { %4326 = vmatpush1.bf16.msra.mxu0 %v8583_v11  ;;  %4359 = vmatpush1.bf16.msra.mxu1 %v8586_v57  ;;  %v8649_v57 = vld [vmem:[#allocation13 + $0x968] ss:$24 sps:$4 sm:$0xff]  }
 0x44e   : > { %4360 = vmatprep.subr.bf16.mxu1 %v8591_v12  ;;  %4666 = vmatprep.subr.bf16.mxu0 %v8594_v51  ;;  %v8652_v12 = vld [vmem:[#allocation13 + $0xa30] ss:$24 sps:$4 sm:$0xff]  }
 0x450   : > { %4328 = vmatmul.mubr.bf16.vlgmr.msra.gmra.mrb[32].mxu0 %v9858_v22 }
 0x451   : > { %4361 = vmatpush1.bf16.msra.mxu1 %v8589_v13  ;;  %4667 = vmatpush1.bf16.msra.mxu0 %v8592_v40  ;;  %v8657_v13 = vld [vmem:[#allocation13 + $0x99c] ss:$24 sps:$4 sm:$0xff]  }
 0x452   : > { %4362 = vmatprep.subr.bf16.mxu1 %v8597_v14  ;;  %4668 = vmatprep.subr.bf16.mxu0 %v8600_v16  ;;  %v8660_v40 = vld [vmem:[#allocation13 + $0xa64] ss:$24 sps:$4 sm:$0xff]   ;;  %v8655_v14 = vld [vmem:[#allocation13 + $0x998] ss:$24 sps:$4 sm:$0xff]  }
 0x453   : > { %4698 = vmatprep.mubr.bf16.mxu0 %v9353_v0  ;;  %v8658_v16 = vld [vmem:[#allocation13 + $0xa60] ss:$24 sps:$4 sm:$0xff]  }
 0x455   : > { %4363 = vmatpush1.bf16.msra.mxu1 %v8595_v19  ;;  %4669 = vmatpush1.bf16.msra.mxu0 %v8598_v20  ;;  %v8663_v19 = vld [vmem:[#allocation13 + $0x9cc] ss:$24 sps:$4 sm:$0xff]   ;;  %v8661_v20 = vld [vmem:[#allocation13 + $0x9c8] ss:$24 sps:$4 sm:$0xff]  }
 0x456   : > { %4364 = vmatprep.subr.bf16.mxu1 %v8603_v21  ;;  %4670 = vmatprep.subr.bf16.mxu0 %v8606_v23  ;;  %v8676_v21 = vld [vmem:[#allocation10 + $0x488] ss:$16 sps:$4 sm:$0xff]   ;;  %v8666_v23 = vld [vmem:[#allocation13 + $0x9fc] ss:$24 sps:$4 sm:$0xff]  }
 0x459   : > { %4365 = vmatpush1.bf16.msra.mxu1 %v8601_v24  ;;  %4671 = vmatpush1.bf16.msra.mxu0 %v8604_v27  ;;  %v8684_v24 = vld [vmem:[#allocation10 + $0x4ac] ss:$16 sps:$4 sm:$0xff]   ;;  %v8664_v27 = vld [vmem:[#allocation13 + $0x9f8] ss:$24 sps:$4 sm:$0xff]  }
 0x45a   : > { %4366 = vmatprep.subr.bf16.mxu1 %v8609_v29  ;;  %4672 = vmatprep.subr.bf16.mxu0 %v8612_v30  ;;  %v8682_v29 = vld [vmem:[#allocation10 + $0x4a8] ss:$16 sps:$4 sm:$0xff]   ;;  %v8669_v30 = vld [vmem:[#allocation13 + $0xa2c] ss:$24 sps:$4 sm:$0xff]  }
 0x45d   : > { %4367 = vmatpush1.bf16.msra.mxu1 %v8607_v31  ;;  %4673 = vmatpush1.bf16.msra.mxu0 %v8610_v32  ;;  %v8690_v31 = vld [vmem:[#allocation10 + $0x4cc] ss:$16 sps:$4 sm:$0xff]   ;;  %v8667_v32 = vld [vmem:[#allocation13 + $0xa28] ss:$24 sps:$4 sm:$0xff]  }
 0x45e   : > { %4674 = vmatprep.subr.bf16.mxu0 %v8615_v25  ;;  %4748 = vmatprep.subr.bf16.mxu1 %v8618_v33  ;;  %v8688_v25 = vld [vmem:[#allocation10 + $0x4c8] ss:$16 sps:$4 sm:$0xff]   ;;  %v8672_v33 = vld [vmem:[#allocation13 + $0xa5c] ss:$24 sps:$4 sm:$0xff]  }
 0x460   : > { %4369 = vmatmul.mubr.bf16.vlgmr.msra.gmra.mrb[24].mxu1 %v9858_v22 }
 0x461   : > { %4675 = vmatpush1.bf16.msra.mxu0 %v8613_v35  ;;  %4749 = vmatpush1.bf16.msra.mxu1 %v8616_v18  ;;  %v8670_v35 = vld [vmem:[#allocation13 + $0xa58] ss:$24 sps:$4 sm:$0xff]  }
 0x462   : > { %4676 = vmatprep.subr.bf16.mxu0 %v8621_v5  ;;  %4750 = vmatprep.subr.bf16.mxu1 %v8624_v62  ;;  %v8694_v18 = vld [vmem:[#allocation10 + $0x4e8] ss:$16 sps:$4 sm:$0xff]   ;;  %v8675_v5 = vld [vmem:[#allocation10 + $0x484] ss:$16 sps:$4 sm:$0xff]   ;;  %v8702_v62 = vld [vmem:[#allocation10 + $0x50c] ss:$16 sps:$4 sm:$0xff]  }
 0x463   : > { %v3603_v47 = vpop.f32.mrb[20].mxu0  ;;  %4780 = vmatprep.mubr.bf16.mxu1 %v9353_v0 }
 0x464   : > { %v9876_v39 = vadd.f32 %v3603_v47, %v9862_v60  ;;  %v3605_v49 = vpop.f32.mrb[21].mxu0  ;;  %v8631_v60 = vld [vmem:[#allocation13 + $0xa50] ss:$24 sps:$4 sm:$0xff]   ;;  %v8687_v47 = vld [vmem:[#allocation10 + $0x4c4] ss:$16 sps:$4 sm:$0xff]  }
 0x465   : > { %v9879_v50 = vadd.f32 %v3605_v49, %v9864_v48  ;;  %4677 = vmatpush1.bf16.msra.mxu0 %v8619_v44  ;;  %4751 = vmatpush1.bf16.msra.mxu1 %v8622_v45  ;;  %v3607_v22 = vpop.f32.mrb[22].mxu0  ;;  %v8639_v48 = vld [vmem:[#allocation13 + $0x90c] ss:$24 sps:$4 sm:$0xff]   ;;  %v8700_v44 = vld [vmem:[#allocation10 + $0x508] ss:$16 sps:$4 sm:$0xff]  }
 0x466   : > { %v3608_v53 = vpop.f32.mrb[23].mxu0  ;;  %4678 = vmatprep.subr.bf16.mxu0 %v8627_v38  ;;  %4752 = vmatprep.subr.bf16.mxu1 %v8630_v37  ;;  %v8681_v45 = vld [vmem:[#allocation10 + $0x4a4] ss:$16 sps:$4 sm:$0xff]   ;;  %v8708_v38 = vld [vmem:[#allocation10 + $0x52c] ss:$16 sps:$4 sm:$0xff]  }
 0x467   : > { %v8679_v37 = vld [vmem:[#allocation10 + $0x4a0] ss:$16 sps:$4 sm:$0xff]   ;;  %v8693_v22 = vld [vmem:[#allocation10 + $0x4e4] ss:$16 sps:$4 sm:$0xff]  }
 0x468   : > { %v8685_v49 = vld [vmem:[#allocation10 + $0x4c0] ss:$16 sps:$4 sm:$0xff]  }
 0x469   : > { %4679 = vmatpush1.bf16.msra.mxu0 %v8625_v52  ;;  %4753 = vmatpush1.bf16.msra.mxu1 %v8628_v36  ;;  %v8691_v52 = vld [vmem:[#allocation10 + $0x4e0] ss:$16 sps:$4 sm:$0xff]   ;;  %v8699_v36 = vld [vmem:[#allocation10 + $0x504] ss:$16 sps:$4 sm:$0xff]  }
 0x46a   : > { %4680 = vmatprep.subr.bf16.mxu0 %v8633_v54  ;;  %4754 = vmatprep.subr.bf16.mxu1 %v8636_v15  ;;  %v8697_v53 = vld [vmem:[#allocation10 + $0x500] ss:$16 sps:$4 sm:$0xff]   ;;  %v8705_v54 = vld [vmem:[#allocation10 + $0x524] ss:$16 sps:$4 sm:$0xff]  }
 0x46b   : > { %v8703_v15 = vld [vmem:[#allocation10 + $0x520] ss:$16 sps:$4 sm:$0xff]  }
 0x46d   : > { %4681 = vmatpush1.bf16.msra.mxu0 %v8631_v60  ;;  %4755 = vmatpush1.bf16.msra.mxu1 %v8634_v59 }
 0x46e   : > { %4707 = vmatprep.subr.bf16.mxu0 %v8639_v48  ;;  %4756 = vmatprep.subr.bf16.mxu1 %v8642_v61 }
 0x470   : > { %4699 = vmatmul.mubr.bf16.vlgmr.msra.gmra.mrb[36].mxu0 %v9881_v3 }
 0x471   : > { %4708 = vmatpush1.bf16.msra.mxu0 %v8637_v1  ;;  %4757 = vmatpush1.bf16.msra.mxu1 %v8640_v2  ;;  %v8714_v1 = vld [vmem:[#allocation10 + $0x54c] ss:$16 sps:$4 sm:$0xff]  }
 0x472   : > { %4709 = vmatprep.subr.bf16.mxu0 %v8645_v4  ;;  %4758 = vmatprep.subr.bf16.mxu1 %v8648_v6  ;;  %v8712_v4 = vld [vmem:[#allocation10 + $0x548] ss:$16 sps:$4 sm:$0xff]   ;;  %v8717_v6 = vld [vmem:[#allocation10 + $0x564] ss:$16 sps:$4 sm:$0xff]  }
 0x473   : > { %v9884_v9 = vpop.f32.mrb[12].mxu1  ;;  %4739 = vmatprep.mubr.bf16.mxu0 %v9353_v0  ;;  %v8678_v0 = vld [vmem:[#allocation10 + $0x48c] ss:$16 sps:$4 sm:$0xff]  }
 0x474   : > { %v9887_v10 = vpop.f32.mrb[13].mxu1 }
 0x475   : > { %v3648_v11 = vpop.f32.mrb[14].mxu1  ;;  %4710 = vmatpush1.bf16.msra.mxu0 %v8643_v56  ;;  %4759 = vmatpush1.bf16.msra.mxu1 %v8646_v7  ;;  %v8718_v56 = vld [vmem:[#allocation10 + $0x568] ss:$16 sps:$4 sm:$0xff]   ;;  %v8720_v7 = vld [vmem:[#allocation10 + $0x56c] ss:$16 sps:$4 sm:$0xff]  }
 0x476   : > { %v3649_v51 = vpop.f32.mrb[15].mxu1  ;;  %4711 = vmatprep.subr.bf16.mxu0 %v8651_v8  ;;  %4760 = vmatprep.subr.bf16.mxu1 %v8654_v28  ;;  %v8715_v8 = vld [vmem:[#allocation10 + $0x560] ss:$16 sps:$4 sm:$0xff]   ;;  %v8726_v28 = vld [vmem:[#allocation10 + $0x58c] ss:$16 sps:$4 sm:$0xff]  }
 0x477   : > { %v8721_v11 = vld [vmem:[#allocation10 + $0x580] ss:$16 sps:$4 sm:$0xff]   ;;  %v8730_v51 = vld [vmem:[#allocation10 + $0x5a8] ss:$16 sps:$4 sm:$0xff]  }
 0x479   : > { %4712 = vmatpush1.bf16.msra.mxu0 %v8649_v57  ;;  %4761 = vmatpush1.bf16.msra.mxu1 %v8652_v12  ;;  %v8732_v57 = vld [vmem:[#allocation10 + $0x5ac] ss:$16 sps:$4 sm:$0xff]   ;;  %v8729_v12 = vld [vmem:[#allocation10 + $0x5a4] ss:$16 sps:$4 sm:$0xff]  }
 0x47a   : > { %4713 = vmatprep.subr.bf16.mxu0 %v8657_v13  ;;  %4762 = vmatprep.subr.bf16.mxu1 %v8660_v40  ;;  %v8727_v13 = vld [vmem:[#allocation10 + $0x5a0] ss:$16 sps:$4 sm:$0xff]  }
 0x47d   : > { %4714 = vmatpush1.bf16.msra.mxu0 %v8655_v14  ;;  %4763 = vmatpush1.bf16.msra.mxu1 %v8658_v16 }
 0x47e   : > { %4715 = vmatprep.subr.bf16.mxu0 %v8663_v19  ;;  %6124 = vmatprep.subr.bf16.mxu1 %v8678_v0  ;;  %v8735_v19 = vld [vmem:[#allocation10 + $0x5c4] ss:$16 sps:$4 sm:$0xff]   ;;  %v8738_v0 = vld [vmem:[#allocation10 + $0x5cc] ss:$16 sps:$4 sm:$0xff]  }
 0x480   : > { %4781 = vmatmul.mubr.bf16.vlgmr.msra.gmra.mrb[28].mxu1 %v9881_v3 }
 0x481   : > { %4716 = vmatpush1.bf16.msra.mxu0 %v8661_v20  ;;  %6125 = vmatpush1.bf16.msra.mxu1 %v8676_v21  ;;  %v8733_v21 = vld [vmem:[#allocation10 + $0x5c0] ss:$16 sps:$4 sm:$0xff]  }
 0x482   : > { %4717 = vmatprep.subr.bf16.mxu0 %v8666_v23  ;;  %6126 = vmatprep.subr.bf16.mxu1 %v8684_v24  ;;  %v8736_v23 = vld [vmem:[#allocation10 + $0x5c8] ss:$16 sps:$4 sm:$0xff]   ;;  %v8741_v24 = vld [vmem:[#allocation10 + $0x5e4] ss:$16 sps:$4 sm:$0xff]  }
 0x485   : > { %4718 = vmatpush1.bf16.msra.mxu0 %v8664_v27  ;;  %6127 = vmatpush1.bf16.msra.mxu1 %v8682_v29  ;;  %v8742_v27 = vld [vmem:[#allocation10 + $0x5e8] ss:$16 sps:$4 sm:$0xff]   ;;  %v8744_v29 = vld [vmem:[#allocation10 + $0x5ec] ss:$16 sps:$4 sm:$0xff]  }
 0x486   : > { %4719 = vmatprep.subr.bf16.mxu0 %v8669_v30  ;;  %6128 = vmatprep.subr.bf16.mxu1 %v8690_v31  ;;  %v8739_v30 = vld [vmem:[#allocation10 + $0x5e0] ss:$16 sps:$4 sm:$0xff]   ;;  %v8750_v31 = vld [vmem:[#allocation10 + $0x60c] ss:$16 sps:$4 sm:$0xff]  }
 0x489   : > { %4720 = vmatpush1.bf16.msra.mxu0 %v8667_v32  ;;  %6129 = vmatpush1.bf16.msra.mxu1 %v8688_v25  ;;  %v8747_v32 = vld [vmem:[#allocation10 + $0x604] ss:$16 sps:$4 sm:$0xff]   ;;  %v8748_v25 = vld [vmem:[#allocation10 + $0x608] ss:$16 sps:$4 sm:$0xff]  }
 0x48a   : > { %4721 = vmatprep.subr.bf16.mxu0 %v8672_v33  ;;  %6130 = vmatprep.subr.bf16.mxu1 %v8696_v34  ;;  %v8745_v33 = vld [vmem:[#allocation10 + $0x600] ss:$16 sps:$4 sm:$0xff]   ;;  %v8756_v34 = vld [vmem:[#allocation10 + $0x62c] ss:$16 sps:$4 sm:$0xff]  }
 0x48d   : > { %4722 = vmatpush1.bf16.msra.mxu0 %v8670_v35  ;;  %6131 = vmatpush1.bf16.msra.mxu1 %v8694_v18  ;;  %v8753_v35 = vld [vmem:[#allocation10 + $0x624] ss:$16 sps:$4 sm:$0xff]   ;;  %v8754_v18 = vld [vmem:[#allocation10 + $0x628] ss:$16 sps:$4 sm:$0xff]  }
 0x48e   : > { %6001 = vmatprep.subr.bf16.mxu0 %v8675_v5  ;;  %6132 = vmatprep.subr.bf16.mxu1 %v8702_v62  ;;  %v8751_v5 = vld [vmem:[#allocation10 + $0x620] ss:$16 sps:$4 sm:$0xff]   ;;  %v8759_v62 = vld [vmem:[#allocation10 + $0x644] ss:$16 sps:$4 sm:$0xff]  }
 0x490   : > { %4740 = vmatmul.mubr.bf16.vlgmr.msra.gmra.mrb[40].mxu0 %v9881_v3  ;;  %v8709_v3 = vld [vmem:[#allocation10 + $0x540] ss:$16 sps:$4 sm:$0xff]  }
 0x491   : > { %6002 = vmatpush1.bf16.msra.mxu0 %v8673_v55  ;;  %6133 = vmatpush1.bf16.msra.mxu1 %v8700_v44  ;;  %v8762_v55 = vld [vmem:[#allocation10 + $0x64c] ss:$16 sps:$4 sm:$0xff]   ;;  %v8757_v44 = vld [vmem:[#allocation10 + $0x640] ss:$16 sps:$4 sm:$0xff]  }
 0x492   : > { %6003 = vmatprep.subr.bf16.mxu0 %v8681_v45  ;;  %6134 = vmatprep.subr.bf16.mxu1 %v8708_v38  ;;  %v8760_v45 = vld [vmem:[#allocation10 + $0x648] ss:$16 sps:$4 sm:$0xff]   ;;  %v8765_v38 = vld [vmem:[#allocation10 + $0x664] ss:$16 sps:$4 sm:$0xff]  }
 0x495   : > { %6004 = vmatpush1.bf16.msra.mxu0 %v8679_v37  ;;  %6135 = vmatpush1.bf16.msra.mxu1 %v8706_v46  ;;  %v8768_v37 = vld [vmem:[#allocation10 + $0x66c] ss:$16 sps:$4 sm:$0xff]   ;;  %v8763_v46 = vld [vmem:[#allocation10 + $0x660] ss:$16 sps:$4 sm:$0xff]  }
 0x496   : > { %6005 = vmatprep.subr.bf16.mxu0 %v8687_v47  ;;  %6136 = vmatprep.subr.bf16.mxu1 %v8714_v1  ;;  %v8766_v47 = vld [vmem:[#allocation10 + $0x668] ss:$16 sps:$4 sm:$0xff]  }
 0x499   : > { %6006 = vmatpush1.bf16.msra.mxu0 %v8685_v49  ;;  %6137 = vmatpush1.bf16.msra.mxu1 %v8712_v4  ;;  %v8771_v49 = vld [vmem:[#allocation10 + $0x684] ss:$16 sps:$4 sm:$0xff]  }
 0x49a   : > { %6007 = vmatprep.subr.bf16.mxu0 %v8693_v22  ;;  %6138 = vmatprep.subr.bf16.mxu1 %v8720_v7  ;;  %v8774_v22 = vld [vmem:[#allocation10 + $0x68c] ss:$16 sps:$4 sm:$0xff]  }
 0x49d   : > { %6008 = vmatpush1.bf16.msra.mxu0 %v8691_v52  ;;  %6139 = vmatpush1.bf16.msra.mxu1 %v8718_v56 }
 0x49e   : > { %6009 = vmatprep.subr.bf16.mxu0 %v8699_v36  ;;  %6140 = vmatprep.subr.bf16.mxu1 %v8726_v28 }
 0x4a1   : > { %6010 = vmatpush1.bf16.msra.mxu0 %v8697_v53 }
 0x4a2   : > { %6011 = vmatprep.subr.bf16.mxu0 %v8705_v54 }
 0x4a3   : > { %v3685_v58 = vpop.f32.mrb[24].mxu0 }
 0x4a4   : > { %v9892_v60 = vadd.f32 %v3685_v58, %v9884_v9  ;;  %v3687_v59 = vpop.f32.mrb[25].mxu0  ;;  %v8723_v9 = vld [vmem:[#allocation10 + $0x584] ss:$16 sps:$4 sm:$0xff]  }
 0x4a5   : > { %v9895_v48 = vadd.f32 %v3687_v59, %v9887_v10  ;;  %v3689_v61 = vpop.f32.mrb[26].mxu0  ;;  %6012 = vmatpush1.bf16.msra.mxu0 %v8703_v15  ;;  %v8724_v10 = vld [vmem:[#allocation10 + $0x588] ss:$16 sps:$4 sm:$0xff]  }
 0x4a6   : > { %v3690_v2 = vpop.f32.mrb[27].mxu0  ;;  %6013 = vmatprep.subr.bf16.mxu0 %v8711_v63  ;;  %6141 = vmatpush1.bf16.msra.mxu1 %v8724_v10 }
 0x4a7   : > { %6142 = vmatprep.subr.bf16.mxu1 %v8732_v57 }
 0x4a9   : > { %6014 = vmatpush1.bf16.msra.mxu0 %v8709_v3 }
 0x4aa   : > { %6015 = vmatprep.subr.bf16.mxu0 %v8717_v6  ;;  %6143 = vmatpush1.bf16.msra.mxu1 %v8730_v51 }
 0x4ab   : > { %6144 = vmatprep.subr.bf16.mxu1 %v8738_v0 }
 0x4ad   : > { %6016 = vmatpush1.bf16.msra.mxu0 %v8715_v8 }
 0x4ae   : > { %6017 = vmatprep.subr.bf16.mxu0 %v8723_v9  ;;  %6145 = vmatpush1.bf16.msra.mxu1 %v8736_v23 }
 0x4af   : > { %6146 = vmatprep.subr.bf16.mxu1 %v8744_v29 }
 0x4b1   : > { %6018 = vmatpush1.bf16.msra.mxu0 %v8721_v11 }
 0x4b2   : > { %6019 = vmatprep.subr.bf16.mxu0 %v8729_v12  ;;  %6147 = vmatpush1.bf16.msra.mxu1 %v8742_v27 }
 0x4b3   : > { %v3726_v40 = vpop.f32.mrb[16].mxu1  ;;  %6148 = vmatprep.subr.bf16.mxu1 %v8750_v31 }
 0x4b4   : > { %v3728_v14 = vpop.f32.mrb[17].mxu1 }
 0x4b5   : > { %v3730_v16 = vpop.f32.mrb[18].mxu1  ;;  %6020 = vmatpush1.bf16.msra.mxu0 %v8727_v13  ;;  %v9018_v13 = vld [vmem:[#allocation14 + $0x8] sm:$0xff] }
 0x4b6   : > { %v3731_v20 = vpop.f32.mrb[19].mxu1  ;;  %6021 = vmatprep.subr.bf16.mxu0 %v8735_v19  ;;  %6149 = vmatpush1.bf16.msra.mxu1 %v8748_v25  ;;  %v8780_v25 = vld [vmem:[#allocation10 + $0x6ac] ss:$16 sps:$4 sm:$0xff]  }
 0x4b7   : > { %6150 = vmatprep.subr.bf16.mxu1 %v8756_v34  ;;  %v8775_v34 = vld [vmem:[#allocation10 + $0x6a0] ss:$16 sps:$4 sm:$0xff]  }
 0x4b9   : > { %6022 = vmatpush1.bf16.msra.mxu0 %v8733_v21 }
 0x4ba   : > { %6023 = vmatprep.subr.bf16.mxu0 %v8741_v24  ;;  %6151 = vmatpush1.bf16.msra.mxu1 %v8754_v18  ;;  %v471_v18 = vld [vmem:[#allocation14 + $0x28] sm:$0xff] }
 0x4bb   : > { %6152 = vmatprep.subr.bf16.mxu1 %v8762_v55 }
 0x4bd   : > { %6024 = vmatpush1.bf16.msra.mxu0 %v8739_v30  ;;  %v8769_v30 = vld [vmem:[#allocation10 + $0x680] ss:$16 sps:$4 sm:$0xff]  }
 0x4be   : > { %6025 = vmatprep.subr.bf16.mxu0 %v8747_v32  ;;  %6153 = vmatpush1.bf16.msra.mxu1 %v8760_v45  ;;  %v8777_v32 = vld [vmem:[#allocation10 + $0x6a4] ss:$16 sps:$4 sm:$0xff]  }
 0x4bf   : > { %6154 = vmatprep.subr.bf16.mxu1 %v8768_v37 }
 0x4c1   : > { %6026 = vmatpush1.bf16.msra.mxu0 %v8745_v33  ;;  %v470_v33 = vld [vmem:[#allocation14 + $0x20] sm:$0xff] }
 0x4c2   : > { %6027 = vmatprep.subr.bf16.mxu0 %v8753_v35  ;;  %6155 = vmatpush1.bf16.msra.mxu1 %v8766_v47  ;;  %v8778_v35 = vld [vmem:[#allocation10 + $0x6a8] ss:$16 sps:$4 sm:$0xff]  }
 0x4c3   : > { %6165 = vmatprep.subr.bf16.mxu1 %v8774_v22  ;;  %v8784_v47 = vld [vmem:[#allocation10 + $0x6c8] ss:$16 sps:$4 sm:$0xff]  }
 0x4c5   : > { %6028 = vmatpush1.bf16.msra.mxu0 %v8751_v5  ;;  %v8783_v5 = vld [vmem:[#allocation10 + $0x6c4] ss:$16 sps:$4 sm:$0xff]  }
 0x4c6   : > { %6029 = vmatprep.subr.bf16.mxu0 %v8759_v62  ;;  %v8786_v62 = vld [vmem:[#allocation10 + $0x6cc] ss:$16 sps:$4 sm:$0xff]  }
 0x4c9   : > { %6030 = vmatpush1.bf16.msra.mxu0 %v8757_v44 }
 0x4ca   : > { %6031 = vmatprep.subr.bf16.mxu0 %v8765_v38 }
 0x4cd   : > { %6032 = vmatpush1.bf16.msra.mxu0 %v8763_v46  ;;  %v8781_v46 = vld [vmem:[#allocation10 + $0x6c0] ss:$16 sps:$4 sm:$0xff]  }
 0x4ce   : > { %6042 = vmatprep.subr.bf16.mxu0 %v8771_v49 }
 0x4e3   : > { %v3767_v52 = vpop.f32.mrb[28].mxu0 }
 0x4e4   : > { %v3768_v36 = vadd.f32 %v3767_v52, %v3726_v40  ;;  %v3769_v53 = vpop.f32.mrb[29].mxu0  ;;  %v8789_v52 = vld [vmem:[#allocation10 + $0x6e4] ss:$16 sps:$4 sm:$0xff]  }
 0x4e5   : > { %v3770_v54 = vadd.f32 %v3769_v53, %v3728_v14  ;;  %v3771_v15 = vpop.f32.mrb[30].mxu0 }
 0x4e6   : > { %v3772_v58 = vpop.f32.mrb[31].mxu0 }
 0x4e7   : > { %v8787_v58 = vld [vmem:[#allocation10 + $0x6e0] ss:$16 sps:$4 sm:$0xff]  }
 0x4f3   : > { %v4288_v59 = vpop.f32.mrb[20].mxu1 }
 0x4f4   : > { %v4289_v61 = vadd.f32 %v4288_v59, %v9876_v39  ;;  %v4290_v63 = vpop.f32.mrb[21].mxu1  ;;  %v8790_v59 = vld [vmem:[#allocation10 + $0x6e8] ss:$16 sps:$4 sm:$0xff]  }
 0x4f5   : > { %v4291_v1 = vadd.f32 %v4290_v63, %v9879_v50  ;;  %v4292_v2 = vpop.f32.mrb[22].mxu1  ;;  %v9906_v50 = vsub.s32 7, %v9735_v41  ;;  %v8798_v63 = vld [vmem:[#allocation10 + $0x70c] ss:$16 sps:$4 sm:$0xff]  }
 0x4f6   : > { %v4293_v3 = vpop.f32.mrb[23].mxu1  ;;  %v8796_v2 = vld [vmem:[#allocation10 + $0x708] ss:$16 sps:$4 sm:$0xff]  }
 0x4f7   : > { %v4798_v51 = vrot.slane %v9869_v42, %v9906_v50  ;;  %v4802_v40 = vrot.slane %v9018_v13, %v9906_v50  ;;  %v8772_v42 = vld [vmem:[#allocation10 + $0x688] ss:$16 sps:$4 sm:$0xff]   ;;  %v4814_v55 = vrot.slane %v470_v33, %v9906_v50  ;;  %v4818_v45 = vrot.slane %v471_v18, %v9906_v50  ;;  %v8801_v3 = vld [vmem:[#allocation10 + $0x724] ss:$16 sps:$4 sm:$0xff]   ;;  %v8805_v13 = vld [vmem:[#allocation10 + $0x740] ss:$16 sps:$4 sm:$0xff]  }
 0x4f8   : > { %v8831_v33 = vld [vmem:[#allocation10 + $0x7c4] ss:$16 sps:$4 sm:$0xff]   ;;  %v8832_v18 = vld [vmem:[#allocation10 + $0x7c8] ss:$16 sps:$4 sm:$0xff]  }
 0x523   : > { %v4329_v4 = vpop.f32.mrb[32].mxu0 }
 0x524   : > { %v9900_v6 = vadd.f32 %v4329_v4, %v9892_v60  ;;  %v4331_v56 = vpop.f32.mrb[33].mxu0  ;;  %v8804_v4 = vld [vmem:[#allocation10 + $0x72c] ss:$16 sps:$4 sm:$0xff]  }
 0x525   : > { %v9903_v7 = vadd.f32 %v4331_v56, %v9895_v48  ;;  %v4333_v8 = vpop.f32.mrb[34].mxu0  ;;  %v8799_v56 = vld [vmem:[#allocation10 + $0x720] ss:$16 sps:$4 sm:$0xff]  }
 0x526   : > { %v4334_v28 = vpop.f32.mrb[35].mxu0  ;;  %v8802_v8 = vld [vmem:[#allocation10 + $0x728] ss:$16 sps:$4 sm:$0xff]  }
 0x527   : > { %v8807_v28 = vld [vmem:[#allocation10 + $0x744] ss:$16 sps:$4 sm:$0xff]  }
 0x533   : > { %v4370_v9 = vpop.f32.mrb[24].mxu1 }
 0x534   : > { %v4371_v10 = vadd.f32 %v4370_v9, %v3768_v36  ;;  %v4372_v11 = vpop.f32.mrb[25].mxu1  ;;  %v8792_v36 = vld [vmem:[#allocation10 + $0x6ec] ss:$16 sps:$4 sm:$0xff]  }
 0x535   : > { %v4373_v57 = vadd.f32 %v4372_v11, %v3770_v54  ;;  %v4374_v39 = vpop.f32.mrb[26].mxu1  ;;  %v8810_v9 = vld [vmem:[#allocation10 + $0x74c] ss:$16 sps:$4 sm:$0xff]  }
 0x536   : > { %v4375_v12 = vpop.f32.mrb[27].mxu1  ;;  %v9020_v39 = vld [vmem:[#allocation14 + $0x18] sm:$0xff] }
 0x537   : > { %v4810_v12 = vrot.slane %v9020_v39, %v9906_v50 }
 0x543   : > { %v4700_v60 = vpop.f32.mrb[36].mxu0 }
 0x544   : > { %v4789_v48 = vadd.f32 %v4700_v60, %v4289_v61  ;;  %v4702_v14 = vpop.f32.mrb[37].mxu0  ;;  %v8795_v61 = vld [vmem:[#allocation10 + $0x704] ss:$16 sps:$4 sm:$0xff]  }
 0x545   : > { %v4790_v16 = vadd.f32 %v4702_v14, %v4291_v1  ;;  %v4704_v19 = vpop.f32.mrb[38].mxu0  ;;  %v8793_v1 = vld [vmem:[#allocation10 + $0x700] ss:$16 sps:$4 sm:$0xff]  }
 0x546   : > { %v4819_v0 = vadd.f32 %v4798_v51, %v4789_v48  ;;  %v4705_v20 = vpop.f32.mrb[39].mxu0  ;;  %v8816_v19 = vld [vmem:[#allocation10 + $0x76c] ss:$16 sps:$4 sm:$0xff]  }
 0x547   : > { %v4820_v21 = vadd.f32 %v4802_v40, %v4790_v16  ;;  %v8808_v40 = vld [vmem:[#allocation10 + $0x748] ss:$16 sps:$4 sm:$0xff]   ;;  %v8813_v16 = vld [vmem:[#allocation10 + $0x764] ss:$16 sps:$4 sm:$0xff]  }
 0x548   : > { %vm4825_vm0 = vcmp.gt.f32.partialorder %v4819_v0, 0.0  ;;  %v4831_v23 = vmul.f32 0.2, %v4819_v0 }
 0x549   : > { %v4832_v24 = vmul.f32 0.2, %v4820_v21  ;;  %vm4826_vm1 = vcmp.gt.f32.partialorder %v4820_v21, 0.0 }
 0x54a   : > { %v4837_v41 = vsel %vm4825_vm0, %v4819_v0, %v4831_v23  ;;  %v8819_v23 = vld [vmem:[#allocation10 + $0x784] ss:$16 sps:$4 sm:$0xff]  }
 0x54b   : > { %v4838_v27 = vsel %vm4826_vm1, %v4820_v21, %v4832_v24  ;;  %v5035_v31 = vpack.c.bf16 %v4837_v41, %v4837_v41  ;;  %v8822_v41 = vld [vmem:[#allocation10 + $0x78c] ss:$16 sps:$4 sm:$0xff]  }
 0x54c   : > { %v5036_v29 = vpack.c.bf16 %v4838_v27, %v4838_v27  ;;  %v8817_v27 = vld [vmem:[#allocation10 + $0x780] ss:$16 sps:$4 sm:$0xff]  }
 0x54e   : > { %6033 = vmatprep.mubr.bf16.mxu0 %v5036_v29  ;;  %6156 = vmatprep.mubr.bf16.mxu1 %v5036_v29 }
 0x54f   : > { %6034 = vmatmul.mubr.bf16.vlgmr.msra.gmra.mrb[44].mxu0 %v5035_v31  ;;  %6157 = vmatmul.mubr.bf16.vlgmr.msra.gmra.mrb[32].mxu1 %v5035_v31  ;;  %v8828_v31 = vld [vmem:[#allocation10 + $0x7ac] ss:$16 sps:$4 sm:$0xff]  }
 0x550   : > { %6043 = vmatpush1.bf16.msra.mxu0 %v8769_v30  ;;  %6166 = vmatpush1.bf16.msra.mxu1 %v8772_v42  ;;  %v8820_v30 = vld [vmem:[#allocation10 + $0x788] ss:$16 sps:$4 sm:$0xff]   ;;  %v8825_v42 = vld [vmem:[#allocation10 + $0x7a4] ss:$16 sps:$4 sm:$0xff]  }
 0x551   : > { %6044 = vmatprep.subr.bf16.mxu0 %v8777_v32  ;;  %6167 = vmatprep.subr.bf16.mxu1 %v8780_v25  ;;  %v8823_v32 = vld [vmem:[#allocation10 + $0x7a0] ss:$16 sps:$4 sm:$0xff]   ;;  %v8826_v25 = vld [vmem:[#allocation10 + $0x7a8] ss:$16 sps:$4 sm:$0xff]  }
 0x553   : > { %v4782_v44 = vpop.f32.mrb[28].mxu1 }
 0x554   : > { %v4793_v38 = vadd.f32 %v4782_v44, %v4371_v10  ;;  %6045 = vmatpush1.bf16.msra.mxu0 %v8775_v34  ;;  %6168 = vmatpush1.bf16.msra.mxu1 %v8778_v35  ;;  %v4784_v37 = vpop.f32.mrb[29].mxu1  ;;  %v9019_v10 = vld [vmem:[#allocation14 + $0x10] sm:$0xff]  ;;  %v8834_v34 = vld [vmem:[#allocation10 + $0x7cc] ss:$16 sps:$4 sm:$0xff]   ;;  %v8838_v44 = vld [vmem:[#allocation10 + $0x7e8] ss:$16 sps:$4 sm:$0xff]  }
 0x555   : > { %v4794_v49 = vadd.f32 %v4784_v37, %v4373_v57  ;;  %v4786_v22 = vpop.f32.mrb[30].mxu1  ;;  %6046 = vmatprep.subr.bf16.mxu0 %v8783_v5  ;;  %6169 = vmatprep.subr.bf16.mxu1 %v8786_v62  ;;  %v4806_v11 = vrot.slane %v9019_v10, %v9906_v50  ;;  %v8811_v50 = vld [vmem:[#allocation10 + $0x760] ss:$16 sps:$4 sm:$0xff]   ;;  %v8837_v5 = vld [vmem:[#allocation10 + $0x7e4] ss:$16 sps:$4 sm:$0xff]  }
 0x556   : > { %v9913_v53 = vadd.f32 %v4814_v55, %v4793_v38  ;;  %v4787_v54 = vpop.f32.mrb[31].mxu1  ;;  %v8829_v35 = vld [vmem:[#allocation10 + $0x7c0] ss:$16 sps:$4 sm:$0xff]   ;;  %v8840_v62 = vld [vmem:[#allocation10 + $0x7ec] ss:$16 sps:$4 sm:$0xff]  }
 0x557   : > { %v9915_v15 = vadd.f32 %v4818_v45, %v4794_v49  ;;  %v8835_v55 = vld [vmem:[#allocation10 + $0x7e0] ss:$16 sps:$4 sm:$0xff]   ;;  %v8843_v45 = vld [vmem:[#allocation10 + $0x804] ss:$16 sps:$4 sm:$0xff]   ;;  %v8846_v38 = vld [vmem:[#allocation10 + $0x80c] ss:$16 sps:$4 sm:$0xff]  }
 0x558   : > { %6047 = vmatpush1.bf16.msra.mxu0 %v8781_v46  ;;  %6170 = vmatpush1.bf16.msra.mxu1 %v8784_v47  ;;  %v8841_v37 = vld [vmem:[#allocation10 + $0x800] ss:$16 sps:$4 sm:$0xff]   ;;  %v8844_v46 = vld [vmem:[#allocation10 + $0x808] ss:$16 sps:$4 sm:$0xff]   ;;  %v8849_v47 = vld [vmem:[#allocation10 + $0x824] ss:$16 sps:$4 sm:$0xff]  }
 0x559   : > { %6048 = vmatprep.subr.bf16.mxu0 %v8789_v52  ;;  %6171 = vmatprep.subr.bf16.mxu1 %v8792_v36  ;;  %v8852_v49 = vld [vmem:[#allocation10 + $0x82c] ss:$16 sps:$4 sm:$0xff]   ;;  %v8847_v22 = vld [vmem:[#allocation10 + $0x820] ss:$16 sps:$4 sm:$0xff]   ;;  %v8850_v52 = vld [vmem:[#allocation10 + $0x828] ss:$16 sps:$4 sm:$0xff]  }
 0x55a   : > { %v8855_v36 = vld [vmem:[#allocation10 + $0x844] ss:$16 sps:$4 sm:$0xff]   ;;  %v8858_v54 = vld [vmem:[#allocation10 + $0x84c] ss:$16 sps:$4 sm:$0xff]   ;;  %vm4830_vm4 = vcmp.gt.f32.partialorder %v9915_v15, 0.0  ;;  %vm4829_vm5 = vcmp.gt.f32.partialorder %v9913_v53, 0.0 }
 0x55b   : > { %v8865_v10 = vld [vmem:[#allocation10 + $0x880] ss:$16 sps:$4 sm:$0xff]  }
 0x55c   : > { %6049 = vmatpush1.bf16.msra.mxu0 %v8787_v58  ;;  %6172 = vmatpush1.bf16.msra.mxu1 %v8790_v59  ;;  %v8853_v58 = vld [vmem:[#allocation10 + $0x840] ss:$16 sps:$4 sm:$0xff]   ;;  %v8856_v59 = vld [vmem:[#allocation10 + $0x848] ss:$16 sps:$4 sm:$0xff]  }
 0x55d   : > { %6050 = vmatprep.subr.bf16.mxu0 %v8795_v61  ;;  %6173 = vmatprep.subr.bf16.mxu1 %v8798_v63  ;;  %v8861_v61 = vld [vmem:[#allocation10 + $0x864] ss:$16 sps:$4 sm:$0xff]   ;;  %v8864_v63 = vld [vmem:[#allocation10 + $0x86c] ss:$16 sps:$4 sm:$0xff]  }
 0x560   : > { %6051 = vmatpush1.bf16.msra.mxu0 %v8793_v1  ;;  %6174 = vmatpush1.bf16.msra.mxu1 %v8796_v2  ;;  %v4836_v2 = vmul.f32 0.2, %v9915_v15 }
 0x561   : > { %6052 = vmatprep.subr.bf16.mxu0 %v8801_v3  ;;  %6175 = vmatprep.subr.bf16.mxu1 %v8804_v4  ;;  %v8859_v3 = vld [vmem:[#allocation10 + $0x860] ss:$16 sps:$4 sm:$0xff]   ;;  %v8862_v4 = vld [vmem:[#allocation10 + $0x868] ss:$16 sps:$4 sm:$0xff]  }
 0x563   : > { %v4741_v57 = vpop.f32.mrb[40].mxu0 }
 0x564   : > { %v4791_v51 = vadd.f32 %v4741_v57, %v9900_v6  ;;  %6053 = vmatpush1.bf16.msra.mxu0 %v8799_v56  ;;  %6176 = vmatpush1.bf16.msra.mxu1 %v8802_v8  ;;  %v4743_v60 = vpop.f32.mrb[41].mxu0  ;;  %v8814_v6 = vld [vmem:[#allocation10 + $0x768] ss:$16 sps:$4 sm:$0xff]   ;;  %v8867_v56 = vld [vmem:[#allocation10 + $0x884] ss:$16 sps:$4 sm:$0xff]  }
 0x565   : > { %v4792_v48 = vadd.f32 %v4743_v60, %v9903_v7  ;;  %v4745_v14 = vpop.f32.mrb[42].mxu0  ;;  %6054 = vmatprep.subr.bf16.mxu0 %v8807_v28  ;;  %6177 = vmatprep.subr.bf16.mxu1 %v8810_v9  ;;  %v8870_v8 = vld [vmem:[#allocation10 + $0x88c] ss:$16 sps:$4 sm:$0xff]   ;;  %v4842_v9 = vsel %vm4830_vm4, %v9915_v15, %v4836_v2  ;;  %v8868_v57 = vld [vmem:[#allocation10 + $0x888] ss:$16 sps:$4 sm:$0xff]  }
 0x566   : > { %v9921_v0 = vadd.f32 %v4806_v11, %v4791_v51  ;;  %v4746_v20 = vpop.f32.mrb[43].mxu0  ;;  %v5040_v39 = vpack.c.bf16 %v4842_v9, %v4842_v9  ;;  %v8876_v51 = vld [vmem:[#allocation10 + $0x8ac] ss:$16 sps:$4 sm:$0xff]   ;;  %v8871_v60 = vld [vmem:[#allocation10 + $0x8a0] ss:$16 sps:$4 sm:$0xff]  }
 0x567   : > { %v4822_v21 = vadd.f32 %v4810_v12, %v4792_v48  ;;  %v8873_v12 = vld [vmem:[#allocation10 + $0x8a4] ss:$16 sps:$4 sm:$0xff]   ;;  %v8882_v15 = vld [vmem:[#allocation10 + $0x8cc] ss:$16 sps:$4 sm:$0xff]   ;;  %v8877_v48 = vld [vmem:[#allocation10 + $0x8c0] ss:$16 sps:$4 sm:$0xff]  }
 0x568   : > { %6055 = vmatpush1.bf16.msra.mxu0 %v8805_v13  ;;  %6178 = vmatpush1.bf16.msra.mxu1 %v8808_v40  ;;  %v4833_v1 = vmul.f32 0.2, %v9921_v0  ;;  %vm4827_vm3 = vcmp.gt.f32.partialorder %v9921_v0, 0.0  ;;  %v8874_v13 = vld [vmem:[#allocation10 + $0x8a8] ss:$16 sps:$4 sm:$0xff]  }
 0x569   : > { %v4834_v24 = vmul.f32 0.2, %v4822_v21  ;;  %6056 = vmatprep.subr.bf16.mxu0 %v8813_v16  ;;  %6179 = vmatprep.subr.bf16.mxu1 %v8816_v19  ;;  %vm4828_vm2 = vcmp.gt.f32.partialorder %v4822_v21, 0.0  ;;  %v8879_v40 = vld [vmem:[#allocation10 + $0x8c4] ss:$16 sps:$4 sm:$0xff]  }
 0x56a   : > { %v4839_v28 = vsel %vm4827_vm3, %v9921_v0, %v4833_v1  ;;  %v8880_v14 = vld [vmem:[#allocation10 + $0x8c8] ss:$16 sps:$4 sm:$0xff]   ;;  %v8885_v16 = vld [vmem:[#allocation10 + $0x8e4] ss:$16 sps:$4 sm:$0xff]   ;;  %v8888_v19 = vld [vmem:[#allocation10 + $0x8ec] ss:$16 sps:$4 sm:$0xff]  }
 0x56b   : > { %v4840_v7 = vsel %vm4828_vm2, %v4822_v21, %v4834_v24  ;;  %v5037_v11 = vpack.c.bf16 %v4839_v28, %v4839_v28  ;;  %v8883_v0 = vld [vmem:[#allocation10 + $0x8e0] ss:$16 sps:$4 sm:$0xff]   ;;  %v8886_v20 = vld [vmem:[#allocation10 + $0x8e8] ss:$16 sps:$4 sm:$0xff]   ;;  %v8891_v21 = vld [vmem:[#allocation10 + $0x904] ss:$16 sps:$4 sm:$0xff]  }
 0x56c   : > { %6057 = vmatpush1.bf16.msra.mxu0 %v8811_v50  ;;  %6180 = vmatpush1.bf16.msra.mxu1 %v8814_v6  ;;  %v5038_v29 = vpack.c.bf16 %v4840_v7, %v4840_v7  ;;  %v8894_v50 = vld [vmem:[#allocation10 + $0x90c] ss:$16 sps:$4 sm:$0xff]   ;;  %v8889_v6 = vld [vmem:[#allocation10 + $0x900] ss:$16 sps:$4 sm:$0xff]   ;;  %v8897_v24 = vld [vmem:[#allocation10 + $0x924] ss:$16 sps:$4 sm:$0xff]  }
 0x56d   : > { %6058 = vmatprep.subr.bf16.mxu0 %v8819_v23  ;;  %6181 = vmatprep.subr.bf16.mxu1 %v8822_v41  ;;  %v8892_v23 = vld [vmem:[#allocation10 + $0x908] ss:$16 sps:$4 sm:$0xff]   ;;  %v8900_v41 = vld [vmem:[#allocation10 + $0x92c] ss:$16 sps:$4 sm:$0xff]   ;;  %v8895_v7 = vld [vmem:[#allocation10 + $0x920] ss:$16 sps:$4 sm:$0xff]  }
 0x56e   : > { %6074 = vmatprep.mubr.bf16.mxu0 %v5038_v29  ;;  %6197 = vmatprep.mubr.bf16.mxu1 %v5038_v29  ;;  %v8903_v29 = vld [vmem:[#allocation10 + $0x944] ss:$16 sps:$4 sm:$0xff]   ;;  %v8948_v2 = vld [vmem:[#allocation10 + $0xa2c] ss:$16 sps:$4 sm:$0xff]   ;;  %v8949_v28 = vld [vmem:[#allocation10 + $0xa40] ss:$16 sps:$4 sm:$0xff]  }
 0x56f   : > { %v8945_v1 = vld [vmem:[#allocation10 + $0xa24] ss:$16 sps:$4 sm:$0xff]   ;;  %v8952_v9 = vld [vmem:[#allocation10 + $0xa48] ss:$16 sps:$4 sm:$0xff]  }
 0x570   : > { %6059 = vmatpush1.bf16.msra.mxu0 %v8817_v27  ;;  %6182 = vmatpush1.bf16.msra.mxu1 %v8820_v30  ;;  %v8898_v27 = vld [vmem:[#allocation10 + $0x928] ss:$16 sps:$4 sm:$0xff]   ;;  %v8906_v30 = vld [vmem:[#allocation10 + $0x94c] ss:$16 sps:$4 sm:$0xff]  }
 0x571   : > { %6060 = vmatprep.subr.bf16.mxu0 %v8825_v42  ;;  %6183 = vmatprep.subr.bf16.mxu1 %v8828_v31  ;;  %v8901_v42 = vld [vmem:[#allocation10 + $0x940] ss:$16 sps:$4 sm:$0xff]   ;;  %v8904_v31 = vld [vmem:[#allocation10 + $0x948] ss:$16 sps:$4 sm:$0xff]  }
 0x574   : > { %6061 = vmatpush1.bf16.msra.mxu0 %v8823_v32  ;;  %6184 = vmatpush1.bf16.msra.mxu1 %v8826_v25  ;;  %v8909_v32 = vld [vmem:[#allocation10 + $0x964] ss:$16 sps:$4 sm:$0xff]   ;;  %v8912_v25 = vld [vmem:[#allocation10 + $0x96c] ss:$16 sps:$4 sm:$0xff]  }
 0x575   : > { %6062 = vmatprep.subr.bf16.mxu0 %v8831_v33  ;;  %6185 = vmatprep.subr.bf16.mxu1 %v8834_v34  ;;  %v8907_v33 = vld [vmem:[#allocation10 + $0x960] ss:$16 sps:$4 sm:$0xff]   ;;  %v8910_v34 = vld [vmem:[#allocation10 + $0x968] ss:$16 sps:$4 sm:$0xff]  }
 0x578   : > { %6063 = vmatpush1.bf16.msra.mxu0 %v8829_v35  ;;  %6186 = vmatpush1.bf16.msra.mxu1 %v8832_v18  ;;  %v8915_v35 = vld [vmem:[#allocation10 + $0x984] ss:$16 sps:$4 sm:$0xff]   ;;  %v8918_v18 = vld [vmem:[#allocation10 + $0x98c] ss:$16 sps:$4 sm:$0xff]  }
 0x579   : > { %6064 = vmatprep.subr.bf16.mxu0 %v8837_v5  ;;  %6187 = vmatprep.subr.bf16.mxu1 %v8840_v62  ;;  %v8913_v5 = vld [vmem:[#allocation10 + $0x980] ss:$16 sps:$4 sm:$0xff]   ;;  %v8916_v62 = vld [vmem:[#allocation10 + $0x988] ss:$16 sps:$4 sm:$0xff]  }
 0x57c   : > { %6065 = vmatpush1.bf16.msra.mxu0 %v8835_v55  ;;  %6188 = vmatpush1.bf16.msra.mxu1 %v8838_v44  ;;  %v8921_v55 = vld [vmem:[#allocation10 + $0x9a4] ss:$16 sps:$4 sm:$0xff]   ;;  %v8924_v44 = vld [vmem:[#allocation10 + $0x9ac] ss:$16 sps:$4 sm:$0xff]  }
 0x57d   : > { %6066 = vmatprep.subr.bf16.mxu0 %v8843_v45  ;;  %6189 = vmatprep.subr.bf16.mxu1 %v8846_v38  ;;  %v8919_v45 = vld [vmem:[#allocation10 + $0x9a0] ss:$16 sps:$4 sm:$0xff]   ;;  %v8922_v38 = vld [vmem:[#allocation10 + $0x9a8] ss:$16 sps:$4 sm:$0xff]  }
 0x580   : > { %6067 = vmatpush1.bf16.msra.mxu0 %v8841_v37  ;;  %6190 = vmatpush1.bf16.msra.mxu1 %v8844_v46  ;;  %v8927_v37 = vld [vmem:[#allocation10 + $0x9c4] ss:$16 sps:$4 sm:$0xff]   ;;  %v8930_v46 = vld [vmem:[#allocation10 + $0x9cc] ss:$16 sps:$4 sm:$0xff]  }
 0x581   : > { %6068 = vmatprep.subr.bf16.mxu0 %v8849_v47  ;;  %6191 = vmatprep.subr.bf16.mxu1 %v8852_v49  ;;  %v8925_v47 = vld [vmem:[#allocation10 + $0x9c0] ss:$16 sps:$4 sm:$0xff]   ;;  %v8928_v49 = vld [vmem:[#allocation10 + $0x9c8] ss:$16 sps:$4 sm:$0xff]  }
 0x584   : > { %6069 = vmatpush1.bf16.msra.mxu0 %v8847_v22  ;;  %6192 = vmatpush1.bf16.msra.mxu1 %v8850_v52  ;;  %v8933_v22 = vld [vmem:[#allocation10 + $0x9e4] ss:$16 sps:$4 sm:$0xff]   ;;  %v8936_v52 = vld [vmem:[#allocation10 + $0x9ec] ss:$16 sps:$4 sm:$0xff]  }
 0x585   : > { %6070 = vmatprep.subr.bf16.mxu0 %v8855_v36  ;;  %6193 = vmatprep.subr.bf16.mxu1 %v8858_v54  ;;  %v8931_v36 = vld [vmem:[#allocation10 + $0x9e0] ss:$16 sps:$4 sm:$0xff]   ;;  %v8934_v54 = vld [vmem:[#allocation10 + $0x9e8] ss:$16 sps:$4 sm:$0xff]  }
 0x588   : > { %6071 = vmatpush1.bf16.msra.mxu0 %v8853_v58  ;;  %6194 = vmatpush1.bf16.msra.mxu1 %v8856_v59  ;;  %v8939_v58 = vld [vmem:[#allocation10 + $0xa04] ss:$16 sps:$4 sm:$0xff]   ;;  %v8942_v59 = vld [vmem:[#allocation10 + $0xa0c] ss:$16 sps:$4 sm:$0xff]  }
 0x589   : > { %6072 = vmatprep.subr.bf16.mxu0 %v8861_v61  ;;  %6195 = vmatprep.subr.bf16.mxu1 %v8864_v63  ;;  %v8937_v61 = vld [vmem:[#allocation10 + $0xa00] ss:$16 sps:$4 sm:$0xff]   ;;  %v8940_v63 = vld [vmem:[#allocation10 + $0xa08] ss:$16 sps:$4 sm:$0xff]  }
 0x58c   : > { %6073 = vmatpush1.bf16.msra.mxu0 %v8859_v3  ;;  %6196 = vmatpush1.bf16.msra.mxu1 %v8862_v4  ;;  %v8943_v3 = vld [vmem:[#allocation10 + $0xa20] ss:$16 sps:$4 sm:$0xff]   ;;  %v8946_v4 = vld [vmem:[#allocation10 + $0xa28] ss:$16 sps:$4 sm:$0xff]  }
 0x58d   : > { %6083 = vmatprep.subr.bf16.mxu0 %v8867_v56  ;;  %6206 = vmatprep.subr.bf16.mxu1 %v8870_v8  ;;  %v8951_v56 = vld [vmem:[#allocation10 + $0xa44] ss:$16 sps:$4 sm:$0xff]   ;;  %v8954_v8 = vld [vmem:[#allocation10 + $0xa4c] ss:$16 sps:$4 sm:$0xff]  }
 0x58f   : > { %6075 = vmatmul.mubr.bf16.vlgmr.msra.gmra.mrb[44].mxu0 %v5037_v11  ;;  %6198 = vmatmul.mubr.bf16.vlgmr.msra.gmra.mrb[32].mxu1 %v5037_v11  ;;  %v4835_v11 = vmul.f32 0.2, %v9913_v53 }
 0x590   : > { %6084 = vmatpush1.bf16.msra.mxu0 %v8865_v10  ;;  %6115 = vmatprep.mubr.bf16.mxu0 %v5040_v39  ;;  %v8957_v10 = vld [vmem:[#allocation10 + $0xa64] ss:$16 sps:$4 sm:$0xff]  }
 0x591   : > { %6207 = vmatpush1.bf16.msra.mxu1 %v8868_v57  ;;  %6238 = vmatprep.mubr.bf16.mxu1 %v5040_v39  ;;  %v8960_v57 = vld [vmem:[#allocation10 + $0xa6c] ss:$16 sps:$4 sm:$0xff]   ;;  %v8955_v39 = vld [vmem:[#allocation10 + $0xa60] ss:$16 sps:$4 sm:$0xff]  }
 0x592   : > { %6085 = vmatprep.subr.bf16.mxu0 %v8873_v12  ;;  %6208 = vmatprep.subr.bf16.mxu1 %v8876_v51  ;;  %v8958_v12 = vld [vmem:[#allocation10 + $0xa68] ss:$16 sps:$4 sm:$0xff]   ;;  %v4841_v51 = vsel %vm4829_vm5, %v9913_v53, %v4835_v11  ;;  %v8969_v53 = vld [vmem:[#allocation11 + $0x60] sm:$0xff]  }
 0x594   : > { %6086 = vmatpush1.bf16.msra.mxu0 %v8871_v60  ;;  %v5039_v60 = vpack.c.bf16 %v4841_v51, %v4841_v51 }
 0x595   : > { %6209 = vmatpush1.bf16.msra.mxu1 %v8874_v13  ;;  %6087 = vmatprep.subr.bf16.mxu0 %v8879_v40  ;;  %v8961_v13 = vld [vmem:[#allocation11 + $0x50] sm:$0xff]  }
 0x596   : > { %6210 = vmatprep.subr.bf16.mxu1 %v8882_v15  ;;  %v8962_v40 = vld [vmem:[#allocation11 + $0xd0] sm:$0xff]  }
 0x597   : > { %v8963_v15 = vld [vmem:[#allocation11 + $0x10] sm:$0xff]  }
 0x598   : > { %6088 = vmatpush1.bf16.msra.mxu0 %v8877_v48  ;;  %v8964_v48 = vld [vmem:[#allocation11 + $0x90] sm:$0xff]  }
 0x599   : > { %6211 = vmatpush1.bf16.msra.mxu1 %v8880_v14  ;;  %6089 = vmatprep.subr.bf16.mxu0 %v8885_v16  ;;  %v8965_v14 = vld [vmem:[#allocation11 + $0x58] sm:$0xff]  }
 0x59a   : > { %6212 = vmatprep.subr.bf16.mxu1 %v8888_v19  ;;  %v8966_v16 = vld [vmem:[#allocation11 + $0xd8] sm:$0xff]  }
 0x59b   : > { %v8967_v19 = vld [vmem:[#allocation11 + $0x18] sm:$0xff]  }
 0x59c   : > { %6090 = vmatpush1.bf16.msra.mxu0 %v8883_v0  ;;  %v8968_v0 = vld [vmem:[#allocation11 + $0x98] sm:$0xff]  }
 0x59d   : > { %6213 = vmatpush1.bf16.msra.mxu1 %v8886_v20  ;;  %6091 = vmatprep.subr.bf16.mxu0 %v8891_v21  ;;  %v8970_v20 = vld [vmem:[#allocation11 + $0xe0] sm:$0xff]  }
 0x59e   : > { %6214 = vmatprep.subr.bf16.mxu1 %v8894_v50  ;;  %v8971_v21 = vld [vmem:[#allocation11 + $0x20] sm:$0xff]  }
 0x59f   : > { %v8972_v50 = vld [vmem:[#allocation11 + $0xa0] sm:$0xff]  }
 0x5a0   : > { %6092 = vmatpush1.bf16.msra.mxu0 %v8889_v6  ;;  %v8973_v6 = vld [vmem:[#allocation11 + $0x68] sm:$0xff]  }
 0x5a1   : > { %6215 = vmatpush1.bf16.msra.mxu1 %v8892_v23  ;;  %6093 = vmatprep.subr.bf16.mxu0 %v8897_v24  ;;  %v8974_v23 = vld [vmem:[#allocation11 + $0xe8] sm:$0xff]  }
 0x5a2   : > { %6216 = vmatprep.subr.bf16.mxu1 %v8900_v41  ;;  %v8975_v24 = vld [vmem:[#allocation11 + $0x28] sm:$0xff]  }
 0x5a3   : > { %v8976_v41 = vld [vmem:[#allocation11 + $0xa8] sm:$0xff]  }
 0x5a4   : > { %6094 = vmatpush1.bf16.msra.mxu0 %v8895_v7  ;;  %v8977_v7 = vld [vmem:[#allocation11 + $0x70] sm:$0xff]  }
 0x5a5   : > { %6217 = vmatpush1.bf16.msra.mxu1 %v8898_v27  ;;  %6095 = vmatprep.subr.bf16.mxu0 %v8903_v29  ;;  %v8978_v27 = vld [vmem:[#allocation11 + $0xf0] sm:$0xff]  }
 0x5a6   : > { %6218 = vmatprep.subr.bf16.mxu1 %v8906_v30  ;;  %v8979_v29 = vld [vmem:[#allocation11 + $0x30] sm:$0xff]  }
 0x5a7   : > { %v8980_v30 = vld [vmem:[#allocation11 + $0xb0] sm:$0xff]  }
 0x5a8   : > { %6096 = vmatpush1.bf16.msra.mxu0 %v8901_v42  ;;  %v8981_v42 = vld [vmem:[#allocation11 + $0x78] sm:$0xff]  }
 0x5a9   : > { %6219 = vmatpush1.bf16.msra.mxu1 %v8904_v31  ;;  %6097 = vmatprep.subr.bf16.mxu0 %v8909_v32  ;;  %v8982_v31 = vld [vmem:[#allocation11 + $0xf8] sm:$0xff]  }
 0x5aa   : > { %6220 = vmatprep.subr.bf16.mxu1 %v8912_v25  ;;  %v8983_v32 = vld [vmem:[#allocation11 + $0x38] sm:$0xff]  }
 0x5ab   : > { %v8984_v25 = vld [vmem:[#allocation11 + $0xb8] sm:$0xff]  }
 0x5ac   : > { %6098 = vmatpush1.bf16.msra.mxu0 %v8907_v33  ;;  %v8985_v33 = vld [vmem:[#allocation11 + $0x80] sm:$0xff]  }
 0x5ad   : > { %6221 = vmatpush1.bf16.msra.mxu1 %v8910_v34  ;;  %6099 = vmatprep.subr.bf16.mxu0 %v8915_v35  ;;  %v8986_v34 = vld [vmem:[#allocation11 + $0x100] sm:$0xff]  }
 0x5ae   : > { %6222 = vmatprep.subr.bf16.mxu1 %v8918_v18  ;;  %v8987_v35 = vld [vmem:[#allocation11 + $0x40] sm:$0xff]  }
 0x5af   : > { %v8988_v18 = vld [vmem:[#allocation11 + $0xc0] sm:$0xff]  }
 0x5b0   : > { %6100 = vmatpush1.bf16.msra.mxu0 %v8913_v5  ;;  %v8989_v5 = vld [vmem:[#allocation11 + $0x88] sm:$0xff]  }
 0x5b1   : > { %6223 = vmatpush1.bf16.msra.mxu1 %v8916_v62  ;;  %6101 = vmatprep.subr.bf16.mxu0 %v8921_v55  ;;  %v8990_v62 = vld [vmem:[#allocation11 + $0x108] sm:$0xff]  }
 0x5b2   : > { %6224 = vmatprep.subr.bf16.mxu1 %v8924_v44  ;;  %v8991_v55 = vld [vmem:[#allocation11 + $0x48] sm:$0xff]  }
 0x5b3   : > { %v8992_v44 = vld [vmem:[#allocation11 + $0xc8] sm:$0xff]  }
 0x5b4   : > { %6102 = vmatpush1.bf16.msra.mxu0 %v8919_v45 }
 0x5b5   : > { %6225 = vmatpush1.bf16.msra.mxu1 %v8922_v38  ;;  %6103 = vmatprep.subr.bf16.mxu0 %v8927_v37 }
 0x5b6   : > { %6226 = vmatprep.subr.bf16.mxu1 %v8930_v46 }
 0x5b8   : > { %6104 = vmatpush1.bf16.msra.mxu0 %v8925_v47 }
 0x5b9   : > { %6227 = vmatpush1.bf16.msra.mxu1 %v8928_v49  ;;  %6105 = vmatprep.subr.bf16.mxu0 %v8933_v22 }
 0x5ba   : > { %6228 = vmatprep.subr.bf16.mxu1 %v8936_v52 }
 0x5bc   : > { %6106 = vmatpush1.bf16.msra.mxu0 %v8931_v36 }
 0x5bd   : > { %6229 = vmatpush1.bf16.msra.mxu1 %v8934_v54  ;;  %6107 = vmatprep.subr.bf16.mxu0 %v8939_v58 }
 0x5be   : > { %6230 = vmatprep.subr.bf16.mxu1 %v8942_v59 }
 0x5c0   : > { %6108 = vmatpush1.bf16.msra.mxu0 %v8937_v61 }
 0x5c1   : > { %6231 = vmatpush1.bf16.msra.mxu1 %v8940_v63  ;;  %6109 = vmatprep.subr.bf16.mxu0 %v8945_v1 }
 0x5c2   : > { %6232 = vmatprep.subr.bf16.mxu1 %v8948_v2 }
 0x5c4   : > { %6110 = vmatpush1.bf16.msra.mxu0 %v8943_v3 }
 0x5c5   : > { %6233 = vmatpush1.bf16.msra.mxu1 %v8946_v4  ;;  %6111 = vmatprep.subr.bf16.mxu0 %v8951_v56 }
 0x5c6   : > { %6234 = vmatprep.subr.bf16.mxu1 %v8954_v8 }
 0x5c8   : > { %6112 = vmatpush1.bf16.msra.mxu0 %v8949_v28 }
 0x5c9   : > { %6235 = vmatpush1.bf16.msra.mxu1 %v8952_v9  ;;  %6113 = vmatprep.subr.bf16.mxu0 %v8957_v10 }
 0x5ca   : > { %6236 = vmatprep.subr.bf16.mxu1 %v8960_v57 }
 0x5cc   : > { %6114 = vmatpush1.bf16.msra.mxu0 %v8955_v39 }
 0x5cd   : > { %6237 = vmatpush1.bf16.msra.mxu1 %v8958_v12  ;;  %7683 = vmatprep.subr.bf16.mxu0 %v8961_v13 }
 0x5ce   : > { %7705 = vmatprep.subr.bf16.mxu1 %v8962_v40 }
 0x5cf   : > { %6116 = vmatmul.mubr.bf16.vlgmr.msra.gmra.mrb[44].mxu0 %v5039_v60 }
 0x5d0   : > { %6239 = vmatmul.mubr.bf16.vlgmr.msra.gmra.mrb[32].mxu1 %v5039_v60  ;;  %7684 = vmatpush3.bf16.msra.mxu0 %v8963_v15 }
 0x5d1   : > { %7706 = vmatpush3.bf16.msra.mxu1 %v8964_v48  ;;  %7685 = vmatprep.subr.bf16.mxu0 %v8965_v14 }
 0x5d2   : > { %7707 = vmatprep.subr.bf16.mxu1 %v8966_v16 }
 0x5d4   : > { %7686 = vmatpush3.bf16.msra.mxu0 %v8967_v19 }
 0x5d5   : > { %7708 = vmatpush3.bf16.msra.mxu1 %v8968_v0  ;;  %7687 = vmatprep.subr.bf16.mxu0 %v8969_v53 }
 0x5d6   : > { %7709 = vmatprep.subr.bf16.mxu1 %v8970_v20 }
 0x5d8   : > { %7688 = vmatpush3.bf16.msra.mxu0 %v8971_v21 }
 0x5d9   : > { %7710 = vmatpush3.bf16.msra.mxu1 %v8972_v50  ;;  %7689 = vmatprep.subr.bf16.mxu0 %v8973_v6 }
 0x5da   : > { %7711 = vmatprep.subr.bf16.mxu1 %v8974_v23 }
 0x5dc   : > { %7690 = vmatpush3.bf16.msra.mxu0 %v8975_v24 }
 0x5dd   : > { %7712 = vmatpush3.bf16.msra.mxu1 %v8976_v41  ;;  %7691 = vmatprep.subr.bf16.mxu0 %v8977_v7 }
 0x5de   : > { %7713 = vmatprep.subr.bf16.mxu1 %v8978_v27 }
 0x5e0   : > { %7692 = vmatpush3.bf16.msra.mxu0 %v8979_v29 }
 0x5e1   : > { %7714 = vmatpush3.bf16.msra.mxu1 %v8980_v30  ;;  %7693 = vmatprep.subr.bf16.mxu0 %v8981_v42 }
 0x5e2   : > { %7715 = vmatprep.subr.bf16.mxu1 %v8982_v31 }
 0x5e4   : > { %7694 = vmatpush3.bf16.msra.mxu0 %v8983_v32 }
 0x5e5   : > { %7716 = vmatpush3.bf16.msra.mxu1 %v8984_v25  ;;  %7695 = vmatprep.subr.bf16.mxu0 %v8985_v33 }
 0x5e6   : > { %7717 = vmatprep.subr.bf16.mxu1 %v8986_v34 }
 0x5e8   : > { %7696 = vmatpush3.bf16.msra.mxu0 %v8987_v35 }
 0x5e9   : > { %7718 = vmatpush3.bf16.msra.mxu1 %v8988_v18  ;;  %7697 = vmatprep.subr.bf16.mxu0 %v8989_v5 }
 0x5ea   : > { %7719 = vmatprep.subr.bf16.mxu1 %v8990_v62 }
 0x5ec   : > { %7698 = vmatpush3.bf16.msra.mxu0 %v8991_v55 }
 0x5ed   : > { %7720 = vmatpush3.bf16.msra.mxu1 %v8992_v44 }
 0x6a2   : > { %v6117_v45 = vpop.f32.mrb[44].mxu0 }
 0x6a3   : > { %v6247_v38 = vrot.slane %v6117_v45, 4  ;;  %v6240_v37 = vpop.f32.mrb[32].mxu1  ;;  %v6119_v46 = vpop.f32.mrb[45].mxu0 }
 0x6a4   : > { %v6259_v47 = vrot.slane %v6240_v37, 4  ;;  %v6253_v49 = vrot.slane %v6119_v46, 4  ;;  %v6242_v22 = vpop.f32.mrb[33].mxu1  ;;  %v6121_v52 = vpop.f32.mrb[46].mxu0 }
 0x6a5   : > { %v6248_v36 = vadd.f32 %v6247_v38, %v6117_v45  ;;  %v6265_v54 = vrot.slane %v6242_v22, 4  ;;  %v6244_v58 = vpop.f32.mrb[34].mxu1  ;;  %v6122_v59 = vpop.f32.mrb[47].mxu0 }
 0x6a6   : > { %v6260_v61 = vadd.f32 %v6259_v47, %v6240_v37  ;;  %v6254_v63 = vadd.f32 %v6253_v49, %v6119_v46  ;;  %v6245_v1 = vpop.f32.mrb[35].mxu1 }
 0x6a7   : > { %v6249_v2 = vrot.slane %v6248_v36, 2  ;;  %v6266_v3 = vadd.f32 %v6265_v54, %v6242_v22 }
 0x6a8   : > { %v6261_v4 = vrot.slane %v6260_v61, 2  ;;  %v6255_v56 = vrot.slane %v6254_v63, 2 }
 0x6a9   : > { %v6250_v8 = vadd.f32 %v6249_v2, %v6248_v36  ;;  %v6267_v28 = vrot.slane %v6266_v3, 2  ;;  %v472_v2 = vld [vmem:[#allocation14 + $0x30] sm:$0x7] }
 0x6aa   : > { %v6262_v9 = vadd.f32 %v6261_v4, %v6260_v61  ;;  %v6256_v10 = vadd.f32 %v6255_v56, %v6254_v63  ;;  %v473_v4 = vld [vmem:[#allocation14 + $0x38] sm:$0x7]  ;;  %v6326_v56 = vrot.slane %v472_v2, %v9738_v43 }
 0x6ab   : > { %v6251_v11 = vrot.slane %v6250_v8, 1  ;;  %v6268_v57 = vadd.f32 %v6267_v28, %v6266_v3  ;;  %v474_v3 = vld [vmem:[#allocation14 + $0x40] sm:$0x7] }
 0x6ac   : > { %v6263_v39 = vrot.slane %v6262_v9, 1  ;;  %v6257_v12 = vrot.slane %v6256_v10, 1 }
 0x6ad   : > { %v6252_v51 = vadd.f32 %v6251_v11, %v6250_v8  ;;  %v6269_v60 = vrot.slane %v6268_v57, 1  ;;  %v475_v8 = vld [vmem:[#allocation14 + $0x48] sm:$0x7] }
 0x6ae   : > { %v6264_v13 = vadd.f32 %v6263_v39, %v6262_v9  ;;  %v6258_v40 = vadd.f32 %v6257_v12, %v6256_v10  ;;  %v6334_v9 = vrot.slane %v474_v3, %v9738_v43  ;;  %v6330_v39 = vrot.slane %v473_v4, %v9738_v43 }
 0x6af   : > { %v6271_v15 = vmul.f32 0.125, %v6252_v51  ;;  %v6270_v48 = vadd.f32 %v6269_v60, %v6268_v57  ;;  %v6346_v57 = vrot.slane %v472_v2, %v9830_v17  ;;  %v6354_v60 = vrot.slane %v474_v3, %v9830_v17 }
 0x6b0   : > { %v6273_v14 = vmul.f32 0.125, %v6264_v13  ;;  %v6272_v16 = vmul.f32 0.125, %v6258_v40  ;;  %v6338_v13 = vrot.slane %v475_v8, %v9738_v43 }
 0x6b1   : > { %v6275_v19 = vsub.f32 %v6117_v45, %v6271_v15  ;;  %v6274_v0 = vmul.f32 0.125, %v6270_v48 }
 0x6b2   : > { %v6277_v53 = vsub.f32 %v6240_v37, %v6273_v14  ;;  %v6276_v20 = vsub.f32 %v6119_v46, %v6272_v16  ;;  %v6350_v14 = vrot.slane %v473_v4, %v9830_v17 }
 0x6b3   : > { %v6279_v21 = vmul.f32 %v6275_v19, %v6275_v19  ;;  %v6278_v50 = vsub.f32 %v6242_v22, %v6274_v0 }
 0x6b4   : > { %v6281_v6 = vmul.f32 %v6277_v53, %v6277_v53  ;;  %v6280_v23 = vmul.f32 %v6276_v20, %v6276_v20 }
 0x6b5   : > { %v6283_v24 = vrot.slane %v6279_v21, 4  ;;  %v6282_v41 = vmul.f32 %v6278_v50, %v6278_v50 }
 0x6b6   : > { %v6295_v7 = vrot.slane %v6281_v6, 4  ;;  %v6289_v27 = vrot.slane %v6280_v23, 4 }
 0x6b7   : > { %v6284_v29 = vadd.f32 %v6283_v24, %v6279_v21  ;;  %v6301_v30 = vrot.slane %v6282_v41, 4  ;;  %v6358_v21 = vrot.slane %v475_v8, %v9830_v17 }
 0x6b8   : > { %v6296_v42 = vadd.f32 %v6295_v7, %v6281_v6  ;;  %v6290_v31 = vadd.f32 %v6289_v27, %v6280_v23 }
 0x6b9   : > { %v6285_v32 = vrot.slane %v6284_v29, 2  ;;  %v6302_v25 = vadd.f32 %v6301_v30, %v6282_v41 }
 0x6ba   : > { %v6297_v33 = vrot.slane %v6296_v42, 2  ;;  %v6291_v34 = vrot.slane %v6290_v31, 2 }
 0x6bb   : > { %v6286_v35 = vadd.f32 %v6285_v32, %v6284_v29  ;;  %v6303_v18 = vrot.slane %v6302_v25, 2 }
 0x6bc   : > { %v6298_v5 = vadd.f32 %v6297_v33, %v6296_v42  ;;  %v6292_v62 = vadd.f32 %v6291_v34, %v6290_v31  ;;  %v6446_v34 = vrot.slane %v472_v2, %v9833_v26 }
 0x6bd   : > { %v6287_v55 = vrot.slane %v6286_v35, 1  ;;  %v6304_v44 = vadd.f32 %v6303_v18, %v6302_v25 }
 0x6be   : > { %v6299_v45 = vrot.slane %v6298_v5, 1  ;;  %v6293_v38 = vrot.slane %v6292_v62, 1 }
 0x6bf   : > { %v6288_v37 = vadd.f32 %v6287_v55, %v6286_v35  ;;  %v6305_v46 = vrot.slane %v6304_v44, 1 }
 0x6c0   : > { %v6300_v47 = vadd.f32 %v6299_v45, %v6298_v5  ;;  %v6294_v49 = vadd.f32 %v6293_v38, %v6292_v62 }
 0x6c1   : > { %v6307_v22 = vmul.f32 0.125, %v6288_v37  ;;  %v6306_v52 = vadd.f32 %v6305_v46, %v6304_v44 }
 0x6c2   : > { %v6309_v36 = vmul.f32 0.125, %v6300_v47  ;;  %v6308_v54 = vmul.f32 0.125, %v6294_v49 }
 0x6c3   : > { %v6311_v58 = vadd.f32 1e-05, %v6307_v22  ;;  %v6310_v59 = vmul.f32 0.125, %v6306_v52 }
 0x6c4   : > { %v6313_v61 = vadd.f32 1e-05, %v6309_v36  ;;  %v6312_v63 = vadd.f32 1e-05, %v6308_v54 }
 0x6c5   : > { %9005 = vrsqrt.f32 %v6311_v58  ;;  %v6314_v1 = vadd.f32 1e-05, %v6310_v59 }
 0x6c6   : > { %9007 = vrsqrt.f32 %v6313_v61 }
 0x6c7   : > { %9009 = vrsqrt.f32 %v6312_v63 }
 0x6c8   : > { %9011 = vrsqrt.f32 %v6314_v1 }
 0x6cf   : > { %v9006_v28 = vpop.eup %9005 }
 0x6d0   : > { %v9008_v10 = vpop.eup %9007  ;;  %v6319_v11 = vmul.f32 %v9006_v28, %v6275_v19 }
 0x6d1   : > { %v9010_v12 = vpop.eup %9009  ;;  %v6321_v51 = vmul.f32 %v9008_v10, %v6277_v53 }
 0x6d2   : > { %v9012_v40 = vpop.eup %9011  ;;  %v6339_v15 = vmul.f32 %v6326_v56, %v6319_v11  ;;  %v6320_v48 = vmul.f32 %v9010_v12, %v6276_v20 }
 0x6d3   : > { %v6341_v16 = vmul.f32 %v6334_v9, %v6321_v51  ;;  %v6322_v0 = vmul.f32 %v9012_v40, %v6278_v50 }
 0x6d4   : > { %v6359_v19 = vadd.f32 %v6346_v57, %v6339_v15  ;;  %v6340_v6 = vmul.f32 %v6330_v39, %v6320_v48 }
 0x6d5   : > { %v6361_v23 = vadd.f32 %v6354_v60, %v6341_v16  ;;  %v6342_v24 = vmul.f32 %v6338_v13, %v6322_v0 }
 0x6d6   : > { %v6360_v41 = vadd.f32 %v6350_v14, %v6340_v6  ;;  %vm6363_vm6 = vcmp.gt.f32.partialorder %v6359_v19, 0.0  ;;  %v6367_v53 = vmul.f32 0.2, %v6359_v19 }
 0x6d7   : > { %v6362_v7 = vadd.f32 %v6358_v21, %v6342_v24  ;;  %vm6365_vm7 = vcmp.gt.f32.partialorder %v6361_v23, 0.0  ;;  %v6369_v27 = vmul.f32 0.2, %v6361_v23 }
 0x6d8   : > { %vm6364_vm8 = vcmp.gt.f32.partialorder %v6360_v41, 0.0  ;;  %v6368_v43 = vmul.f32 0.2, %v6360_v41  ;;  %v6371_v29 = vsel %vm6363_vm6, %v6359_v19, %v6367_v53 }
 0x6d9   : > { %vm6366_vm9 = vcmp.gt.f32.partialorder %v6362_v7, 0.0  ;;  %v6370_v20 = vmul.f32 0.2, %v6362_v7  ;;  %v6373_v42 = vsel %vm6365_vm7, %v6361_v23, %v6369_v27  ;;  %v6439_v32 = vpack.c.bf16 %v6371_v29, %v6371_v29 }
 0x6da   : > { %v6372_v30 = vsel %vm6364_vm8, %v6360_v41, %v6368_v43  ;;  %v6441_v25 = vpack.c.bf16 %v6373_v42, %v6373_v42 }
 0x6db   : > { %v6440_v50 = vpack.c.bf16 %v6372_v30, %v6372_v30  ;;  %v6374_v31 = vsel %vm6366_vm9, %v6362_v7, %v6370_v20 }
 0x6dc   : > { %v6442_v17 = vpack.c.bf16 %v6374_v31, %v6374_v31 }
 0x6dd   : > { %6671 = vmatprep.mubr.bf16.mxu0 %v6440_v50 }
 0x6de   : > { %6711 = vmatprep.mubr.bf16.mxu1 %v6442_v17  ;;  %6672 = vmatmul.mubr.bf16.vlgmr.msra.gmra.mrb[48].mxu0 %v6439_v32 }
 0x6df   : > { %6712 = vmatmul.mubr.bf16.vlgmr.msra.gmra.mrb[36].mxu1 %v6441_v25 }
 0x7b1   : > { %v7699_v33 = vpop.f32.mrb[48].mxu0 }
 0x7b2   : > { %v7721_v35 = vpop.f32.mrb[36].mxu1  ;;  %v7700_v18 = vpop.f32.mrb[49].mxu0 }
 0x7b3   : > { %v7701_v5 = vadd.f32 %v7700_v18, %v7699_v33  ;;  %v7722_v62 = vpop.f32.mrb[37].mxu1  ;;  %v7702_v55 = vpop.f32.mrb[50].mxu0 }
 0x7b4   : > { %v7723_v44 = vadd.f32 %v7722_v62, %v7721_v35  ;;  %v7724_v45 = vpop.f32.mrb[38].mxu1  ;;  %v7703_v38 = vpop.f32.mrb[51].mxu0 }
 0x7b5   : > { %v6674_v37 = vadd.f32 %v7701_v5, %v6446_v34  ;;  %v7725_v46 = vpop.f32.mrb[39].mxu1 }
 0x7b7   : > { %v6714_v47 = vadd.f32 %v7723_v44, %v6674_v37 }
 0x7b9   : > { %6719 = vst [vmem:[%s464_s23] sm:$0xff] %v6714_v47 }
 0x7ba   : > { %9264 = shalt.err (!%p9261_p1)
}
 0x7bb   : > { %s9265_s16 = scalar_lea.hbm %s9946_s3, 128  ;;  %s9269_s9 = scalar_lea.hbm %s10055_s5, 512 }
 0x7bc   : > { %p9266_p11 = scmp.ne.s32.totalorder %s9946_s3, %s9265_s16  ;;  %p9270_p6 = scmp.lt.u32.totalorder %s9946_s3, %s10055_s5 }
 0x7bd   : > { %p9271_p8 = scmp.lt.u32.totalorder %s9269_s9, %s9265_s16  ;;  %p9273_p13 = scmp.lt.u32.totalorder %s9265_s16, %s9946_s3 }
 0x7be   : > { %p9267_p12 = pnand %p9266_p11, %p10056_p5 }
 0x7bf   : > { %p9272_p3 = por %p9271_p8, %p9270_p6 }
 0x7c0   : > { %p9268_p0 = pneg %p9267_p12 }
 0x7c1   : > { %p9274_p7 = por %p9273_p13, %p9272_p3 }
 0x7c3   : > { %p9275_p4 = pnand %p9274_p7, %p9268_p0 }
 0x7c5   : > { %9278 = shalt.err (!%p9275_p4)
}
 0x7c6   : > { %7785 = dma.vmem_to_hbm [thread:$0]  (%p10056_p5), %s9948_s26, 128, %s9946_s3, %s6721_s30  }
 0x7c7 PF: > { %s10057_s21 = sld [smem:[#allocation24_spill]]  ;;  %s10058_s12 = sld [smem:[#allocation23_spill]] }
 0x7c8   : > { %s10059_s19 = sld [smem:[#allocation28_spill]] }
 0x7cd   : > { %p7828_p2 = scmp.ge.s32.totalorder %s10057_s21, 2  ;;  %s6746_s25 = sand.u32 1, %s10058_s12  }
 0x7ce   : > { %p10060_p9 = scmp.ne.s32.totalorder %s10059_s19, 0  ;;  %s6747_s15 = scalar_lea.sflag [#allocation4], %s6746_s25 }
 0x7d0   : > { %p7814_p10 = pnand %p7828_p2, %p10060_p9 }
 0x7d2   : > { %9316 = dma.done.wait (!%p7814_p10), %s6747_s15, 128  }
 0x7d3   : > { %9318 = vsyncadd (!%p7814_p10), %s6747_s15, 4294967168  ;;  %s10061_s30 = sld [smem:[#allocation25_spill]]  ;;  %s10062_s14 = sld [smem:[#allocation26_spill]] }
 0x7d4   : > { %s10063_s27 = smov %s9325_s28  ;;  %s10064_s28 = smov %s9329_s29 }
 0x7d9   : > { %p27_p1 = scmp.ge.s32.totalorder %s10061_s30, 6   ;;  %s10065_s29 = smov %s10062_s14 }
 0x7db   :  { %29 = sbr.rel (!%p27_p1) target bundleno = 15 (0xf), region = 141 }
 0x7e2   :  { %6752 = vsyncpa [#allocation3], 1 }
 0x7e3   :  { %6754 = vsyncpa [#allocation3 + $0x1], 1 }
 0x7e4   :  { %6755 = vsyncpa [#allocation6], 1 }
 0x7e5   :  { %6757 = vsyncpa [#allocation6 + $0x1], 1 }
 0x7e6   :  { %6758 = vsyncpa [#allocation9], 1 }
 0x7e7   :  { %6759 = vsyncpa [#allocation12], 1 }
 0x7e8   :  { %6760 = vsyncpa [#allocation15], 1 }
 0x7e9   :  { %6761 = vsyncpa [#allocation4], 1 }
 0x7ea   :  { %6763 = vsyncpa [#allocation4 + $0x1], 1 }

</bundles_post_ra>
